<compile_context>
chip_gen: v7x
topology: tpu7x:2x2x1
jax: 0.10.0
libtpu: 0.0.40
codegen_flags: <defaults>
</compile_context>

<pallas_src>
import math
import jax
import jax.numpy as jnp
from jax import lax
from jax.experimental import pallas as pl
from jax.experimental.pallas import tpu as pltpu

# ---------------- static configuration (small shapes consistent with the module) -----------
B, S, D    = 2, 16, 32          # batch, seq_len (== CRF MaxLen), input_dim
N_LABELS   = 5                  # decoder label_size
L2         = N_LABELS + 2       # CRF label_size (pad_logits adds 2 columns of -1000)
START, END = L2 - 2, L2 - 1
LP         = 128                # label dim padded to a full lane register
H, KD, VD  = 3, 16, 16          # num_heads, key_dim, val_dim
DH         = D // 2             # Linears hidden size
NEG        = -1e9               # padding value that can never win a max

# packed-weight buffer layout (rows 8-aligned so every in-kernel window is tile-aligned)
WC      = H * (2 * KD + VD)     # 144 = width of the fused QKV projection
OFF_QKV = 0                     # rows [  0, 32): wqkv   (D, 144)   (Q block pre-scaled)
OFF_OW1 = OFF_QKV + D           # rows [ 32, 80): W_ow1  (H*VD, DH) (wo @ w1 folded)
OFF_W2  = OFF_OW1 + H * VD      # rows [ 80, 96): w2p    (DH, LP)   (fused pad_logits)
OFF_TR  = OFF_W2 + DH           # rows [ 96,104): trans8 (8, LP)    (CRF transitions)
WR      = OFF_TR + 8            # 104


# ---------------- fused kernel: MHA + MLP + pad_logits + Viterbi decode --------------------
def attn_crf_kernel(lens_ref, x_ref, wpack_ref, bias_ref, preds_ref):
    b = pl.program_id(0)
    len_b = lens_ref[b]                                          # scalar (SMEM prefetch)

    # ---- packed parameter views (static, tile-aligned windows of the 2 packed buffers) ----
    wqkv   = wpack_ref[pl.ds(OFF_QKV, D), :]                     # (32, 144)  [Q|K|V], head-major
    w_ow1  = wpack_ref[pl.ds(OFF_OW1, H * VD), pl.ds(0, DH)]     # (48, 16)   wo @ w1
    w2p    = wpack_ref[pl.ds(OFF_W2, DH), pl.ds(0, LP)]          # (16, 128)
    trans8 = wpack_ref[pl.ds(OFF_TR, 8), pl.ds(0, LP)]           # (8, 128)   rows/cols >= L2 NEG
    bqkv   = bias_ref[pl.ds(0, 1), :]                            # (1, 144)
    b_ow1  = bias_ref[pl.ds(1, 1), pl.ds(0, DH)]                 # (1, 16)    bo @ w1 + b1
    b2p    = bias_ref[pl.ds(2, 1), pl.ds(0, LP)]                 # (1, 128)
    t_end  = bias_ref[pl.ds(3, 1), pl.ds(0, LP)]                 # (1, 128)   transition[end]

    # ---- attention key mask computed in-kernel from the prefetched length ------------------
    kpos = lax.broadcasted_iota(jnp.int32, (1, S), 1)
    madd = jnp.where(kpos < len_b, 0.0, -10000.0)                # (1, S) additive key mask

    # ---- multi-head attention (head-fused QKV projection, 1/sqrt(KD) folded into wq) -------
    x = x_ref[0]                                                 # (S, D)
    qkv = jnp.dot(x, wqkv, preferred_element_type=jnp.float32) + bqkv       # (S, 144)
    ko, vo = H * KD, 2 * H * KD
    ctx = []
    for h in range(H):                                           # static, small head count
        qh = qkv[:, h * KD:(h + 1) * KD]                         # (S, KD)  (already scaled)
        kh = qkv[:, ko + h * KD:ko + (h + 1) * KD]               # (S, KD)
        vh = qkv[:, vo + h * VD:vo + (h + 1) * VD]               # (S, VD)
        s = lax.dot_general(qh, kh, (((1,), (1,)), ((), ())),
                            preferred_element_type=jnp.float32) + madd      # (S, S)
        s = s - jnp.max(s, axis=-1, keepdims=True)
        p = jnp.exp(s)
        p = p * pl.reciprocal(jnp.sum(p, axis=-1, keepdims=True), approx=True)
        ctx.append(jnp.dot(p, vh, preferred_element_type=jnp.float32))      # (S, VD)
    ctx_cat = jnp.concatenate(ctx, axis=1)                       # (S, H*VD)

    # ---- Linears MLP (tanh hidden); wo folded into w_ow1, CRF.pad_logits fused into w2p ----
    h1 = jnp.tanh(jnp.dot(ctx_cat, w_ow1, preferred_element_type=jnp.float32) + b_ow1)
    # columns [N_LABELS, L2) have zero weight and bias -1000 (== pad_logits); columns >= L2
    # have bias NEG (layout padding, never selected).
    logits = jnp.dot(h1, w2p, preferred_element_type=jnp.float32) + b2p     # (S, LP)

    # ---- CRF Viterbi forward recursion (to-label axis on sublanes, L2=7 real labels) -------
    lane  = lax.broadcasted_iota(jnp.int32, (1, LP), 1)
    sub8  = lax.broadcasted_iota(jnp.int32, (8, LP), 0)
    lane8 = lax.broadcasted_iota(jnp.int32, (8, LP), 1)
    diag  = sub8 == lane8                                        # column->row "transpose" mask
    real  = lane < L2

    vit = jnp.where(lane == START, 0.0, jnp.where(real, -100.0, NEG)).astype(jnp.float32)
    bp_rows = []                                                 # per-step backpointers (vregs)
    for t in range(S):                                           # static unroll (S = 16)
        m = vit + trans8                                         # (8,LP): m[i,j]=vit[j]+T[i,j]
        vt_col = jnp.max(m, axis=1, keepdims=True)               # (8, 1)  per to-label max
        # backpointer (first-occurrence argmax over source labels), OFF the vit chain
        bp_col = jnp.min(jnp.where(m >= vt_col, lane8, LP),
                         axis=1, keepdims=True)                  # (8, 1) int32
        bp_rows.append(jnp.sum(jnp.where(diag, bp_col, 0),
                               axis=0, keepdims=True))           # (1, LP) int32
        vt_row = jnp.max(jnp.where(diag, vt_col, NEG),
                         axis=0, keepdims=True)                  # (1, LP) column -> row
        vit_nxt = vt_row + logits[t:t + 1, :]
        c = len_b - t                                            # remaining length
        vit = jnp.where(c > 0,
                        jnp.where(c == 1, vit_nxt + t_end, vit_nxt),
                        vit)

    # ---- backtrack: gather through the materialized backpointer rows ------------------------
    vit = jnp.where(real, vit, NEG)                              # single pad-lane re-pin
    smax = jnp.max(vit, axis=1, keepdims=True)
    idx = jnp.min(jnp.where(vit >= smax, lane, LP), axis=1, keepdims=True)   # (1,1) int32
    preds = jnp.where(lane == S - 1, idx, 0)                                 # (1,LP) int32
    for k in range(1, S):                                        # static unroll
        bp_row = bp_rows[S - k]                                  # pointers of timestep S-k
        idx = jnp.sum(jnp.where(lane == idx, bp_row, 0),
                      axis=1, keepdims=True)                     # gather bp_row[idx]
        preds = jnp.where(lane == S - 1 - k, idx, preds)
    preds_ref[0] = preds                                         # lane-dense (1, LP) write


# ---------------- wrapper -------------------------------------------------------------------
def attn_crf_decoder_forward(params, inputs, labels_mask):
    """AttnCRFDecoder.forward: returns predicted label paths (B, S) int32."""
    lens = labels_mask.sum(-1).astype(jnp.int32)                 # (B,) -> SMEM scalar prefetch

    grid_spec = pltpu.PrefetchScalarGridSpec(
        num_scalar_prefetch=1,
        grid=(B,),
        in_specs=[pl.BlockSpec((1, S, D), lambda b, _: (b, 0, 0)),
                  pl.BlockSpec((WR, WC), lambda b, _: (0, 0)),
                  pl.BlockSpec((8, WC), lambda b, _: (0, 0))],
        out_specs=pl.BlockSpec((1, 1, LP), lambda b, _: (b, 0, 0)),
    )
    preds = pl.pallas_call(
        attn_crf_kernel,
        out_shape=jax.ShapeDtypeStruct((B, 1, LP), jnp.int32),
        grid_spec=grid_spec,
        compiler_params=pltpu.CompilerParams(dimension_semantics=("parallel",)),
    )(lens, inputs, params["wpack"], params["bias"])
    return preds.reshape(B, LP)[:, :S]


# ---------------- deterministic parameter construction --------------------------------------
def init_params(key):
    ks = jax.random.split(key, 13)
    w = lambda k, shape: 0.1 * jax.random.normal(k, shape, jnp.float32)
    wq, bq = w(ks[0], (H, D, KD)), w(ks[1], (H, KD))
    wk, bk = w(ks[2], (H, D, KD)), w(ks[3], (H, KD))
    wv, bv = w(ks[4], (H, D, VD)), w(ks[5], (H, VD))
    wo, bo = w(ks[6], (H, VD, D)), w(ks[7], (D,))
    w1, b1 = w(ks[8], (D, DH)), w(ks[9], (DH,))
    w2, b2 = w(ks[10], (DH, N_LABELS)), w(ks[11], (N_LABELS,))

    # CRF transition (label_size = N_LABELS + 2), initialized as CRF.__init__/initialize.
    trans = jax.random.normal(ks[12], (L2, L2), jnp.float32)
    trans = trans.at[:, END].set(-100.0)
    trans = trans.at[START, :].set(-100.0)

    # head-fused QKV projection (head-major columns matching the kernel slices);
    # the 1/sqrt(KD) attention scale is folded into the Q weights/bias.
    scale = 1.0 / math.sqrt(KD)
    wqkv = jnp.concatenate(
        [jnp.transpose(wq, (1, 0, 2)).reshape(D, H * KD) * scale,
         jnp.transpose(wk, (1, 0, 2)).reshape(D, H * KD),
         jnp.transpose(wv, (1, 0, 2)).reshape(D, H * VD)], axis=1)                  # (D, 144)
    bqkv = jnp.concatenate([bq.reshape(-1) * scale, bk.reshape(-1), bv.reshape(-1)])  # (144,)

    # fold the MHA output projection into the MLP first layer (host-side, one-time).
    wo_cat = wo.reshape(H * VD, D)                                # (48, D)
    w_ow1 = wo_cat @ w1                                           # (48, DH)
    b_ow1 = bo @ w1 + b1                                          # (DH,)

    # MLP output layer padded to LP lanes; fuses CRF.pad_logits (-1000 pad columns).
    w2p = jnp.zeros((DH, LP), jnp.float32).at[:, :N_LABELS].set(w2)
    b2p = jnp.full((LP,), NEG, jnp.float32).at[N_LABELS:L2].set(-1000.0).at[:N_LABELS].set(b2)

    # CRF transitions on a sublane-aligned (8, LP) tile (rows/cols >= L2 padded with NEG),
    # plus the transition[end] row (pad lanes 0 = neutral).
    trans8 = jnp.full((8, LP), NEG, jnp.float32).at[:L2, :L2].set(trans)
    t_end = jnp.zeros((LP,), jnp.float32).at[:L2].set(trans[END])

    # one packed weight buffer + one packed bias buffer (2 parameter DMAs total).
    wpack = jnp.zeros((WR, WC), jnp.float32)
    wpack = wpack.at[OFF_QKV:OFF_QKV + D, :].set(wqkv)
    wpack = wpack.at[OFF_OW1:OFF_OW1 + H * VD, :DH].set(w_ow1)
    wpack = wpack.at[OFF_W2:OFF_W2 + DH, :LP].set(w2p)
    wpack = wpack.at[OFF_TR:OFF_TR + 8, :LP].set(trans8)

    bias = jnp.zeros((8, WC), jnp.float32)
    bias = bias.at[0, :WC].set(bqkv)
    bias = bias.at[1, :DH].set(b_ow1)
    bias = bias.at[2, :LP].set(b2p)
    bias = bias.at[3, :LP].set(t_end)

    return dict(wpack=wpack, bias=bias)


if __name__ == "__main__":
    key = jax.random.PRNGKey(0)
    kp, kx = jax.random.split(key)
    params = init_params(kp)

    inputs = jax.random.normal(kx, (B, S, D), jnp.float32)
    labels_mask = jnp.array([[1] * S,
                             [1] * 9 + [0] * (S - 9)], dtype=jnp.int32)   # lens = [16, 9]

    preds = attn_crf_decoder_forward(params, inputs, labels_mask)
    preds = jax.block_until_ready(preds)

    assert preds.shape == (B, S) and preds.dtype == jnp.int32
    assert bool(jnp.all((preds >= 0) & (preds < L2)))
    print("KERNEL_OK")
</pallas_src>

<mosaic_0001>
module attributes {stable_mosaic.version = 11 : i64} {
  func.func @attn_crf_kernel(%arg0: i32, %arg1: memref<2xi32, #tpu.memory_space<smem>>, %arg2: memref<1x16x32xf32, #tpu.memory_space<vmem>>, %arg3: memref<104x144xf32, #tpu.memory_space<vmem>>, %arg4: memref<8x144xf32, #tpu.memory_space<vmem>>, %arg5: memref<1x1x128xi32, #tpu.memory_space<vmem>>) attributes {dimension_semantics = [#tpu.dimension_semantics<parallel>], iteration_bounds = array<i64: 2>, scalar_prefetch = 1 : i64, scratch_operands = 0 : i64, tpu.core_type = #tpu.core_type<tc>, window_params = [{transform_indices = @transform_0, window_bounds = array<i64: 1, 16, 32>}, {pipeline_mode = #tpu.pipeline_mode<synchronous>, transform_indices = @transform_1, window_bounds = array<i64: 104, 144>}, {pipeline_mode = #tpu.pipeline_mode<synchronous>, transform_indices = @transform_2, window_bounds = array<i64: 8, 144>}, {transform_indices = @transform_3, window_bounds = array<i64: 1, 1, 128>}]} {
    %0 = arith.index_cast %arg0 : i32 to index
    %1 = memref.load %arg1[%0] : memref<2xi32, #tpu.memory_space<smem>>
    %c0 = arith.constant 0 : index
    %c0_0 = arith.constant 0 : index
    %2 = vector.load %arg3[%c0, %c0_0] : memref<104x144xf32, #tpu.memory_space<vmem>>, vector<32x144xf32>
    %c32 = arith.constant 32 : index
    %c0_1 = arith.constant 0 : index
    %3 = vector.load %arg3[%c32, %c0_1] : memref<104x144xf32, #tpu.memory_space<vmem>>, vector<48x16xf32>
    %c80 = arith.constant 80 : index
    %c0_2 = arith.constant 0 : index
    %4 = vector.load %arg3[%c80, %c0_2] : memref<104x144xf32, #tpu.memory_space<vmem>>, vector<16x128xf32>
    %c96 = arith.constant 96 : index
    %c0_3 = arith.constant 0 : index
    %5 = vector.load %arg3[%c96, %c0_3] : memref<104x144xf32, #tpu.memory_space<vmem>>, vector<8x128xf32>
    %c0_4 = arith.constant 0 : index
    %c0_5 = arith.constant 0 : index
    %6 = vector.load %arg4[%c0_4, %c0_5] : memref<8x144xf32, #tpu.memory_space<vmem>>, vector<1x144xf32>
    %c1 = arith.constant 1 : index
    %c0_6 = arith.constant 0 : index
    %7 = vector.load %arg4[%c1, %c0_6] : memref<8x144xf32, #tpu.memory_space<vmem>>, vector<1x16xf32>
    %c2 = arith.constant 2 : index
    %c0_7 = arith.constant 0 : index
    %8 = vector.load %arg4[%c2, %c0_7] : memref<8x144xf32, #tpu.memory_space<vmem>>, vector<1x128xf32>
    %c3 = arith.constant 3 : index
    %c0_8 = arith.constant 0 : index
    %9 = vector.load %arg4[%c3, %c0_8] : memref<8x144xf32, #tpu.memory_space<vmem>>, vector<1x128xf32>
    %10 = tpu.iota {dimensions = array<i32: 1>} : vector<1x16xi32>
    %11 = vector.broadcast %1 : i32 to vector<1x16xi32>
    %12 = arith.cmpi slt, %10, %11 : vector<1x16xi32>
    %cst = arith.constant 0.000000e+00 : f32
    %cst_9 = arith.constant -1.000000e+04 : f32
    %13 = vector.broadcast %cst : f32 to vector<1x16xf32>
    %14 = vector.broadcast %cst_9 : f32 to vector<1x16xf32>
    %15 = arith.select %12, %13, %14 : vector<1x16xi1>, vector<1x16xf32>
    %c0_10 = arith.constant 0 : index
    %c0_11 = arith.constant 0 : index
    %c0_12 = arith.constant 0 : index
    %16 = vector.load %arg2[%c0_10, %c0_11, %c0_12] : memref<1x16x32xf32, #tpu.memory_space<vmem>>, vector<1x16x32xf32>
    %17 = vector.shape_cast %16 : vector<1x16x32xf32> to vector<16x32xf32>
    %cst_13 = arith.constant dense<0.000000e+00> : vector<16x144xf32>
    %18 = tpu.matmul %17, %2, %cst_13 {dimension_numbers = #tpu.dot_dimension_numbers<[1], [0], [0], [1], [0, 0, 1, 1], [], []>} : vector<16x32xf32>, vector<32x144xf32>, vector<16x144xf32> -> vector<16x144xf32>
    %19 = vector.broadcast %6 : vector<1x144xf32> to vector<16x144xf32>
    %20 = arith.addf %18, %19 : vector<16x144xf32>
    %21 = vector.extract_strided_slice %20 {offsets = [0, 0], sizes = [16, 16], strides = [1, 1]} : vector<16x144xf32> to vector<16x16xf32>
    %22 = vector.extract_strided_slice %20 {offsets = [0, 48], sizes = [16, 16], strides = [1, 1]} : vector<16x144xf32> to vector<16x16xf32>
    %23 = vector.extract_strided_slice %20 {offsets = [0, 96], sizes = [16, 16], strides = [1, 1]} : vector<16x144xf32> to vector<16x16xf32>
    %cst_14 = arith.constant dense<0.000000e+00> : vector<16x16xf32>
    %24 = tpu.matmul %21, %22, %cst_14 {dimension_numbers = #tpu.dot_dimension_numbers<[1], [1], [0], [0], [0, 0, 1, 0], [], []>} : vector<16x16xf32>, vector<16x16xf32>, vector<16x16xf32> -> vector<16x16xf32>
    %25 = vector.broadcast %15 : vector<1x16xf32> to vector<16x16xf32>
    %26 = arith.addf %24, %25 : vector<16x16xf32>
    %cst_15 = arith.constant dense<0xFF800000> : vector<16xf32>
    %27 = vector.multi_reduction <maximumf>, %26, %cst_15 [1] : vector<16x16xf32> to vector<16xf32>
    %28 = vector.shape_cast %27 : vector<16xf32> to vector<16x1xf32>
    %29 = vector.broadcast %28 : vector<16x1xf32> to vector<16x16xf32>
    %30 = arith.subf %26, %29 : vector<16x16xf32>
    %31 = math.exp %30 : vector<16x16xf32>
    %cst_16 = arith.constant dense<0.000000e+00> : vector<16xf32>
    %32 = vector.multi_reduction <add>, %31, %cst_16 [1] : vector<16x16xf32> to vector<16xf32>
    %33 = vector.shape_cast %32 : vector<16xf32> to vector<16x1xf32>
    %34 = tpu.reciprocal %33 {approx = true} : vector<16x1xf32> -> vector<16x1xf32>
    %35 = vector.broadcast %34 : vector<16x1xf32> to vector<16x16xf32>
    %36 = arith.mulf %31, %35 : vector<16x16xf32>
    %cst_17 = arith.constant dense<0.000000e+00> : vector<16x16xf32>
    %37 = tpu.matmul %36, %23, %cst_17 {dimension_numbers = #tpu.dot_dimension_numbers<[1], [0], [0], [1], [0, 0, 1, 1], [], []>} : vector<16x16xf32>, vector<16x16xf32>, vector<16x16xf32> -> vector<16x16xf32>
    %38 = vector.extract_strided_slice %20 {offsets = [0, 16], sizes = [16, 16], strides = [1, 1]} : vector<16x144xf32> to vector<16x16xf32>
    %39 = vector.extract_strided_slice %20 {offsets = [0, 64], sizes = [16, 16], strides = [1, 1]} : vector<16x144xf32> to vector<16x16xf32>
    %40 = vector.extract_strided_slice %20 {offsets = [0, 112], sizes = [16, 16], strides = [1, 1]} : vector<16x144xf32> to vector<16x16xf32>
    %cst_18 = arith.constant dense<0.000000e+00> : vector<16x16xf32>
    %41 = tpu.matmul %38, %39, %cst_18 {dimension_numbers = #tpu.dot_dimension_numbers<[1], [1], [0], [0], [0, 0, 1, 0], [], []>} : vector<16x16xf32>, vector<16x16xf32>, vector<16x16xf32> -> vector<16x16xf32>
    %42 = vector.broadcast %15 : vector<1x16xf32> to vector<16x16xf32>
    %43 = arith.addf %41, %42 : vector<16x16xf32>
    %cst_19 = arith.constant dense<0xFF800000> : vector<16xf32>
    %44 = vector.multi_reduction <maximumf>, %43, %cst_19 [1] : vector<16x16xf32> to vector<16xf32>
    %45 = vector.shape_cast %44 : vector<16xf32> to vector<16x1xf32>
    %46 = vector.broadcast %45 : vector<16x1xf32> to vector<16x16xf32>
    %47 = arith.subf %43, %46 : vector<16x16xf32>
    %48 = math.exp %47 : vector<16x16xf32>
    %cst_20 = arith.constant dense<0.000000e+00> : vector<16xf32>
    %49 = vector.multi_reduction <add>, %48, %cst_20 [1] : vector<16x16xf32> to vector<16xf32>
    %50 = vector.shape_cast %49 : vector<16xf32> to vector<16x1xf32>
    %51 = tpu.reciprocal %50 {approx = true} : vector<16x1xf32> -> vector<16x1xf32>
    %52 = vector.broadcast %51 : vector<16x1xf32> to vector<16x16xf32>
    %53 = arith.mulf %48, %52 : vector<16x16xf32>
    %cst_21 = arith.constant dense<0.000000e+00> : vector<16x16xf32>
    %54 = tpu.matmul %53, %40, %cst_21 {dimension_numbers = #tpu.dot_dimension_numbers<[1], [0], [0], [1], [0, 0, 1, 1], [], []>} : vector<16x16xf32>, vector<16x16xf32>, vector<16x16xf32> -> vector<16x16xf32>
    %55 = vector.extract_strided_slice %20 {offsets = [0, 32], sizes = [16, 16], strides = [1, 1]} : vector<16x144xf32> to vector<16x16xf32>
    %56 = vector.extract_strided_slice %20 {offsets = [0, 80], sizes = [16, 16], strides = [1, 1]} : vector<16x144xf32> to vector<16x16xf32>
    %57 = vector.extract_strided_slice %20 {offsets = [0, 128], sizes = [16, 16], strides = [1, 1]} : vector<16x144xf32> to vector<16x16xf32>
    %cst_22 = arith.constant dense<0.000000e+00> : vector<16x16xf32>
    %58 = tpu.matmul %55, %56, %cst_22 {dimension_numbers = #tpu.dot_dimension_numbers<[1], [1], [0], [0], [0, 0, 1, 0], [], []>} : vector<16x16xf32>, vector<16x16xf32>, vector<16x16xf32> -> vector<16x16xf32>
    %59 = vector.broadcast %15 : vector<1x16xf32> to vector<16x16xf32>
    %60 = arith.addf %58, %59 : vector<16x16xf32>
    %cst_23 = arith.constant dense<0xFF800000> : vector<16xf32>
    %61 = vector.multi_reduction <maximumf>, %60, %cst_23 [1] : vector<16x16xf32> to vector<16xf32>
    %62 = vector.shape_cast %61 : vector<16xf32> to vector<16x1xf32>
    %63 = vector.broadcast %62 : vector<16x1xf32> to vector<16x16xf32>
    %64 = arith.subf %60, %63 : vector<16x16xf32>
    %65 = math.exp %64 : vector<16x16xf32>
    %cst_24 = arith.constant dense<0.000000e+00> : vector<16xf32>
    %66 = vector.multi_reduction <add>, %65, %cst_24 [1] : vector<16x16xf32> to vector<16xf32>
    %67 = vector.shape_cast %66 : vector<16xf32> to vector<16x1xf32>
    %68 = tpu.reciprocal %67 {approx = true} : vector<16x1xf32> -> vector<16x1xf32>
    %69 = vector.broadcast %68 : vector<16x1xf32> to vector<16x16xf32>
    %70 = arith.mulf %65, %69 : vector<16x16xf32>
    %cst_25 = arith.constant dense<0.000000e+00> : vector<16x16xf32>
    %71 = tpu.matmul %70, %57, %cst_25 {dimension_numbers = #tpu.dot_dimension_numbers<[1], [0], [0], [1], [0, 0, 1, 1], [], []>} : vector<16x16xf32>, vector<16x16xf32>, vector<16x16xf32> -> vector<16x16xf32>
    %72 = tpu.concatenate %37, %54, %71 in 1 : vector<16x16xf32>, vector<16x16xf32>, vector<16x16xf32> -> vector<16x48xf32>
    %cst_26 = arith.constant dense<0.000000e+00> : vector<16x16xf32>
    %73 = tpu.matmul %72, %3, %cst_26 {dimension_numbers = #tpu.dot_dimension_numbers<[1], [0], [0], [1], [0, 0, 1, 1], [], []>} : vector<16x48xf32>, vector<48x16xf32>, vector<16x16xf32> -> vector<16x16xf32>
    %74 = vector.broadcast %7 : vector<1x16xf32> to vector<16x16xf32>
    %75 = arith.addf %73, %74 : vector<16x16xf32>
    %76 = math.tanh %75 : vector<16x16xf32>
    %cst_27 = arith.constant dense<0.000000e+00> : vector<16x128xf32>
    %77 = tpu.matmul %76, %4, %cst_27 {dimension_numbers = #tpu.dot_dimension_numbers<[1], [0], [0], [1], [0, 0, 1, 1], [], []>} : vector<16x16xf32>, vector<16x128xf32>, vector<16x128xf32> -> vector<16x128xf32>
    %78 = vector.broadcast %8 : vector<1x128xf32> to vector<16x128xf32>
    %79 = arith.addf %77, %78 : vector<16x128xf32>
    %80 = tpu.iota {dimensions = array<i32: 1>} : vector<1x128xi32>
    %81 = tpu.iota {dimensions = array<i32: 0>} : vector<8x128xi32>
    %82 = tpu.iota {dimensions = array<i32: 1>} : vector<8x128xi32>
    %83 = arith.cmpi eq, %81, %82 : vector<8x128xi32>
    %c7_i32 = arith.constant 7 : i32
    %84 = vector.broadcast %c7_i32 : i32 to vector<1x128xi32>
    %85 = arith.cmpi slt, %80, %84 : vector<1x128xi32>
    %c5_i32 = arith.constant 5 : i32
    %86 = vector.broadcast %c5_i32 : i32 to vector<1x128xi32>
    %87 = arith.cmpi eq, %80, %86 : vector<1x128xi32>
    %cst_28 = arith.constant -1.000000e+02 : f32
    %cst_29 = arith.constant -1.000000e+09 : f32
    %88 = vector.broadcast %cst_28 : f32 to vector<1x128xf32>
    %89 = vector.broadcast %cst_29 : f32 to vector<1x128xf32>
    %90 = arith.select %85, %88, %89 : vector<1x128xi1>, vector<1x128xf32>
    %cst_30 = arith.constant 0.000000e+00 : f32
    %91 = vector.broadcast %cst_30 : f32 to vector<1x128xf32>
    %92 = arith.select %87, %91, %90 : vector<1x128xi1>, vector<1x128xf32>
    %93 = vector.broadcast %92 : vector<1x128xf32> to vector<8x128xf32>
    %94 = arith.addf %93, %5 : vector<8x128xf32>
    %cst_31 = arith.constant dense<0xFF800000> : vector<8xf32>
    %95 = vector.multi_reduction <maximumf>, %94, %cst_31 [1] : vector<8x128xf32> to vector<8xf32>
    %96 = vector.shape_cast %95 : vector<8xf32> to vector<8x1xf32>
    %cst_32 = arith.constant -1.000000e+09 : f32
    %97 = vector.shape_cast %96 : vector<8x1xf32> to vector<8x1xf32>
    %98 = vector.broadcast %97 : vector<8x1xf32> to vector<8x128xf32>
    %99 = vector.broadcast %cst_32 : f32 to vector<8x128xf32>
    %100 = arith.select %83, %98, %99 : vector<8x128xi1>, vector<8x128xf32>
    %cst_33 = arith.constant dense<0xFF800000> : vector<128xf32>
    %101 = vector.multi_reduction <maximumf>, %100, %cst_33 [0] : vector<8x128xf32> to vector<128xf32>
    %102 = vector.shape_cast %101 : vector<128xf32> to vector<1x128xf32>
    %103 = vector.extract_strided_slice %79 {offsets = [0, 0], sizes = [1, 128], strides = [1, 1]} : vector<16x128xf32> to vector<1x128xf32>
    %104 = arith.addf %102, %103 : vector<1x128xf32>
    %c0_i32 = arith.constant 0 : i32
    %105 = arith.subi %1, %c0_i32 : i32
    %c0_i32_34 = arith.constant 0 : i32
    %106 = arith.cmpi sgt, %105, %c0_i32_34 : i32
    %c1_i32 = arith.constant 1 : i32
    %107 = arith.cmpi eq, %105, %c1_i32 : i32
    %108 = arith.addf %104, %9 : vector<1x128xf32>
    %109 = arith.select %107, %108, %104 : vector<1x128xf32>
    %110 = arith.select %106, %109, %92 : vector<1x128xf32>
    %111 = vector.broadcast %110 : vector<1x128xf32> to vector<8x128xf32>
    %112 = arith.addf %111, %5 : vector<8x128xf32>
    %cst_35 = arith.constant dense<0xFF800000> : vector<8xf32>
    %113 = vector.multi_reduction <maximumf>, %112, %cst_35 [1] : vector<8x128xf32> to vector<8xf32>
    %114 = vector.shape_cast %113 : vector<8xf32> to vector<8x1xf32>
    %115 = vector.broadcast %114 : vector<8x1xf32> to vector<8x128xf32>
    %116 = arith.cmpf oge, %112, %115 : vector<8x128xf32>
    %c128_i32 = arith.constant 128 : i32
    %117 = vector.broadcast %c128_i32 : i32 to vector<8x128xi32>
    %118 = arith.select %116, %82, %117 : vector<8x128xi1>, vector<8x128xi32>
    %cst_36 = arith.constant dense<2147483647> : vector<8xi32>
    %119 = vector.multi_reduction <minsi>, %118, %cst_36 [1] : vector<8x128xi32> to vector<8xi32>
    %120 = vector.shape_cast %119 : vector<8xi32> to vector<8x1xi32>
    %c0_i32_37 = arith.constant 0 : i32
    %121 = vector.shape_cast %120 : vector<8x1xi32> to vector<8x1xi32>
    %122 = vector.broadcast %121 : vector<8x1xi32> to vector<8x128xi32>
    %123 = vector.broadcast %c0_i32_37 : i32 to vector<8x128xi32>
    %124 = arith.select %83, %122, %123 : vector<8x128xi1>, vector<8x128xi32>
    %cst_38 = arith.constant dense<0> : vector<128xi32>
    %125 = vector.multi_reduction <add>, %124, %cst_38 [0] : vector<8x128xi32> to vector<128xi32>
    %126 = vector.shape_cast %125 : vector<128xi32> to vector<1x128xi32>
    %cst_39 = arith.constant -1.000000e+09 : f32
    %127 = vector.shape_cast %114 : vector<8x1xf32> to vector<8x1xf32>
    %128 = vector.broadcast %127 : vector<8x1xf32> to vector<8x128xf32>
    %129 = vector.broadcast %cst_39 : f32 to vector<8x128xf32>
    %130 = arith.select %83, %128, %129 : vector<8x128xi1>, vector<8x128xf32>
    %cst_40 = arith.constant dense<0xFF800000> : vector<128xf32>
    %131 = vector.multi_reduction <maximumf>, %130, %cst_40 [0] : vector<8x128xf32> to vector<128xf32>
    %132 = vector.shape_cast %131 : vector<128xf32> to vector<1x128xf32>
    %133 = vector.extract_strided_slice %79 {offsets = [1, 0], sizes = [1, 128], strides = [1, 1]} : vector<16x128xf32> to vector<1x128xf32>
    %134 = arith.addf %132, %133 : vector<1x128xf32>
    %c1_i32_41 = arith.constant 1 : i32
    %135 = arith.subi %1, %c1_i32_41 : i32
    %c0_i32_42 = arith.constant 0 : i32
    %136 = arith.cmpi sgt, %135, %c0_i32_42 : i32
    %c1_i32_43 = arith.constant 1 : i32
    %137 = arith.cmpi eq, %135, %c1_i32_43 : i32
    %138 = arith.addf %134, %9 : vector<1x128xf32>
    %139 = arith.select %137, %138, %134 : vector<1x128xf32>
    %140 = arith.select %136, %139, %110 : vector<1x128xf32>
    %141 = vector.broadcast %140 : vector<1x128xf32> to vector<8x128xf32>
    %142 = arith.addf %141, %5 : vector<8x128xf32>
    %cst_44 = arith.constant dense<0xFF800000> : vector<8xf32>
    %143 = vector.multi_reduction <maximumf>, %142, %cst_44 [1] : vector<8x128xf32> to vector<8xf32>
    %144 = vector.shape_cast %143 : vector<8xf32> to vector<8x1xf32>
    %145 = vector.broadcast %144 : vector<8x1xf32> to vector<8x128xf32>
    %146 = arith.cmpf oge, %142, %145 : vector<8x128xf32>
    %c128_i32_45 = arith.constant 128 : i32
    %147 = vector.broadcast %c128_i32_45 : i32 to vector<8x128xi32>
    %148 = arith.select %146, %82, %147 : vector<8x128xi1>, vector<8x128xi32>
    %cst_46 = arith.constant dense<2147483647> : vector<8xi32>
    %149 = vector.multi_reduction <minsi>, %148, %cst_46 [1] : vector<8x128xi32> to vector<8xi32>
    %150 = vector.shape_cast %149 : vector<8xi32> to vector<8x1xi32>
    %c0_i32_47 = arith.constant 0 : i32
    %151 = vector.shape_cast %150 : vector<8x1xi32> to vector<8x1xi32>
    %152 = vector.broadcast %151 : vector<8x1xi32> to vector<8x128xi32>
    %153 = vector.broadcast %c0_i32_47 : i32 to vector<8x128xi32>
    %154 = arith.select %83, %152, %153 : vector<8x128xi1>, vector<8x128xi32>
    %cst_48 = arith.constant dense<0> : vector<128xi32>
    %155 = vector.multi_reduction <add>, %154, %cst_48 [0] : vector<8x128xi32> to vector<128xi32>
    %156 = vector.shape_cast %155 : vector<128xi32> to vector<1x128xi32>
    %cst_49 = arith.constant -1.000000e+09 : f32
    %157 = vector.shape_cast %144 : vector<8x1xf32> to vector<8x1xf32>
    %158 = vector.broadcast %157 : vector<8x1xf32> to vector<8x128xf32>
    %159 = vector.broadcast %cst_49 : f32 to vector<8x128xf32>
    %160 = arith.select %83, %158, %159 : vector<8x128xi1>, vector<8x128xf32>
    %cst_50 = arith.constant dense<0xFF800000> : vector<128xf32>
    %161 = vector.multi_reduction <maximumf>, %160, %cst_50 [0] : vector<8x128xf32> to vector<128xf32>
    %162 = vector.shape_cast %161 : vector<128xf32> to vector<1x128xf32>
    %163 = vector.extract_strided_slice %79 {offsets = [2, 0], sizes = [1, 128], strides = [1, 1]} : vector<16x128xf32> to vector<1x128xf32>
    %164 = arith.addf %162, %163 : vector<1x128xf32>
    %c2_i32 = arith.constant 2 : i32
    %165 = arith.subi %1, %c2_i32 : i32
    %c0_i32_51 = arith.constant 0 : i32
    %166 = arith.cmpi sgt, %165, %c0_i32_51 : i32
    %c1_i32_52 = arith.constant 1 : i32
    %167 = arith.cmpi eq, %165, %c1_i32_52 : i32
    %168 = arith.addf %164, %9 : vector<1x128xf32>
    %169 = arith.select %167, %168, %164 : vector<1x128xf32>
    %170 = arith.select %166, %169, %140 : vector<1x128xf32>
    %171 = vector.broadcast %170 : vector<1x128xf32> to vector<8x128xf32>
    %172 = arith.addf %171, %5 : vector<8x128xf32>
    %cst_53 = arith.constant dense<0xFF800000> : vector<8xf32>
    %173 = vector.multi_reduction <maximumf>, %172, %cst_53 [1] : vector<8x128xf32> to vector<8xf32>
    %174 = vector.shape_cast %173 : vector<8xf32> to vector<8x1xf32>
    %175 = vector.broadcast %174 : vector<8x1xf32> to vector<8x128xf32>
    %176 = arith.cmpf oge, %172, %175 : vector<8x128xf32>
    %c128_i32_54 = arith.constant 128 : i32
    %177 = vector.broadcast %c128_i32_54 : i32 to vector<8x128xi32>
    %178 = arith.select %176, %82, %177 : vector<8x128xi1>, vector<8x128xi32>
    %cst_55 = arith.constant dense<2147483647> : vector<8xi32>
    %179 = vector.multi_reduction <minsi>, %178, %cst_55 [1] : vector<8x128xi32> to vector<8xi32>
    %180 = vector.shape_cast %179 : vector<8xi32> to vector<8x1xi32>
    %c0_i32_56 = arith.constant 0 : i32
    %181 = vector.shape_cast %180 : vector<8x1xi32> to vector<8x1xi32>
    %182 = vector.broadcast %181 : vector<8x1xi32> to vector<8x128xi32>
    %183 = vector.broadcast %c0_i32_56 : i32 to vector<8x128xi32>
    %184 = arith.select %83, %182, %183 : vector<8x128xi1>, vector<8x128xi32>
    %cst_57 = arith.constant dense<0> : vector<128xi32>
    %185 = vector.multi_reduction <add>, %184, %cst_57 [0] : vector<8x128xi32> to vector<128xi32>
    %186 = vector.shape_cast %185 : vector<128xi32> to vector<1x128xi32>
    %cst_58 = arith.constant -1.000000e+09 : f32
    %187 = vector.shape_cast %174 : vector<8x1xf32> to vector<8x1xf32>
    %188 = vector.broadcast %187 : vector<8x1xf32> to vector<8x128xf32>
    %189 = vector.broadcast %cst_58 : f32 to vector<8x128xf32>
    %190 = arith.select %83, %188, %189 : vector<8x128xi1>, vector<8x128xf32>
    %cst_59 = arith.constant dense<0xFF800000> : vector<128xf32>
    %191 = vector.multi_reduction <maximumf>, %190, %cst_59 [0] : vector<8x128xf32> to vector<128xf32>
    %192 = vector.shape_cast %191 : vector<128xf32> to vector<1x128xf32>
    %193 = vector.extract_strided_slice %79 {offsets = [3, 0], sizes = [1, 128], strides = [1, 1]} : vector<16x128xf32> to vector<1x128xf32>
    %194 = arith.addf %192, %193 : vector<1x128xf32>
    %c3_i32 = arith.constant 3 : i32
    %195 = arith.subi %1, %c3_i32 : i32
    %c0_i32_60 = arith.constant 0 : i32
    %196 = arith.cmpi sgt, %195, %c0_i32_60 : i32
    %c1_i32_61 = arith.constant 1 : i32
    %197 = arith.cmpi eq, %195, %c1_i32_61 : i32
    %198 = arith.addf %194, %9 : vector<1x128xf32>
    %199 = arith.select %197, %198, %194 : vector<1x128xf32>
    %200 = arith.select %196, %199, %170 : vector<1x128xf32>
    %201 = vector.broadcast %200 : vector<1x128xf32> to vector<8x128xf32>
    %202 = arith.addf %201, %5 : vector<8x128xf32>
    %cst_62 = arith.constant dense<0xFF800000> : vector<8xf32>
    %203 = vector.multi_reduction <maximumf>, %202, %cst_62 [1] : vector<8x128xf32> to vector<8xf32>
    %204 = vector.shape_cast %203 : vector<8xf32> to vector<8x1xf32>
    %205 = vector.broadcast %204 : vector<8x1xf32> to vector<8x128xf32>
    %206 = arith.cmpf oge, %202, %205 : vector<8x128xf32>
    %c128_i32_63 = arith.constant 128 : i32
    %207 = vector.broadcast %c128_i32_63 : i32 to vector<8x128xi32>
    %208 = arith.select %206, %82, %207 : vector<8x128xi1>, vector<8x128xi32>
    %cst_64 = arith.constant dense<2147483647> : vector<8xi32>
    %209 = vector.multi_reduction <minsi>, %208, %cst_64 [1] : vector<8x128xi32> to vector<8xi32>
    %210 = vector.shape_cast %209 : vector<8xi32> to vector<8x1xi32>
    %c0_i32_65 = arith.constant 0 : i32
    %211 = vector.shape_cast %210 : vector<8x1xi32> to vector<8x1xi32>
    %212 = vector.broadcast %211 : vector<8x1xi32> to vector<8x128xi32>
    %213 = vector.broadcast %c0_i32_65 : i32 to vector<8x128xi32>
    %214 = arith.select %83, %212, %213 : vector<8x128xi1>, vector<8x128xi32>
    %cst_66 = arith.constant dense<0> : vector<128xi32>
    %215 = vector.multi_reduction <add>, %214, %cst_66 [0] : vector<8x128xi32> to vector<128xi32>
    %216 = vector.shape_cast %215 : vector<128xi32> to vector<1x128xi32>
    %cst_67 = arith.constant -1.000000e+09 : f32
    %217 = vector.shape_cast %204 : vector<8x1xf32> to vector<8x1xf32>
    %218 = vector.broadcast %217 : vector<8x1xf32> to vector<8x128xf32>
    %219 = vector.broadcast %cst_67 : f32 to vector<8x128xf32>
    %220 = arith.select %83, %218, %219 : vector<8x128xi1>, vector<8x128xf32>
    %cst_68 = arith.constant dense<0xFF800000> : vector<128xf32>
    %221 = vector.multi_reduction <maximumf>, %220, %cst_68 [0] : vector<8x128xf32> to vector<128xf32>
    %222 = vector.shape_cast %221 : vector<128xf32> to vector<1x128xf32>
    %223 = vector.extract_strided_slice %79 {offsets = [4, 0], sizes = [1, 128], strides = [1, 1]} : vector<16x128xf32> to vector<1x128xf32>
    %224 = arith.addf %222, %223 : vector<1x128xf32>
    %c4_i32 = arith.constant 4 : i32
    %225 = arith.subi %1, %c4_i32 : i32
    %c0_i32_69 = arith.constant 0 : i32
    %226 = arith.cmpi sgt, %225, %c0_i32_69 : i32
    %c1_i32_70 = arith.constant 1 : i32
    %227 = arith.cmpi eq, %225, %c1_i32_70 : i32
    %228 = arith.addf %224, %9 : vector<1x128xf32>
    %229 = arith.select %227, %228, %224 : vector<1x128xf32>
    %230 = arith.select %226, %229, %200 : vector<1x128xf32>
    %231 = vector.broadcast %230 : vector<1x128xf32> to vector<8x128xf32>
    %232 = arith.addf %231, %5 : vector<8x128xf32>
    %cst_71 = arith.constant dense<0xFF800000> : vector<8xf32>
    %233 = vector.multi_reduction <maximumf>, %232, %cst_71 [1] : vector<8x128xf32> to vector<8xf32>
    %234 = vector.shape_cast %233 : vector<8xf32> to vector<8x1xf32>
    %235 = vector.broadcast %234 : vector<8x1xf32> to vector<8x128xf32>
    %236 = arith.cmpf oge, %232, %235 : vector<8x128xf32>
    %c128_i32_72 = arith.constant 128 : i32
    %237 = vector.broadcast %c128_i32_72 : i32 to vector<8x128xi32>
    %238 = arith.select %236, %82, %237 : vector<8x128xi1>, vector<8x128xi32>
    %cst_73 = arith.constant dense<2147483647> : vector<8xi32>
    %239 = vector.multi_reduction <minsi>, %238, %cst_73 [1] : vector<8x128xi32> to vector<8xi32>
    %240 = vector.shape_cast %239 : vector<8xi32> to vector<8x1xi32>
    %c0_i32_74 = arith.constant 0 : i32
    %241 = vector.shape_cast %240 : vector<8x1xi32> to vector<8x1xi32>
    %242 = vector.broadcast %241 : vector<8x1xi32> to vector<8x128xi32>
    %243 = vector.broadcast %c0_i32_74 : i32 to vector<8x128xi32>
    %244 = arith.select %83, %242, %243 : vector<8x128xi1>, vector<8x128xi32>
    %cst_75 = arith.constant dense<0> : vector<128xi32>
    %245 = vector.multi_reduction <add>, %244, %cst_75 [0] : vector<8x128xi32> to vector<128xi32>
    %246 = vector.shape_cast %245 : vector<128xi32> to vector<1x128xi32>
    %cst_76 = arith.constant -1.000000e+09 : f32
    %247 = vector.shape_cast %234 : vector<8x1xf32> to vector<8x1xf32>
    %248 = vector.broadcast %247 : vector<8x1xf32> to vector<8x128xf32>
    %249 = vector.broadcast %cst_76 : f32 to vector<8x128xf32>
    %250 = arith.select %83, %248, %249 : vector<8x128xi1>, vector<8x128xf32>
    %cst_77 = arith.constant dense<0xFF800000> : vector<128xf32>
    %251 = vector.multi_reduction <maximumf>, %250, %cst_77 [0] : vector<8x128xf32> to vector<128xf32>
    %252 = vector.shape_cast %251 : vector<128xf32> to vector<1x128xf32>
    %253 = vector.extract_strided_slice %79 {offsets = [5, 0], sizes = [1, 128], strides = [1, 1]} : vector<16x128xf32> to vector<1x128xf32>
    %254 = arith.addf %252, %253 : vector<1x128xf32>
    %c5_i32_78 = arith.constant 5 : i32
    %255 = arith.subi %1, %c5_i32_78 : i32
    %c0_i32_79 = arith.constant 0 : i32
    %256 = arith.cmpi sgt, %255, %c0_i32_79 : i32
    %c1_i32_80 = arith.constant 1 : i32
    %257 = arith.cmpi eq, %255, %c1_i32_80 : i32
    %258 = arith.addf %254, %9 : vector<1x128xf32>
    %259 = arith.select %257, %258, %254 : vector<1x128xf32>
    %260 = arith.select %256, %259, %230 : vector<1x128xf32>
    %261 = vector.broadcast %260 : vector<1x128xf32> to vector<8x128xf32>
    %262 = arith.addf %261, %5 : vector<8x128xf32>
    %cst_81 = arith.constant dense<0xFF800000> : vector<8xf32>
    %263 = vector.multi_reduction <maximumf>, %262, %cst_81 [1] : vector<8x128xf32> to vector<8xf32>
    %264 = vector.shape_cast %263 : vector<8xf32> to vector<8x1xf32>
    %265 = vector.broadcast %264 : vector<8x1xf32> to vector<8x128xf32>
    %266 = arith.cmpf oge, %262, %265 : vector<8x128xf32>
    %c128_i32_82 = arith.constant 128 : i32
    %267 = vector.broadcast %c128_i32_82 : i32 to vector<8x128xi32>
    %268 = arith.select %266, %82, %267 : vector<8x128xi1>, vector<8x128xi32>
    %cst_83 = arith.constant dense<2147483647> : vector<8xi32>
    %269 = vector.multi_reduction <minsi>, %268, %cst_83 [1] : vector<8x128xi32> to vector<8xi32>
    %270 = vector.shape_cast %269 : vector<8xi32> to vector<8x1xi32>
    %c0_i32_84 = arith.constant 0 : i32
    %271 = vector.shape_cast %270 : vector<8x1xi32> to vector<8x1xi32>
    %272 = vector.broadcast %271 : vector<8x1xi32> to vector<8x128xi32>
    %273 = vector.broadcast %c0_i32_84 : i32 to vector<8x128xi32>
    %274 = arith.select %83, %272, %273 : vector<8x128xi1>, vector<8x128xi32>
    %cst_85 = arith.constant dense<0> : vector<128xi32>
    %275 = vector.multi_reduction <add>, %274, %cst_85 [0] : vector<8x128xi32> to vector<128xi32>
    %276 = vector.shape_cast %275 : vector<128xi32> to vector<1x128xi32>
    %cst_86 = arith.constant -1.000000e+09 : f32
    %277 = vector.shape_cast %264 : vector<8x1xf32> to vector<8x1xf32>
    %278 = vector.broadcast %277 : vector<8x1xf32> to vector<8x128xf32>
    %279 = vector.broadcast %cst_86 : f32 to vector<8x128xf32>
    %280 = arith.select %83, %278, %279 : vector<8x128xi1>, vector<8x128xf32>
    %cst_87 = arith.constant dense<0xFF800000> : vector<128xf32>
    %281 = vector.multi_reduction <maximumf>, %280, %cst_87 [0] : vector<8x128xf32> to vector<128xf32>
    %282 = vector.shape_cast %281 : vector<128xf32> to vector<1x128xf32>
    %283 = vector.extract_strided_slice %79 {offsets = [6, 0], sizes = [1, 128], strides = [1, 1]} : vector<16x128xf32> to vector<1x128xf32>
    %284 = arith.addf %282, %283 : vector<1x128xf32>
    %c6_i32 = arith.constant 6 : i32
    %285 = arith.subi %1, %c6_i32 : i32
    %c0_i32_88 = arith.constant 0 : i32
    %286 = arith.cmpi sgt, %285, %c0_i32_88 : i32
    %c1_i32_89 = arith.constant 1 : i32
    %287 = arith.cmpi eq, %285, %c1_i32_89 : i32
    %288 = arith.addf %284, %9 : vector<1x128xf32>
    %289 = arith.select %287, %288, %284 : vector<1x128xf32>
    %290 = arith.select %286, %289, %260 : vector<1x128xf32>
    %291 = vector.broadcast %290 : vector<1x128xf32> to vector<8x128xf32>
    %292 = arith.addf %291, %5 : vector<8x128xf32>
    %cst_90 = arith.constant dense<0xFF800000> : vector<8xf32>
    %293 = vector.multi_reduction <maximumf>, %292, %cst_90 [1] : vector<8x128xf32> to vector<8xf32>
    %294 = vector.shape_cast %293 : vector<8xf32> to vector<8x1xf32>
    %295 = vector.broadcast %294 : vector<8x1xf32> to vector<8x128xf32>
    %296 = arith.cmpf oge, %292, %295 : vector<8x128xf32>
    %c128_i32_91 = arith.constant 128 : i32
    %297 = vector.broadcast %c128_i32_91 : i32 to vector<8x128xi32>
    %298 = arith.select %296, %82, %297 : vector<8x128xi1>, vector<8x128xi32>
    %cst_92 = arith.constant dense<2147483647> : vector<8xi32>
    %299 = vector.multi_reduction <minsi>, %298, %cst_92 [1] : vector<8x128xi32> to vector<8xi32>
    %300 = vector.shape_cast %299 : vector<8xi32> to vector<8x1xi32>
    %c0_i32_93 = arith.constant 0 : i32
    %301 = vector.shape_cast %300 : vector<8x1xi32> to vector<8x1xi32>
    %302 = vector.broadcast %301 : vector<8x1xi32> to vector<8x128xi32>
    %303 = vector.broadcast %c0_i32_93 : i32 to vector<8x128xi32>
    %304 = arith.select %83, %302, %303 : vector<8x128xi1>, vector<8x128xi32>
    %cst_94 = arith.constant dense<0> : vector<128xi32>
    %305 = vector.multi_reduction <add>, %304, %cst_94 [0] : vector<8x128xi32> to vector<128xi32>
    %306 = vector.shape_cast %305 : vector<128xi32> to vector<1x128xi32>
    %cst_95 = arith.constant -1.000000e+09 : f32
    %307 = vector.shape_cast %294 : vector<8x1xf32> to vector<8x1xf32>
    %308 = vector.broadcast %307 : vector<8x1xf32> to vector<8x128xf32>
    %309 = vector.broadcast %cst_95 : f32 to vector<8x128xf32>
    %310 = arith.select %83, %308, %309 : vector<8x128xi1>, vector<8x128xf32>
    %cst_96 = arith.constant dense<0xFF800000> : vector<128xf32>
    %311 = vector.multi_reduction <maximumf>, %310, %cst_96 [0] : vector<8x128xf32> to vector<128xf32>
    %312 = vector.shape_cast %311 : vector<128xf32> to vector<1x128xf32>
    %313 = vector.extract_strided_slice %79 {offsets = [7, 0], sizes = [1, 128], strides = [1, 1]} : vector<16x128xf32> to vector<1x128xf32>
    %314 = arith.addf %312, %313 : vector<1x128xf32>
    %c7_i32_97 = arith.constant 7 : i32
    %315 = arith.subi %1, %c7_i32_97 : i32
    %c0_i32_98 = arith.constant 0 : i32
    %316 = arith.cmpi sgt, %315, %c0_i32_98 : i32
    %c1_i32_99 = arith.constant 1 : i32
    %317 = arith.cmpi eq, %315, %c1_i32_99 : i32
    %318 = arith.addf %314, %9 : vector<1x128xf32>
    %319 = arith.select %317, %318, %314 : vector<1x128xf32>
    %320 = arith.select %316, %319, %290 : vector<1x128xf32>
    %321 = vector.broadcast %320 : vector<1x128xf32> to vector<8x128xf32>
    %322 = arith.addf %321, %5 : vector<8x128xf32>
    %cst_100 = arith.constant dense<0xFF800000> : vector<8xf32>
    %323 = vector.multi_reduction <maximumf>, %322, %cst_100 [1] : vector<8x128xf32> to vector<8xf32>
    %324 = vector.shape_cast %323 : vector<8xf32> to vector<8x1xf32>
    %325 = vector.broadcast %324 : vector<8x1xf32> to vector<8x128xf32>
    %326 = arith.cmpf oge, %322, %325 : vector<8x128xf32>
    %c128_i32_101 = arith.constant 128 : i32
    %327 = vector.broadcast %c128_i32_101 : i32 to vector<8x128xi32>
    %328 = arith.select %326, %82, %327 : vector<8x128xi1>, vector<8x128xi32>
    %cst_102 = arith.constant dense<2147483647> : vector<8xi32>
    %329 = vector.multi_reduction <minsi>, %328, %cst_102 [1] : vector<8x128xi32> to vector<8xi32>
    %330 = vector.shape_cast %329 : vector<8xi32> to vector<8x1xi32>
    %c0_i32_103 = arith.constant 0 : i32
    %331 = vector.shape_cast %330 : vector<8x1xi32> to vector<8x1xi32>
    %332 = vector.broadcast %331 : vector<8x1xi32> to vector<8x128xi32>
    %333 = vector.broadcast %c0_i32_103 : i32 to vector<8x128xi32>
    %334 = arith.select %83, %332, %333 : vector<8x128xi1>, vector<8x128xi32>
    %cst_104 = arith.constant dense<0> : vector<128xi32>
    %335 = vector.multi_reduction <add>, %334, %cst_104 [0] : vector<8x128xi32> to vector<128xi32>
    %336 = vector.shape_cast %335 : vector<128xi32> to vector<1x128xi32>
    %cst_105 = arith.constant -1.000000e+09 : f32
    %337 = vector.shape_cast %324 : vector<8x1xf32> to vector<8x1xf32>
    %338 = vector.broadcast %337 : vector<8x1xf32> to vector<8x128xf32>
    %339 = vector.broadcast %cst_105 : f32 to vector<8x128xf32>
    %340 = arith.select %83, %338, %339 : vector<8x128xi1>, vector<8x128xf32>
    %cst_106 = arith.constant dense<0xFF800000> : vector<128xf32>
    %341 = vector.multi_reduction <maximumf>, %340, %cst_106 [0] : vector<8x128xf32> to vector<128xf32>
    %342 = vector.shape_cast %341 : vector<128xf32> to vector<1x128xf32>
    %343 = vector.extract_strided_slice %79 {offsets = [8, 0], sizes = [1, 128], strides = [1, 1]} : vector<16x128xf32> to vector<1x128xf32>
    %344 = arith.addf %342, %343 : vector<1x128xf32>
    %c8_i32 = arith.constant 8 : i32
    %345 = arith.subi %1, %c8_i32 : i32
    %c0_i32_107 = arith.constant 0 : i32
    %346 = arith.cmpi sgt, %345, %c0_i32_107 : i32
    %c1_i32_108 = arith.constant 1 : i32
    %347 = arith.cmpi eq, %345, %c1_i32_108 : i32
    %348 = arith.addf %344, %9 : vector<1x128xf32>
    %349 = arith.select %347, %348, %344 : vector<1x128xf32>
    %350 = arith.select %346, %349, %320 : vector<1x128xf32>
    %351 = vector.broadcast %350 : vector<1x128xf32> to vector<8x128xf32>
    %352 = arith.addf %351, %5 : vector<8x128xf32>
    %cst_109 = arith.constant dense<0xFF800000> : vector<8xf32>
    %353 = vector.multi_reduction <maximumf>, %352, %cst_109 [1] : vector<8x128xf32> to vector<8xf32>
    %354 = vector.shape_cast %353 : vector<8xf32> to vector<8x1xf32>
    %355 = vector.broadcast %354 : vector<8x1xf32> to vector<8x128xf32>
    %356 = arith.cmpf oge, %352, %355 : vector<8x128xf32>
    %c128_i32_110 = arith.constant 128 : i32
    %357 = vector.broadcast %c128_i32_110 : i32 to vector<8x128xi32>
    %358 = arith.select %356, %82, %357 : vector<8x128xi1>, vector<8x128xi32>
    %cst_111 = arith.constant dense<2147483647> : vector<8xi32>
    %359 = vector.multi_reduction <minsi>, %358, %cst_111 [1] : vector<8x128xi32> to vector<8xi32>
    %360 = vector.shape_cast %359 : vector<8xi32> to vector<8x1xi32>
    %c0_i32_112 = arith.constant 0 : i32
    %361 = vector.shape_cast %360 : vector<8x1xi32> to vector<8x1xi32>
    %362 = vector.broadcast %361 : vector<8x1xi32> to vector<8x128xi32>
    %363 = vector.broadcast %c0_i32_112 : i32 to vector<8x128xi32>
    %364 = arith.select %83, %362, %363 : vector<8x128xi1>, vector<8x128xi32>
    %cst_113 = arith.constant dense<0> : vector<128xi32>
    %365 = vector.multi_reduction <add>, %364, %cst_113 [0] : vector<8x128xi32> to vector<128xi32>
    %366 = vector.shape_cast %365 : vector<128xi32> to vector<1x128xi32>
    %cst_114 = arith.constant -1.000000e+09 : f32
    %367 = vector.shape_cast %354 : vector<8x1xf32> to vector<8x1xf32>
    %368 = vector.broadcast %367 : vector<8x1xf32> to vector<8x128xf32>
    %369 = vector.broadcast %cst_114 : f32 to vector<8x128xf32>
    %370 = arith.select %83, %368, %369 : vector<8x128xi1>, vector<8x128xf32>
    %cst_115 = arith.constant dense<0xFF800000> : vector<128xf32>
    %371 = vector.multi_reduction <maximumf>, %370, %cst_115 [0] : vector<8x128xf32> to vector<128xf32>
    %372 = vector.shape_cast %371 : vector<128xf32> to vector<1x128xf32>
    %373 = vector.extract_strided_slice %79 {offsets = [9, 0], sizes = [1, 128], strides = [1, 1]} : vector<16x128xf32> to vector<1x128xf32>
    %374 = arith.addf %372, %373 : vector<1x128xf32>
    %c9_i32 = arith.constant 9 : i32
    %375 = arith.subi %1, %c9_i32 : i32
    %c0_i32_116 = arith.constant 0 : i32
    %376 = arith.cmpi sgt, %375, %c0_i32_116 : i32
    %c1_i32_117 = arith.constant 1 : i32
    %377 = arith.cmpi eq, %375, %c1_i32_117 : i32
    %378 = arith.addf %374, %9 : vector<1x128xf32>
    %379 = arith.select %377, %378, %374 : vector<1x128xf32>
    %380 = arith.select %376, %379, %350 : vector<1x128xf32>
    %381 = vector.broadcast %380 : vector<1x128xf32> to vector<8x128xf32>
    %382 = arith.addf %381, %5 : vector<8x128xf32>
    %cst_118 = arith.constant dense<0xFF800000> : vector<8xf32>
    %383 = vector.multi_reduction <maximumf>, %382, %cst_118 [1] : vector<8x128xf32> to vector<8xf32>
    %384 = vector.shape_cast %383 : vector<8xf32> to vector<8x1xf32>
    %385 = vector.broadcast %384 : vector<8x1xf32> to vector<8x128xf32>
    %386 = arith.cmpf oge, %382, %385 : vector<8x128xf32>
    %c128_i32_119 = arith.constant 128 : i32
    %387 = vector.broadcast %c128_i32_119 : i32 to vector<8x128xi32>
    %388 = arith.select %386, %82, %387 : vector<8x128xi1>, vector<8x128xi32>
    %cst_120 = arith.constant dense<2147483647> : vector<8xi32>
    %389 = vector.multi_reduction <minsi>, %388, %cst_120 [1] : vector<8x128xi32> to vector<8xi32>
    %390 = vector.shape_cast %389 : vector<8xi32> to vector<8x1xi32>
    %c0_i32_121 = arith.constant 0 : i32
    %391 = vector.shape_cast %390 : vector<8x1xi32> to vector<8x1xi32>
    %392 = vector.broadcast %391 : vector<8x1xi32> to vector<8x128xi32>
    %393 = vector.broadcast %c0_i32_121 : i32 to vector<8x128xi32>
    %394 = arith.select %83, %392, %393 : vector<8x128xi1>, vector<8x128xi32>
    %cst_122 = arith.constant dense<0> : vector<128xi32>
    %395 = vector.multi_reduction <add>, %394, %cst_122 [0] : vector<8x128xi32> to vector<128xi32>
    %396 = vector.shape_cast %395 : vector<128xi32> to vector<1x128xi32>
    %cst_123 = arith.constant -1.000000e+09 : f32
    %397 = vector.shape_cast %384 : vector<8x1xf32> to vector<8x1xf32>
    %398 = vector.broadcast %397 : vector<8x1xf32> to vector<8x128xf32>
    %399 = vector.broadcast %cst_123 : f32 to vector<8x128xf32>
    %400 = arith.select %83, %398, %399 : vector<8x128xi1>, vector<8x128xf32>
    %cst_124 = arith.constant dense<0xFF800000> : vector<128xf32>
    %401 = vector.multi_reduction <maximumf>, %400, %cst_124 [0] : vector<8x128xf32> to vector<128xf32>
    %402 = vector.shape_cast %401 : vector<128xf32> to vector<1x128xf32>
    %403 = vector.extract_strided_slice %79 {offsets = [10, 0], sizes = [1, 128], strides = [1, 1]} : vector<16x128xf32> to vector<1x128xf32>
    %404 = arith.addf %402, %403 : vector<1x128xf32>
    %c10_i32 = arith.constant 10 : i32
    %405 = arith.subi %1, %c10_i32 : i32
    %c0_i32_125 = arith.constant 0 : i32
    %406 = arith.cmpi sgt, %405, %c0_i32_125 : i32
    %c1_i32_126 = arith.constant 1 : i32
    %407 = arith.cmpi eq, %405, %c1_i32_126 : i32
    %408 = arith.addf %404, %9 : vector<1x128xf32>
    %409 = arith.select %407, %408, %404 : vector<1x128xf32>
    %410 = arith.select %406, %409, %380 : vector<1x128xf32>
    %411 = vector.broadcast %410 : vector<1x128xf32> to vector<8x128xf32>
    %412 = arith.addf %411, %5 : vector<8x128xf32>
    %cst_127 = arith.constant dense<0xFF800000> : vector<8xf32>
    %413 = vector.multi_reduction <maximumf>, %412, %cst_127 [1] : vector<8x128xf32> to vector<8xf32>
    %414 = vector.shape_cast %413 : vector<8xf32> to vector<8x1xf32>
    %415 = vector.broadcast %414 : vector<8x1xf32> to vector<8x128xf32>
    %416 = arith.cmpf oge, %412, %415 : vector<8x128xf32>
    %c128_i32_128 = arith.constant 128 : i32
    %417 = vector.broadcast %c128_i32_128 : i32 to vector<8x128xi32>
    %418 = arith.select %416, %82, %417 : vector<8x128xi1>, vector<8x128xi32>
    %cst_129 = arith.constant dense<2147483647> : vector<8xi32>
    %419 = vector.multi_reduction <minsi>, %418, %cst_129 [1] : vector<8x128xi32> to vector<8xi32>
    %420 = vector.shape_cast %419 : vector<8xi32> to vector<8x1xi32>
    %c0_i32_130 = arith.constant 0 : i32
    %421 = vector.shape_cast %420 : vector<8x1xi32> to vector<8x1xi32>
    %422 = vector.broadcast %421 : vector<8x1xi32> to vector<8x128xi32>
    %423 = vector.broadcast %c0_i32_130 : i32 to vector<8x128xi32>
    %424 = arith.select %83, %422, %423 : vector<8x128xi1>, vector<8x128xi32>
    %cst_131 = arith.constant dense<0> : vector<128xi32>
    %425 = vector.multi_reduction <add>, %424, %cst_131 [0] : vector<8x128xi32> to vector<128xi32>
    %426 = vector.shape_cast %425 : vector<128xi32> to vector<1x128xi32>
    %cst_132 = arith.constant -1.000000e+09 : f32
    %427 = vector.shape_cast %414 : vector<8x1xf32> to vector<8x1xf32>
    %428 = vector.broadcast %427 : vector<8x1xf32> to vector<8x128xf32>
    %429 = vector.broadcast %cst_132 : f32 to vector<8x128xf32>
    %430 = arith.select %83, %428, %429 : vector<8x128xi1>, vector<8x128xf32>
    %cst_133 = arith.constant dense<0xFF800000> : vector<128xf32>
    %431 = vector.multi_reduction <maximumf>, %430, %cst_133 [0] : vector<8x128xf32> to vector<128xf32>
    %432 = vector.shape_cast %431 : vector<128xf32> to vector<1x128xf32>
    %433 = vector.extract_strided_slice %79 {offsets = [11, 0], sizes = [1, 128], strides = [1, 1]} : vector<16x128xf32> to vector<1x128xf32>
    %434 = arith.addf %432, %433 : vector<1x128xf32>
    %c11_i32 = arith.constant 11 : i32
    %435 = arith.subi %1, %c11_i32 : i32
    %c0_i32_134 = arith.constant 0 : i32
    %436 = arith.cmpi sgt, %435, %c0_i32_134 : i32
    %c1_i32_135 = arith.constant 1 : i32
    %437 = arith.cmpi eq, %435, %c1_i32_135 : i32
    %438 = arith.addf %434, %9 : vector<1x128xf32>
    %439 = arith.select %437, %438, %434 : vector<1x128xf32>
    %440 = arith.select %436, %439, %410 : vector<1x128xf32>
    %441 = vector.broadcast %440 : vector<1x128xf32> to vector<8x128xf32>
    %442 = arith.addf %441, %5 : vector<8x128xf32>
    %cst_136 = arith.constant dense<0xFF800000> : vector<8xf32>
    %443 = vector.multi_reduction <maximumf>, %442, %cst_136 [1] : vector<8x128xf32> to vector<8xf32>
    %444 = vector.shape_cast %443 : vector<8xf32> to vector<8x1xf32>
    %445 = vector.broadcast %444 : vector<8x1xf32> to vector<8x128xf32>
    %446 = arith.cmpf oge, %442, %445 : vector<8x128xf32>
    %c128_i32_137 = arith.constant 128 : i32
    %447 = vector.broadcast %c128_i32_137 : i32 to vector<8x128xi32>
    %448 = arith.select %446, %82, %447 : vector<8x128xi1>, vector<8x128xi32>
    %cst_138 = arith.constant dense<2147483647> : vector<8xi32>
    %449 = vector.multi_reduction <minsi>, %448, %cst_138 [1] : vector<8x128xi32> to vector<8xi32>
    %450 = vector.shape_cast %449 : vector<8xi32> to vector<8x1xi32>
    %c0_i32_139 = arith.constant 0 : i32
    %451 = vector.shape_cast %450 : vector<8x1xi32> to vector<8x1xi32>
    %452 = vector.broadcast %451 : vector<8x1xi32> to vector<8x128xi32>
    %453 = vector.broadcast %c0_i32_139 : i32 to vector<8x128xi32>
    %454 = arith.select %83, %452, %453 : vector<8x128xi1>, vector<8x128xi32>
    %cst_140 = arith.constant dense<0> : vector<128xi32>
    %455 = vector.multi_reduction <add>, %454, %cst_140 [0] : vector<8x128xi32> to vector<128xi32>
    %456 = vector.shape_cast %455 : vector<128xi32> to vector<1x128xi32>
    %cst_141 = arith.constant -1.000000e+09 : f32
    %457 = vector.shape_cast %444 : vector<8x1xf32> to vector<8x1xf32>
    %458 = vector.broadcast %457 : vector<8x1xf32> to vector<8x128xf32>
    %459 = vector.broadcast %cst_141 : f32 to vector<8x128xf32>
    %460 = arith.select %83, %458, %459 : vector<8x128xi1>, vector<8x128xf32>
    %cst_142 = arith.constant dense<0xFF800000> : vector<128xf32>
    %461 = vector.multi_reduction <maximumf>, %460, %cst_142 [0] : vector<8x128xf32> to vector<128xf32>
    %462 = vector.shape_cast %461 : vector<128xf32> to vector<1x128xf32>
    %463 = vector.extract_strided_slice %79 {offsets = [12, 0], sizes = [1, 128], strides = [1, 1]} : vector<16x128xf32> to vector<1x128xf32>
    %464 = arith.addf %462, %463 : vector<1x128xf32>
    %c12_i32 = arith.constant 12 : i32
    %465 = arith.subi %1, %c12_i32 : i32
    %c0_i32_143 = arith.constant 0 : i32
    %466 = arith.cmpi sgt, %465, %c0_i32_143 : i32
    %c1_i32_144 = arith.constant 1 : i32
    %467 = arith.cmpi eq, %465, %c1_i32_144 : i32
    %468 = arith.addf %464, %9 : vector<1x128xf32>
    %469 = arith.select %467, %468, %464 : vector<1x128xf32>
    %470 = arith.select %466, %469, %440 : vector<1x128xf32>
    %471 = vector.broadcast %470 : vector<1x128xf32> to vector<8x128xf32>
    %472 = arith.addf %471, %5 : vector<8x128xf32>
    %cst_145 = arith.constant dense<0xFF800000> : vector<8xf32>
    %473 = vector.multi_reduction <maximumf>, %472, %cst_145 [1] : vector<8x128xf32> to vector<8xf32>
    %474 = vector.shape_cast %473 : vector<8xf32> to vector<8x1xf32>
    %475 = vector.broadcast %474 : vector<8x1xf32> to vector<8x128xf32>
    %476 = arith.cmpf oge, %472, %475 : vector<8x128xf32>
    %c128_i32_146 = arith.constant 128 : i32
    %477 = vector.broadcast %c128_i32_146 : i32 to vector<8x128xi32>
    %478 = arith.select %476, %82, %477 : vector<8x128xi1>, vector<8x128xi32>
    %cst_147 = arith.constant dense<2147483647> : vector<8xi32>
    %479 = vector.multi_reduction <minsi>, %478, %cst_147 [1] : vector<8x128xi32> to vector<8xi32>
    %480 = vector.shape_cast %479 : vector<8xi32> to vector<8x1xi32>
    %c0_i32_148 = arith.constant 0 : i32
    %481 = vector.shape_cast %480 : vector<8x1xi32> to vector<8x1xi32>
    %482 = vector.broadcast %481 : vector<8x1xi32> to vector<8x128xi32>
    %483 = vector.broadcast %c0_i32_148 : i32 to vector<8x128xi32>
    %484 = arith.select %83, %482, %483 : vector<8x128xi1>, vector<8x128xi32>
    %cst_149 = arith.constant dense<0> : vector<128xi32>
    %485 = vector.multi_reduction <add>, %484, %cst_149 [0] : vector<8x128xi32> to vector<128xi32>
    %486 = vector.shape_cast %485 : vector<128xi32> to vector<1x128xi32>
    %cst_150 = arith.constant -1.000000e+09 : f32
    %487 = vector.shape_cast %474 : vector<8x1xf32> to vector<8x1xf32>
    %488 = vector.broadcast %487 : vector<8x1xf32> to vector<8x128xf32>
    %489 = vector.broadcast %cst_150 : f32 to vector<8x128xf32>
    %490 = arith.select %83, %488, %489 : vector<8x128xi1>, vector<8x128xf32>
    %cst_151 = arith.constant dense<0xFF800000> : vector<128xf32>
    %491 = vector.multi_reduction <maximumf>, %490, %cst_151 [0] : vector<8x128xf32> to vector<128xf32>
    %492 = vector.shape_cast %491 : vector<128xf32> to vector<1x128xf32>
    %493 = vector.extract_strided_slice %79 {offsets = [13, 0], sizes = [1, 128], strides = [1, 1]} : vector<16x128xf32> to vector<1x128xf32>
    %494 = arith.addf %492, %493 : vector<1x128xf32>
    %c13_i32 = arith.constant 13 : i32
    %495 = arith.subi %1, %c13_i32 : i32
    %c0_i32_152 = arith.constant 0 : i32
    %496 = arith.cmpi sgt, %495, %c0_i32_152 : i32
    %c1_i32_153 = arith.constant 1 : i32
    %497 = arith.cmpi eq, %495, %c1_i32_153 : i32
    %498 = arith.addf %494, %9 : vector<1x128xf32>
    %499 = arith.select %497, %498, %494 : vector<1x128xf32>
    %500 = arith.select %496, %499, %470 : vector<1x128xf32>
    %501 = vector.broadcast %500 : vector<1x128xf32> to vector<8x128xf32>
    %502 = arith.addf %501, %5 : vector<8x128xf32>
    %cst_154 = arith.constant dense<0xFF800000> : vector<8xf32>
    %503 = vector.multi_reduction <maximumf>, %502, %cst_154 [1] : vector<8x128xf32> to vector<8xf32>
    %504 = vector.shape_cast %503 : vector<8xf32> to vector<8x1xf32>
    %505 = vector.broadcast %504 : vector<8x1xf32> to vector<8x128xf32>
    %506 = arith.cmpf oge, %502, %505 : vector<8x128xf32>
    %c128_i32_155 = arith.constant 128 : i32
    %507 = vector.broadcast %c128_i32_155 : i32 to vector<8x128xi32>
    %508 = arith.select %506, %82, %507 : vector<8x128xi1>, vector<8x128xi32>
    %cst_156 = arith.constant dense<2147483647> : vector<8xi32>
    %509 = vector.multi_reduction <minsi>, %508, %cst_156 [1] : vector<8x128xi32> to vector<8xi32>
    %510 = vector.shape_cast %509 : vector<8xi32> to vector<8x1xi32>
    %c0_i32_157 = arith.constant 0 : i32
    %511 = vector.shape_cast %510 : vector<8x1xi32> to vector<8x1xi32>
    %512 = vector.broadcast %511 : vector<8x1xi32> to vector<8x128xi32>
    %513 = vector.broadcast %c0_i32_157 : i32 to vector<8x128xi32>
    %514 = arith.select %83, %512, %513 : vector<8x128xi1>, vector<8x128xi32>
    %cst_158 = arith.constant dense<0> : vector<128xi32>
    %515 = vector.multi_reduction <add>, %514, %cst_158 [0] : vector<8x128xi32> to vector<128xi32>
    %516 = vector.shape_cast %515 : vector<128xi32> to vector<1x128xi32>
    %cst_159 = arith.constant -1.000000e+09 : f32
    %517 = vector.shape_cast %504 : vector<8x1xf32> to vector<8x1xf32>
    %518 = vector.broadcast %517 : vector<8x1xf32> to vector<8x128xf32>
    %519 = vector.broadcast %cst_159 : f32 to vector<8x128xf32>
    %520 = arith.select %83, %518, %519 : vector<8x128xi1>, vector<8x128xf32>
    %cst_160 = arith.constant dense<0xFF800000> : vector<128xf32>
    %521 = vector.multi_reduction <maximumf>, %520, %cst_160 [0] : vector<8x128xf32> to vector<128xf32>
    %522 = vector.shape_cast %521 : vector<128xf32> to vector<1x128xf32>
    %523 = vector.extract_strided_slice %79 {offsets = [14, 0], sizes = [1, 128], strides = [1, 1]} : vector<16x128xf32> to vector<1x128xf32>
    %524 = arith.addf %522, %523 : vector<1x128xf32>
    %c14_i32 = arith.constant 14 : i32
    %525 = arith.subi %1, %c14_i32 : i32
    %c0_i32_161 = arith.constant 0 : i32
    %526 = arith.cmpi sgt, %525, %c0_i32_161 : i32
    %c1_i32_162 = arith.constant 1 : i32
    %527 = arith.cmpi eq, %525, %c1_i32_162 : i32
    %528 = arith.addf %524, %9 : vector<1x128xf32>
    %529 = arith.select %527, %528, %524 : vector<1x128xf32>
    %530 = arith.select %526, %529, %500 : vector<1x128xf32>
    %531 = vector.broadcast %530 : vector<1x128xf32> to vector<8x128xf32>
    %532 = arith.addf %531, %5 : vector<8x128xf32>
    %cst_163 = arith.constant dense<0xFF800000> : vector<8xf32>
    %533 = vector.multi_reduction <maximumf>, %532, %cst_163 [1] : vector<8x128xf32> to vector<8xf32>
    %534 = vector.shape_cast %533 : vector<8xf32> to vector<8x1xf32>
    %535 = vector.broadcast %534 : vector<8x1xf32> to vector<8x128xf32>
    %536 = arith.cmpf oge, %532, %535 : vector<8x128xf32>
    %c128_i32_164 = arith.constant 128 : i32
    %537 = vector.broadcast %c128_i32_164 : i32 to vector<8x128xi32>
    %538 = arith.select %536, %82, %537 : vector<8x128xi1>, vector<8x128xi32>
    %cst_165 = arith.constant dense<2147483647> : vector<8xi32>
    %539 = vector.multi_reduction <minsi>, %538, %cst_165 [1] : vector<8x128xi32> to vector<8xi32>
    %540 = vector.shape_cast %539 : vector<8xi32> to vector<8x1xi32>
    %c0_i32_166 = arith.constant 0 : i32
    %541 = vector.shape_cast %540 : vector<8x1xi32> to vector<8x1xi32>
    %542 = vector.broadcast %541 : vector<8x1xi32> to vector<8x128xi32>
    %543 = vector.broadcast %c0_i32_166 : i32 to vector<8x128xi32>
    %544 = arith.select %83, %542, %543 : vector<8x128xi1>, vector<8x128xi32>
    %cst_167 = arith.constant dense<0> : vector<128xi32>
    %545 = vector.multi_reduction <add>, %544, %cst_167 [0] : vector<8x128xi32> to vector<128xi32>
    %546 = vector.shape_cast %545 : vector<128xi32> to vector<1x128xi32>
    %cst_168 = arith.constant -1.000000e+09 : f32
    %547 = vector.shape_cast %534 : vector<8x1xf32> to vector<8x1xf32>
    %548 = vector.broadcast %547 : vector<8x1xf32> to vector<8x128xf32>
    %549 = vector.broadcast %cst_168 : f32 to vector<8x128xf32>
    %550 = arith.select %83, %548, %549 : vector<8x128xi1>, vector<8x128xf32>
    %cst_169 = arith.constant dense<0xFF800000> : vector<128xf32>
    %551 = vector.multi_reduction <maximumf>, %550, %cst_169 [0] : vector<8x128xf32> to vector<128xf32>
    %552 = vector.shape_cast %551 : vector<128xf32> to vector<1x128xf32>
    %553 = vector.extract_strided_slice %79 {offsets = [15, 0], sizes = [1, 128], strides = [1, 1]} : vector<16x128xf32> to vector<1x128xf32>
    %554 = arith.addf %552, %553 : vector<1x128xf32>
    %c15_i32 = arith.constant 15 : i32
    %555 = arith.subi %1, %c15_i32 : i32
    %c0_i32_170 = arith.constant 0 : i32
    %556 = arith.cmpi sgt, %555, %c0_i32_170 : i32
    %c1_i32_171 = arith.constant 1 : i32
    %557 = arith.cmpi eq, %555, %c1_i32_171 : i32
    %558 = arith.addf %554, %9 : vector<1x128xf32>
    %559 = arith.select %557, %558, %554 : vector<1x128xf32>
    %560 = arith.select %556, %559, %530 : vector<1x128xf32>
    %cst_172 = arith.constant -1.000000e+09 : f32
    %561 = vector.broadcast %cst_172 : f32 to vector<1x128xf32>
    %562 = arith.select %85, %560, %561 : vector<1x128xi1>, vector<1x128xf32>
    %cst_173 = arith.constant dense<0xFF800000> : vector<1xf32>
    %563 = vector.multi_reduction <maximumf>, %562, %cst_173 [1] : vector<1x128xf32> to vector<1xf32>
    %564 = vector.shape_cast %563 : vector<1xf32> to vector<1x1xf32>
    %565 = vector.broadcast %564 : vector<1x1xf32> to vector<1x128xf32>
    %566 = arith.cmpf oge, %562, %565 : vector<1x128xf32>
    %c128_i32_174 = arith.constant 128 : i32
    %567 = vector.broadcast %c128_i32_174 : i32 to vector<1x128xi32>
    %568 = arith.select %566, %80, %567 : vector<1x128xi1>, vector<1x128xi32>
    %cst_175 = arith.constant dense<2147483647> : vector<1xi32>
    %569 = vector.multi_reduction <minsi>, %568, %cst_175 [1] : vector<1x128xi32> to vector<1xi32>
    %570 = vector.shape_cast %569 : vector<1xi32> to vector<1x1xi32>
    %c15_i32_176 = arith.constant 15 : i32
    %571 = vector.broadcast %c15_i32_176 : i32 to vector<1x128xi32>
    %572 = arith.cmpi eq, %80, %571 : vector<1x128xi32>
    %c0_i32_177 = arith.constant 0 : i32
    %573 = vector.shape_cast %570 : vector<1x1xi32> to vector<1x1xi32>
    %574 = vector.broadcast %573 : vector<1x1xi32> to vector<1x128xi32>
    %575 = vector.broadcast %c0_i32_177 : i32 to vector<1x128xi32>
    %576 = arith.select %572, %574, %575 : vector<1x128xi1>, vector<1x128xi32>
    %577 = vector.broadcast %570 : vector<1x1xi32> to vector<1x128xi32>
    %578 = arith.cmpi eq, %80, %577 : vector<1x128xi32>
    %c0_i32_178 = arith.constant 0 : i32
    %579 = vector.broadcast %c0_i32_178 : i32 to vector<1x128xi32>
    %580 = arith.select %578, %546, %579 : vector<1x128xi1>, vector<1x128xi32>
    %cst_179 = arith.constant dense<0> : vector<1xi32>
    %581 = vector.multi_reduction <add>, %580, %cst_179 [1] : vector<1x128xi32> to vector<1xi32>
    %582 = vector.shape_cast %581 : vector<1xi32> to vector<1x1xi32>
    %c14_i32_180 = arith.constant 14 : i32
    %583 = vector.broadcast %c14_i32_180 : i32 to vector<1x128xi32>
    %584 = arith.cmpi eq, %80, %583 : vector<1x128xi32>
    %585 = vector.shape_cast %582 : vector<1x1xi32> to vector<1x1xi32>
    %586 = vector.broadcast %585 : vector<1x1xi32> to vector<1x128xi32>
    %587 = arith.select %584, %586, %576 : vector<1x128xi1>, vector<1x128xi32>
    %588 = vector.broadcast %582 : vector<1x1xi32> to vector<1x128xi32>
    %589 = arith.cmpi eq, %80, %588 : vector<1x128xi32>
    %c0_i32_181 = arith.constant 0 : i32
    %590 = vector.broadcast %c0_i32_181 : i32 to vector<1x128xi32>
    %591 = arith.select %589, %516, %590 : vector<1x128xi1>, vector<1x128xi32>
    %cst_182 = arith.constant dense<0> : vector<1xi32>
    %592 = vector.multi_reduction <add>, %591, %cst_182 [1] : vector<1x128xi32> to vector<1xi32>
    %593 = vector.shape_cast %592 : vector<1xi32> to vector<1x1xi32>
    %c13_i32_183 = arith.constant 13 : i32
    %594 = vector.broadcast %c13_i32_183 : i32 to vector<1x128xi32>
    %595 = arith.cmpi eq, %80, %594 : vector<1x128xi32>
    %596 = vector.shape_cast %593 : vector<1x1xi32> to vector<1x1xi32>
    %597 = vector.broadcast %596 : vector<1x1xi32> to vector<1x128xi32>
    %598 = arith.select %595, %597, %587 : vector<1x128xi1>, vector<1x128xi32>
    %599 = vector.broadcast %593 : vector<1x1xi32> to vector<1x128xi32>
    %600 = arith.cmpi eq, %80, %599 : vector<1x128xi32>
    %c0_i32_184 = arith.constant 0 : i32
    %601 = vector.broadcast %c0_i32_184 : i32 to vector<1x128xi32>
    %602 = arith.select %600, %486, %601 : vector<1x128xi1>, vector<1x128xi32>
    %cst_185 = arith.constant dense<0> : vector<1xi32>
    %603 = vector.multi_reduction <add>, %602, %cst_185 [1] : vector<1x128xi32> to vector<1xi32>
    %604 = vector.shape_cast %603 : vector<1xi32> to vector<1x1xi32>
    %c12_i32_186 = arith.constant 12 : i32
    %605 = vector.broadcast %c12_i32_186 : i32 to vector<1x128xi32>
    %606 = arith.cmpi eq, %80, %605 : vector<1x128xi32>
    %607 = vector.shape_cast %604 : vector<1x1xi32> to vector<1x1xi32>
    %608 = vector.broadcast %607 : vector<1x1xi32> to vector<1x128xi32>
    %609 = arith.select %606, %608, %598 : vector<1x128xi1>, vector<1x128xi32>
    %610 = vector.broadcast %604 : vector<1x1xi32> to vector<1x128xi32>
    %611 = arith.cmpi eq, %80, %610 : vector<1x128xi32>
    %c0_i32_187 = arith.constant 0 : i32
    %612 = vector.broadcast %c0_i32_187 : i32 to vector<1x128xi32>
    %613 = arith.select %611, %456, %612 : vector<1x128xi1>, vector<1x128xi32>
    %cst_188 = arith.constant dense<0> : vector<1xi32>
    %614 = vector.multi_reduction <add>, %613, %cst_188 [1] : vector<1x128xi32> to vector<1xi32>
    %615 = vector.shape_cast %614 : vector<1xi32> to vector<1x1xi32>
    %c11_i32_189 = arith.constant 11 : i32
    %616 = vector.broadcast %c11_i32_189 : i32 to vector<1x128xi32>
    %617 = arith.cmpi eq, %80, %616 : vector<1x128xi32>
    %618 = vector.shape_cast %615 : vector<1x1xi32> to vector<1x1xi32>
    %619 = vector.broadcast %618 : vector<1x1xi32> to vector<1x128xi32>
    %620 = arith.select %617, %619, %609 : vector<1x128xi1>, vector<1x128xi32>
    %621 = vector.broadcast %615 : vector<1x1xi32> to vector<1x128xi32>
    %622 = arith.cmpi eq, %80, %621 : vector<1x128xi32>
    %c0_i32_190 = arith.constant 0 : i32
    %623 = vector.broadcast %c0_i32_190 : i32 to vector<1x128xi32>
    %624 = arith.select %622, %426, %623 : vector<1x128xi1>, vector<1x128xi32>
    %cst_191 = arith.constant dense<0> : vector<1xi32>
    %625 = vector.multi_reduction <add>, %624, %cst_191 [1] : vector<1x128xi32> to vector<1xi32>
    %626 = vector.shape_cast %625 : vector<1xi32> to vector<1x1xi32>
    %c10_i32_192 = arith.constant 10 : i32
    %627 = vector.broadcast %c10_i32_192 : i32 to vector<1x128xi32>
    %628 = arith.cmpi eq, %80, %627 : vector<1x128xi32>
    %629 = vector.shape_cast %626 : vector<1x1xi32> to vector<1x1xi32>
    %630 = vector.broadcast %629 : vector<1x1xi32> to vector<1x128xi32>
    %631 = arith.select %628, %630, %620 : vector<1x128xi1>, vector<1x128xi32>
    %632 = vector.broadcast %626 : vector<1x1xi32> to vector<1x128xi32>
    %633 = arith.cmpi eq, %80, %632 : vector<1x128xi32>
    %c0_i32_193 = arith.constant 0 : i32
    %634 = vector.broadcast %c0_i32_193 : i32 to vector<1x128xi32>
    %635 = arith.select %633, %396, %634 : vector<1x128xi1>, vector<1x128xi32>
    %cst_194 = arith.constant dense<0> : vector<1xi32>
    %636 = vector.multi_reduction <add>, %635, %cst_194 [1] : vector<1x128xi32> to vector<1xi32>
    %637 = vector.shape_cast %636 : vector<1xi32> to vector<1x1xi32>
    %c9_i32_195 = arith.constant 9 : i32
    %638 = vector.broadcast %c9_i32_195 : i32 to vector<1x128xi32>
    %639 = arith.cmpi eq, %80, %638 : vector<1x128xi32>
    %640 = vector.shape_cast %637 : vector<1x1xi32> to vector<1x1xi32>
    %641 = vector.broadcast %640 : vector<1x1xi32> to vector<1x128xi32>
    %642 = arith.select %639, %641, %631 : vector<1x128xi1>, vector<1x128xi32>
    %643 = vector.broadcast %637 : vector<1x1xi32> to vector<1x128xi32>
    %644 = arith.cmpi eq, %80, %643 : vector<1x128xi32>
    %c0_i32_196 = arith.constant 0 : i32
    %645 = vector.broadcast %c0_i32_196 : i32 to vector<1x128xi32>
    %646 = arith.select %644, %366, %645 : vector<1x128xi1>, vector<1x128xi32>
    %cst_197 = arith.constant dense<0> : vector<1xi32>
    %647 = vector.multi_reduction <add>, %646, %cst_197 [1] : vector<1x128xi32> to vector<1xi32>
    %648 = vector.shape_cast %647 : vector<1xi32> to vector<1x1xi32>
    %c8_i32_198 = arith.constant 8 : i32
    %649 = vector.broadcast %c8_i32_198 : i32 to vector<1x128xi32>
    %650 = arith.cmpi eq, %80, %649 : vector<1x128xi32>
    %651 = vector.shape_cast %648 : vector<1x1xi32> to vector<1x1xi32>
    %652 = vector.broadcast %651 : vector<1x1xi32> to vector<1x128xi32>
    %653 = arith.select %650, %652, %642 : vector<1x128xi1>, vector<1x128xi32>
    %654 = vector.broadcast %648 : vector<1x1xi32> to vector<1x128xi32>
    %655 = arith.cmpi eq, %80, %654 : vector<1x128xi32>
    %c0_i32_199 = arith.constant 0 : i32
    %656 = vector.broadcast %c0_i32_199 : i32 to vector<1x128xi32>
    %657 = arith.select %655, %336, %656 : vector<1x128xi1>, vector<1x128xi32>
    %cst_200 = arith.constant dense<0> : vector<1xi32>
    %658 = vector.multi_reduction <add>, %657, %cst_200 [1] : vector<1x128xi32> to vector<1xi32>
    %659 = vector.shape_cast %658 : vector<1xi32> to vector<1x1xi32>
    %c7_i32_201 = arith.constant 7 : i32
    %660 = vector.broadcast %c7_i32_201 : i32 to vector<1x128xi32>
    %661 = arith.cmpi eq, %80, %660 : vector<1x128xi32>
    %662 = vector.shape_cast %659 : vector<1x1xi32> to vector<1x1xi32>
    %663 = vector.broadcast %662 : vector<1x1xi32> to vector<1x128xi32>
    %664 = arith.select %661, %663, %653 : vector<1x128xi1>, vector<1x128xi32>
    %665 = vector.broadcast %659 : vector<1x1xi32> to vector<1x128xi32>
    %666 = arith.cmpi eq, %80, %665 : vector<1x128xi32>
    %c0_i32_202 = arith.constant 0 : i32
    %667 = vector.broadcast %c0_i32_202 : i32 to vector<1x128xi32>
    %668 = arith.select %666, %306, %667 : vector<1x128xi1>, vector<1x128xi32>
    %cst_203 = arith.constant dense<0> : vector<1xi32>
    %669 = vector.multi_reduction <add>, %668, %cst_203 [1] : vector<1x128xi32> to vector<1xi32>
    %670 = vector.shape_cast %669 : vector<1xi32> to vector<1x1xi32>
    %c6_i32_204 = arith.constant 6 : i32
    %671 = vector.broadcast %c6_i32_204 : i32 to vector<1x128xi32>
    %672 = arith.cmpi eq, %80, %671 : vector<1x128xi32>
    %673 = vector.shape_cast %670 : vector<1x1xi32> to vector<1x1xi32>
    %674 = vector.broadcast %673 : vector<1x1xi32> to vector<1x128xi32>
    %675 = arith.select %672, %674, %664 : vector<1x128xi1>, vector<1x128xi32>
    %676 = vector.broadcast %670 : vector<1x1xi32> to vector<1x128xi32>
    %677 = arith.cmpi eq, %80, %676 : vector<1x128xi32>
    %c0_i32_205 = arith.constant 0 : i32
    %678 = vector.broadcast %c0_i32_205 : i32 to vector<1x128xi32>
    %679 = arith.select %677, %276, %678 : vector<1x128xi1>, vector<1x128xi32>
    %cst_206 = arith.constant dense<0> : vector<1xi32>
    %680 = vector.multi_reduction <add>, %679, %cst_206 [1] : vector<1x128xi32> to vector<1xi32>
    %681 = vector.shape_cast %680 : vector<1xi32> to vector<1x1xi32>
    %c5_i32_207 = arith.constant 5 : i32
    %682 = vector.broadcast %c5_i32_207 : i32 to vector<1x128xi32>
    %683 = arith.cmpi eq, %80, %682 : vector<1x128xi32>
    %684 = vector.shape_cast %681 : vector<1x1xi32> to vector<1x1xi32>
    %685 = vector.broadcast %684 : vector<1x1xi32> to vector<1x128xi32>
    %686 = arith.select %683, %685, %675 : vector<1x128xi1>, vector<1x128xi32>
    %687 = vector.broadcast %681 : vector<1x1xi32> to vector<1x128xi32>
    %688 = arith.cmpi eq, %80, %687 : vector<1x128xi32>
    %c0_i32_208 = arith.constant 0 : i32
    %689 = vector.broadcast %c0_i32_208 : i32 to vector<1x128xi32>
    %690 = arith.select %688, %246, %689 : vector<1x128xi1>, vector<1x128xi32>
    %cst_209 = arith.constant dense<0> : vector<1xi32>
    %691 = vector.multi_reduction <add>, %690, %cst_209 [1] : vector<1x128xi32> to vector<1xi32>
    %692 = vector.shape_cast %691 : vector<1xi32> to vector<1x1xi32>
    %c4_i32_210 = arith.constant 4 : i32
    %693 = vector.broadcast %c4_i32_210 : i32 to vector<1x128xi32>
    %694 = arith.cmpi eq, %80, %693 : vector<1x128xi32>
    %695 = vector.shape_cast %692 : vector<1x1xi32> to vector<1x1xi32>
    %696 = vector.broadcast %695 : vector<1x1xi32> to vector<1x128xi32>
    %697 = arith.select %694, %696, %686 : vector<1x128xi1>, vector<1x128xi32>
    %698 = vector.broadcast %692 : vector<1x1xi32> to vector<1x128xi32>
    %699 = arith.cmpi eq, %80, %698 : vector<1x128xi32>
    %c0_i32_211 = arith.constant 0 : i32
    %700 = vector.broadcast %c0_i32_211 : i32 to vector<1x128xi32>
    %701 = arith.select %699, %216, %700 : vector<1x128xi1>, vector<1x128xi32>
    %cst_212 = arith.constant dense<0> : vector<1xi32>
    %702 = vector.multi_reduction <add>, %701, %cst_212 [1] : vector<1x128xi32> to vector<1xi32>
    %703 = vector.shape_cast %702 : vector<1xi32> to vector<1x1xi32>
    %c3_i32_213 = arith.constant 3 : i32
    %704 = vector.broadcast %c3_i32_213 : i32 to vector<1x128xi32>
    %705 = arith.cmpi eq, %80, %704 : vector<1x128xi32>
    %706 = vector.shape_cast %703 : vector<1x1xi32> to vector<1x1xi32>
    %707 = vector.broadcast %706 : vector<1x1xi32> to vector<1x128xi32>
    %708 = arith.select %705, %707, %697 : vector<1x128xi1>, vector<1x128xi32>
    %709 = vector.broadcast %703 : vector<1x1xi32> to vector<1x128xi32>
    %710 = arith.cmpi eq, %80, %709 : vector<1x128xi32>
    %c0_i32_214 = arith.constant 0 : i32
    %711 = vector.broadcast %c0_i32_214 : i32 to vector<1x128xi32>
    %712 = arith.select %710, %186, %711 : vector<1x128xi1>, vector<1x128xi32>
    %cst_215 = arith.constant dense<0> : vector<1xi32>
    %713 = vector.multi_reduction <add>, %712, %cst_215 [1] : vector<1x128xi32> to vector<1xi32>
    %714 = vector.shape_cast %713 : vector<1xi32> to vector<1x1xi32>
    %c2_i32_216 = arith.constant 2 : i32
    %715 = vector.broadcast %c2_i32_216 : i32 to vector<1x128xi32>
    %716 = arith.cmpi eq, %80, %715 : vector<1x128xi32>
    %717 = vector.shape_cast %714 : vector<1x1xi32> to vector<1x1xi32>
    %718 = vector.broadcast %717 : vector<1x1xi32> to vector<1x128xi32>
    %719 = arith.select %716, %718, %708 : vector<1x128xi1>, vector<1x128xi32>
    %720 = vector.broadcast %714 : vector<1x1xi32> to vector<1x128xi32>
    %721 = arith.cmpi eq, %80, %720 : vector<1x128xi32>
    %c0_i32_217 = arith.constant 0 : i32
    %722 = vector.broadcast %c0_i32_217 : i32 to vector<1x128xi32>
    %723 = arith.select %721, %156, %722 : vector<1x128xi1>, vector<1x128xi32>
    %cst_218 = arith.constant dense<0> : vector<1xi32>
    %724 = vector.multi_reduction <add>, %723, %cst_218 [1] : vector<1x128xi32> to vector<1xi32>
    %725 = vector.shape_cast %724 : vector<1xi32> to vector<1x1xi32>
    %c1_i32_219 = arith.constant 1 : i32
    %726 = vector.broadcast %c1_i32_219 : i32 to vector<1x128xi32>
    %727 = arith.cmpi eq, %80, %726 : vector<1x128xi32>
    %728 = vector.shape_cast %725 : vector<1x1xi32> to vector<1x1xi32>
    %729 = vector.broadcast %728 : vector<1x1xi32> to vector<1x128xi32>
    %730 = arith.select %727, %729, %719 : vector<1x128xi1>, vector<1x128xi32>
    %731 = vector.broadcast %725 : vector<1x1xi32> to vector<1x128xi32>
    %732 = arith.cmpi eq, %80, %731 : vector<1x128xi32>
    %c0_i32_220 = arith.constant 0 : i32
    %733 = vector.broadcast %c0_i32_220 : i32 to vector<1x128xi32>
    %734 = arith.select %732, %126, %733 : vector<1x128xi1>, vector<1x128xi32>
    %cst_221 = arith.constant dense<0> : vector<1xi32>
    %735 = vector.multi_reduction <add>, %734, %cst_221 [1] : vector<1x128xi32> to vector<1xi32>
    %736 = vector.shape_cast %735 : vector<1xi32> to vector<1x1xi32>
    %c0_i32_222 = arith.constant 0 : i32
    %737 = vector.broadcast %c0_i32_222 : i32 to vector<1x128xi32>
    %738 = arith.cmpi eq, %80, %737 : vector<1x128xi32>
    %739 = vector.shape_cast %736 : vector<1x1xi32> to vector<1x1xi32>
    %740 = vector.broadcast %739 : vector<1x1xi32> to vector<1x128xi32>
    %741 = arith.select %738, %740, %730 : vector<1x128xi1>, vector<1x128xi32>
    %c0_223 = arith.constant 0 : index
    %c0_224 = arith.constant 0 : index
    %c0_225 = arith.constant 0 : index
    %742 = vector.load %arg5[%c0_223, %c0_224, %c0_225] : memref<1x1x128xi32, #tpu.memory_space<vmem>>, vector<1x1x128xi32>
    %743 = vector.shape_cast %742 : vector<1x1x128xi32> to vector<1x128xi32>
    %744 = vector.shape_cast %741 : vector<1x128xi32> to vector<1x1x128xi32>
    tpu.vector_store %arg5[%c0_223, %c0_224, %c0_225], %744 {strides = array<i32>} : memref<1x1x128xi32, #tpu.memory_space<vmem>>, vector<1x1x128xi32>,
    return
  }
  func.func @transform_0(%arg0: i32, %arg1: memref<2xi32, #tpu.memory_space<smem>>) -> (i32, i32, i32) {
    %c0_i32 = arith.constant 0 : i32
    %c0_i32_0 = arith.constant 0 : i32
    %c0_i32_1 = arith.constant 0 : i32
    return %arg0, %c0_i32, %c0_i32_0 : i32, i32, i32
  }
  func.func @transform_1(%arg0: i32, %arg1: memref<2xi32, #tpu.memory_space<smem>>) -> (i32, i32) {
    %c0_i32 = arith.constant 0 : i32
    %c0_i32_0 = arith.constant 0 : i32
    %c0_i32_1 = arith.constant 0 : i32
    return %c0_i32, %c0_i32_0 : i32, i32
  }
  func.func @transform_2(%arg0: i32, %arg1: memref<2xi32, #tpu.memory_space<smem>>) -> (i32, i32) {
    %c0_i32 = arith.constant 0 : i32
    %c0_i32_0 = arith.constant 0 : i32
    %c0_i32_1 = arith.constant 0 : i32
    return %c0_i32, %c0_i32_0 : i32, i32
  }
  func.func @transform_3(%arg0: i32, %arg1: memref<2xi32, #tpu.memory_space<smem>>) -> (i32, i32, i32) {
    %c0_i32 = arith.constant 0 : i32
    %c0_i32_0 = arith.constant 0 : i32
    %c0_i32_1 = arith.constant 0 : i32
    return %arg0, %c0_i32, %c0_i32_0 : i32, i32, i32
  }
}

</mosaic_0001>

<bundles_post_ra>
// kernel: tpu_custom_call.1
= control target key start
LH: loop header
LB: loop body
LE: loop exit
PB: predicated region body
PF: predicated region fallthrough
CT: control target
= control target key end

     0   :  { %s3323_s0 = inlined_call_operand.vmem [shape: s32[2], index: 0, kind: input, shape index: {}]   ;;  %s3324_s1 = inlined_call_operand.vmem [shape: f32[2,16,32], index: 1, kind: input, shape index: {}]   ;;  %s3325_s2 = inlined_call_operand.vmem [shape: f32[104,144], index: 2, kind: input, shape index: {}]   ;;  %s3326_s3 = inlined_call_operand.vmem [shape: f32[8,144], index: 3, kind: input, shape index: {}]   ;;  %s3327_s4 = inlined_call_operand.hbm [shape: s32[2,1,128], index: 4, kind: output, shape index: {}]  }
   0x1   :  { %s9_s17 = sshll.u32 %s3323_s0, 4  ;;  %s10_s17 = int_to_ptr.vmem [resolvable:$true] %s9_s17 }
   0x2   :  { %s2554_s18 = scalar_lea.vmem %s10_s17, 16  ;;  %p2559_p1 = scmp.lt.s32.totalorder %s10_s17, %s10_s17 }
   0x3   :  { %p2555_p0 = scmp.ne.s32.totalorder %s10_s17, %s2554_s18  ;;  %p2560_p2 = scmp.lt.s32.totalorder %s2554_s18, %s2554_s18 }
   0x5   :  { %p2561_p3 = por %p2560_p2, %p2559_p1 }
   0x7   :  { %p2562_p4 = pnand %p2561_p3, %p2555_p0 }
   0x9   :  { %2565 = shalt.err (!%p2562_p4)  }
   0xa   :  { %s2632_s19 = smov [#allocation3]  }
   0xb   :  { %12 = dma.vmem_to_smem %s10_s17, 16, %s2632_s19, [#allocation2] }
   0xc   :  { %2610 = dma.done.wait [#allocation2], 16 }
   0xd   :  { %2611 = vsyncadd [#allocation2], 4294967280 }
   0xe   :  { %14 = sfence }
   0xf   :  { %15 = vsyncpa [#allocation5], 0 }
  0x10   :  { %17 = vsyncpa [#allocation5 + $0x1], 0  ;;  %s2672_s20 = smov 0   ;;  %s2674_s21 = smov 0  }
  0x11   :  { %s2676_s0 = smov 0   ;;  %s2678_s22 = smov 0  }
  0x12 LB: > { %s2693_s23 = sadd.s32 4294967295, %s2630_s22   ;;  %s2248_s24 = sadd.s32 4294967294, %s2630_s22   ;;  %s2630_s22 = sphi %s2678_s22, %s3337_s22   ;;  %s2626_s0 = sphi %s2676_s0, %s3336_s0   ;;  %s2622_s21 = sphi %s2674_s21, %s3335_s21   ;;  %s2618_s20 = sphi %s2672_s20, %s3334_s20  }
  0x13   : > { %s2697_s25 = sadd.s32 1, %s2630_s22   ;;  %s98_s26 = sadd.s32 1, %s2626_s0 }
  0x14   : > { %s95_s27 = ssub.s32 %s2630_s22, %s2697_s25  ;;  %p108_p5 = scmp.ne.s32.totalorder %s2626_s0, %s2622_s21 }
  0x15   : > { %p96_p6 = scmp.eq.s32.totalorder %s95_s27, 0  ;;  %p109_p7 = scmp.eq.s32.totalorder %s2693_s23, 1 }
  0x16   : > { %p114_p8 = scmp.ne.s32.totalorder %s2622_s21, %s2618_s20  ;;  %p115_p9 = scmp.eq.s32.totalorder %s2248_s24, 1 }
  0x17   : > { %s2708_s28 = scalar_select %p96_p6, %s2626_s0, %s98_s26  }
  0x18   : > { %p2710_p10 = por %p109_p7, %p108_p5  ;;  %p2714_p11 = por %p115_p9, %p114_p8 }
  0x19   : > { %p2251_p12 = scmp.ge.s32.totalorder %s2630_s22, 1  ;;  %p147_p13 = scmp.lt.s32.totalorder %s2630_s22, 3 }
  0x1b   : > { %p148_p0 = pnand %p2251_p12, %p147_p13 }
  0x1c   : > { %v177_v0 = vld [vmem:[%s3325_s2 + $0x8] sm:$0xff] (!%p148_p0)  ;;  %v179_v1 = vld [vmem:[%s3325_s2 + $0x18] sm:$0xff] (!%p148_p0)  ;;  %v176_v2 = vld [vmem:[%s3325_s2] sm:$0xff] (!%p148_p0)  ;;  %p170_p1 = scmp.lt.s32.totalorder (!%p148_p0), %s2693_s23, 1  ;;  %v2633_v7 = vmov (!%p148_p0), 0.0   ;;  %vm215_vm0 = vcmask (!%p148_p0), 261120   ;;  %v197_v15 = vlaneseq (!%p148_p0) }
  0x1d   : > { %151 = sbr.rel (%p148_p0) target bundleno = 6996 (0x1b54), region = 32  ;;  %v2397_v3 = vpack.c.bf16 (!%p148_p0), %v179_v1, %v177_v0  ;;  %v178_v4 = vld [vmem:[%s3325_s2 + $0x10] sm:$0xff] (!%p148_p0)  ;;  %v181_v5 = vld [vmem:[%s3325_s2 + $0x28] sm:$0xff] (!%p148_p0)  ;;  %v183_v6 = vld [vmem:[%s3325_s2 + $0x38] sm:$0xff] (!%p148_p0)  ;;  %286 = vmatprep.mubr.f32.mxu0 (!%p148_p0), %v2633_v7  ;;  %vm305_vm1 = vcmask (!%p148_p0), 130048   ;;  %s2634_s10 = smov (!%p148_p0), 48  }
  0x1e   : > { %v2399_v8 = vpack.c.bf16 (!%p148_p0), %v178_v4, %v176_v2  ;;  %v2401_v9 = vpack.c.bf16 (!%p148_p0), %v183_v6, %v181_v5  ;;  %v180_v10 = vld [vmem:[%s3325_s2 + $0x20] sm:$0xff] (!%p148_p0)  ;;  %v182_v11 = vld [vmem:[%s3325_s2 + $0x30] sm:$0xff] (!%p148_p0)  ;;  %v2751_v16 = vshrl.u32 (!%p148_p0), %v197_v15, 7  ;;  %s2635_s11 = smov (!%p148_p0), 80   ;;  %s2636_s12 = smov (!%p148_p0), 112   ;;  %vm2774_vm2 = vmpackc.low (!%p148_p0), %vm305_vm1, %vm305_vm1  ;;  %v2798_v49 = vand.u32 (!%p148_p0), 127, %v197_v15 }
  0x1f   : > { %2398 = vmatprep.subr.bf16.mxu0 (!%p148_p0), %v2397_v3  ;;  %v2403_v12 = vpack.c.bf16 (!%p148_p0), %v182_v11, %v180_v10  ;;  %v193_v18 = vld [vmem:[%s3326_s3] ss:$8 sm:$0x3] (!%p148_p0)  ;;  %s2637_s13 = smov (!%p148_p0), 64   ;;  %s2638_s14 = smov (!%p148_p0), 96   ;;  %v2639_v51 = vmov (!%p148_p0), -10000.0  }
  0x20   : > { %2400 = vmatpush1.bf16.msra.mxu0 (!%p148_p0), %v2399_v8  ;;  %v2754_v17 = vsub.s32 (!%p148_p0), 0, %v2751_v16  ;;  %v2761_v20 = vsub.s32 (!%p148_p0), 1, %v2751_v16  ;;  %s2796_s15 = sld [smem:[#allocation3 + %s2693_s23]] (!%p148_p0)  ;;  %s2640_s16 = smov (!%p148_p0), 16   ;;  %vm912_vm4 = vcmask (!%p148_p0), 392192   ;;  %vm1080_vm5 = vcmp.lt.s32.totalorder (!%p148_p0), %v2798_v49, 7 }
  0x21   : > { %2402 = vmatprep.subr.bf16.mxu0 (!%p148_p0), %v2401_v9  ;;  %s2641_s17 = smov (!%p148_p0), 32   ;;  %vm1081_vm6 = vcmp.eq.s32.totalorder (!%p148_p0), %v2798_v49, 5  ;;  %vm2877_vm7 = vcmp.eq.s32.totalorder (!%p148_p0), %v2751_v16, %v2798_v49 }
  0x22   : > { %v208_v19 = vrot.slane (!%p148_p0), %v193_v18, %v2754_v17  ;;  %v212_v24 = vrot.slane (!%p148_p0), %v193_v18, %v2761_v20 }
  0x24   : > { %s171_s26 = scalar_select %p170_p1, %s2693_s23, 1  ;;  %2404 = vmatpush1.bf16.msra.mxu0 %v2403_v12 }
  0x26   : > { %s2296_s27 = sshll.u32 %s171_s26, 4  ;;  %v199_v50 = vstv %s2796_s15  ;;  %p1096_p2 = scmp.eq.s32.totalorder %s2796_s15, 1 }
  0x27   : > { %s174_s7 = scalar_lea.vmem %s3324_s1, %s2296_s27  ;;  %vm200_vm3 = vcmp.lt.s32.totalorder %v2798_v49, %v199_v50  ;;  %p1095_p3 = scmp.gt.s32.totalorder %s2796_s15, 0 }
  0x28   : > { %v202_v13 = vld [vmem:[%s174_s7] sm:$0xff]  ;;  %v203_v14 = vld [vmem:[%s174_s7 + $0x8] sm:$0xff]  ;;  %v201_v52 = vsel %vm200_vm3, 0.0, %v2639_v51  ;;  %s1098_s5 = scalar_select %p1096_p2, 1, 0 }
  0x29   : > { %2254 = vmatmul.mubr.msk.f32.vlgmr.msra.gmra.mrb[0].mxu0 %vm215_vm0, %v202_v13  ;;  %s1102_s6 = scalar_select %p1095_p3, 1, 0 }
  0x2a   : > { %292 = vmatprep.mubr.f32.mxu0 %v2633_v7  ;;  %s2278_s9 = sadd.s32 4294967295, %s2796_s15  ;;  %s2281_s19 = sadd.s32 4294967292, %s2796_s15 }
  0x2b   : > { %p1146_p4 = scmp.eq.s32.totalorder %s2278_s9, 1  ;;  %p1145_p5 = scmp.gt.s32.totalorder %s2278_s9, 0 }
  0x2c   : > { %p1305_p12 = scmp.eq.s32.totalorder %s2281_s19, 1  ;;  %p1304_p13 = scmp.gt.s32.totalorder %s2281_s19, 0 }
  0x2d   : > { %2255 = vmatmul.mubr.msk.f32.gmra.mrb[2].mxu0 %vm215_vm0, %v203_v14  ;;  %s2282_s27 = sadd.s32 4294967291, %s2796_s15  ;;  %s2283_s7 = sadd.s32 4294967290, %s2796_s15 }
  0x2e   : > { %s1307_s24 = scalar_select %p1305_p12, 1, 0 }
  0x2f   : > { %s1311_s26 = scalar_select %p1304_p13, 1, 0 }
  0x30   : > { %p1358_p0 = scmp.eq.s32.totalorder %s2282_s27, 1  ;;  %p1357_p1 = scmp.gt.s32.totalorder %s2282_s27, 0 }
  0x31   : > { %p1411_p2 = scmp.eq.s32.totalorder %s2283_s7, 1  ;;  %p1410_p3 = scmp.gt.s32.totalorder %s2283_s7, 0 }
  0x33   : > { %s1413_s8 = scalar_select %p1411_p2, 1, 0 }
  0x34   : > { %s1417_s9 = scalar_select %p1410_p3, 1, 0 }
  0xfc   : > { %v288_v21 = vpop.f32.mrb[0].mxu0 }
  0xfd   : > { %v289_v22 = vadd.f32 %v288_v21, %v208_v19  ;;  %v290_v23 = vpop.f32.mrb[1].mxu0 }
  0xfe   : > { %v291_v28 = vadd.f32 %v290_v23, %v212_v24 }
  0xff   : > { %2337 = vmatprep.mubr.msk.f32.mxu1 %vm305_vm1, %v289_v22 }
 0x100   : > { %v294_v25 = vpop.f32.mrb[2].mxu0 }
 0x101   : > { %v295_v26 = vadd.f32 %v294_v25, %v208_v19  ;;  %v296_v27 = vpop.f32.mrb[3].mxu0 }
 0x102   : > { %v297_v29 = vadd.f32 %v296_v27, %v212_v24 }
 0x103   : > { %v2765_v30 = vpack.i.bf16 %v295_v26, %v289_v22 }
 0x104   : > { %v2767_v31 = vpack.c.bf16 %v297_v29, %v291_v28 }
 0x105   : > { %2512 = vrot.lane.b32.xlu1 %v2765_v30, %s2634_s10  ;;  %2502 = vrot.lane.b32.xlu0 %v2765_v30, %s2635_s11  ;;  %s1148_s10 = scalar_select %p1146_p4, 1, 0 }
 0x106   : > { %s1152_s11 = scalar_select %p1145_p5, 1, 0 }
 0x109   : > { %498 = vrot.lane.b32.xlu1 %v289_v22, %s2636_s12  ;;  %2507 = vrot.lane.b32.xlu0 %v2765_v30, %s2637_s13 }
 0x10d   : > { %698 = vrot.lane.b32.xlu1 %v289_v22, %s2638_s14  ;;  %500 = vrot.lane.b32.xlu0 %v295_v26, %s2636_s12  ;;  %s2279_s12 = sadd.s32 4294967294, %s2796_s15 }
 0x10e   : > { %p1199_p6 = scmp.eq.s32.totalorder %s2279_s12, 1  ;;  %p1198_p7 = scmp.gt.s32.totalorder %s2279_s12, 0 }
 0x110   : > { %s1201_s13 = scalar_select %p1199_p6, 1, 0 }
 0x111   : > { %700 = vrot.lane.b32.xlu0 %v295_v26, %s2638_s14  ;;  %s1205_s14 = scalar_select %p1198_p7, 1, 0 }
 0x177   : > { %v2513_v32 = vpop.permute.xlu1 %2512  ;;  %v2503_v33 = vpop.permute.xlu0 %2502 }
 0x178   : > { %v2505_v34 = vunpack.i.h.bf16 %v2503_v33  ;;  %v2504_v35 = vunpack.i.l.bf16 %v2503_v33  ;;  %v2515_v40 = vunpack.i.h.bf16 %v2513_v32  ;;  %v2514_v41 = vunpack.i.l.bf16 %v2513_v32 }
 0x17a   : > { %v2405_v37 = vpack.c.bf16 %v2505_v34, %v2504_v35  ;;  %v2425_v45 = vpack.c.bf16 %v2515_v40, %v2514_v41 }
 0x17b   : > { %v499_v38 = vpop.permute.xlu1 %498  ;;  %v2508_v39 = vpop.permute.xlu0 %2507 }
 0x17c   : > { %v2510_v42 = vunpack.i.h.bf16 %v2508_v39  ;;  %v2509_v43 = vunpack.i.l.bf16 %v2508_v39  ;;  %2407 = vmatprep.subr.msk.bf16.mxu1 %vm2774_vm2, %v2405_v37  ;;  %2351 = vmatprep.mubr.msk.f32.mxu0 %vm305_vm1, %v499_v38 }
 0x17d   : > { %2410 = vmatpush3.bf16.xpose.msk.msra.mxu1 %vm2774_vm2, %v2405_v37 }
 0x17e   : > { %v2415_v44 = vpack.c.bf16 %v2510_v42, %v2509_v43 }
 0x17f   : > { %v501_v46 = vpop.permute.xlu0 %500  ;;  %v699_v47 = vpop.permute.xlu1 %698 }
 0x180   : > { %2417 = vmatprep.subr.msk.bf16.mxu0 %vm2774_vm2, %v2415_v44 }
 0x181   : > { %2420 = vmatpush3.bf16.xpose.msk.msra.mxu0 %vm2774_vm2, %v2415_v44 }
 0x182   : > { %2427 = vmatprep.subr.msk.bf16.mxu0 %vm2774_vm2, %v2425_v45 }
 0x183   : > { %v701_v48 = vpop.permute.xlu0 %700 }
 0x184   : > { %2338 = vmatmul.mubr.msk.f32.vlgmr.msra.gmra.mrb[0].mxu1 %vm305_vm1, %v295_v26 }
 0x188   : > { %2352 = vmatmul.mubr.msk.f32.vlgmr.msra.gmra.mrb[4].mxu0 %vm305_vm1, %v501_v46 }
 0x189   : > { %2430 = vmatpush3.bf16.xpose.msk.msra.mxu0 %vm2774_vm2, %v2425_v45  ;;  %2365 = vmatprep.mubr.msk.f32.mxu0 %vm305_vm1, %v699_v47 }
 0x190   : > { %2366 = vmatmul.mubr.msk.f32.vlgmr.msra.gmra.mrb[6].mxu0 %vm305_vm1, %v701_v48 }
 0x257   : > { %v2339_v53 = vpop.f32.mrb[0].mxu1 }
 0x258   : > { %v386_v54 = vadd.f32 %v2339_v53, %v201_v52  ;;  %v380_v55 = vpop.f32.mrb[1].mxu1 }
 0x259   : > { %v381_v56 = vadd.f32 %v380_v55, %v201_v52 }
 0x25a   : > { %v392_v57 = vsel %vm305_vm1, %v386_v54, -inf }
 0x25b   : > { %v2353_v58 = vpop.f32.mrb[4].mxu0  ;;  %393 = vmax.xlane.f32.xlu0 %v392_v57  ;;  %v389_v59 = vsel %vm305_vm1, %v381_v56, -inf }
 0x25c   : > { %v586_v60 = vadd.f32 %v2353_v58, %v201_v52  ;;  %v580_v61 = vpop.f32.mrb[5].mxu0  ;;  %390 = vmax.xlane.f32.xlu1 %v389_v59 }
 0x25d   : > { %v581_v62 = vadd.f32 %v580_v61, %v201_v52 }
 0x25e   : > { %v592_v63 = vsel %vm305_vm1, %v586_v60, -inf }
 0x25f   : > { %v589_v0 = vsel %vm305_vm1, %v581_v62, -inf }
 0x260   : > { %590 = vmax.xlane.f32.xlu0 %v589_v0  ;;  %593 = vmax.xlane.f32.xlu1 %v592_v63 }
 0x263   : > { %v2367_v1 = vpop.f32.mrb[6].mxu0 }
 0x264   : > { %v786_v2 = vadd.f32 %v2367_v1, %v201_v52  ;;  %v780_v3 = vpop.f32.mrb[7].mxu0 }
 0x265   : > { %v781_v4 = vadd.f32 %v780_v3, %v201_v52 }
 0x266   : > { %v792_v5 = vsel %vm305_vm1, %v786_v2, -inf }
 0x267   : > { %793 = vmax.xlane.f32.xlu1 %v792_v5  ;;  %v789_v6 = vsel %vm305_vm1, %v781_v4, -inf  ;;  %v185_v5 = vld [vmem:[%s3325_s2 + $0x50] sm:$0xff] }
 0x268   : > { %790 = vmax.xlane.f32.xlu0 %v789_v6  ;;  %v186_v6 = vld [vmem:[%s3325_s2 + $0x60] sm:$0xff] }
 0x2e8   : > { %v394_v7 = vpop.xlane.xlu0 %393 }
 0x2e9   : > { %v396_v8 = vsub.f32 %v386_v54, %v394_v7  ;;  %v391_v9 = vpop.xlane.xlu1 %390 }
 0x2ea   : > { %v395_v10 = vsub.f32 %v381_v56, %v391_v9  ;;  %v188_v9 = vld [vmem:[%s3325_s2 + $0x80] sm:$0xff] }
 0x2eb   : > { %v399_v11 = vmul.f32 1.442695, %v396_v8 }
 0x2ec   : > { %v397_v12 = vmul.f32 1.442695, %v395_v10  ;;  %v189_v10 = vld [vmem:[%s3325_s2 + $0x90] sm:$0xff] }
 0x2ed   : > { %2526 = vpow2.f32 %v399_v11  ;;  %v591_v13 = vpop.xlane.xlu0 %590  ;;  %v594_v14 = vpop.xlane.xlu1 %593  ;;  %v2443_v11 = vpack.c.bf16 %v189_v10, %v188_v9 }
 0x2ee   : > { %2528 = vpow2.f32 %v397_v12  ;;  %v595_v15 = vsub.f32 %v581_v62, %v591_v13  ;;  %v596_v18 = vsub.f32 %v586_v60, %v594_v14 }
 0x2f0   : > { %v597_v19 = vmul.f32 1.442695, %v595_v15  ;;  %v599_v21 = vmul.f32 1.442695, %v596_v18 }
 0x2f2   : > { %2530 = vpow2.f32 %v597_v19 }
 0x2f3   : > { %2532 = vpow2.f32 %v599_v21 }
 0x2f4   : > { %v794_v22 = vpop.xlane.xlu1 %793 }
 0x2f5   : > { %v796_v23 = vsub.f32 %v786_v2, %v794_v22  ;;  %v791_v24 = vpop.xlane.xlu0 %790 }
 0x2f6   : > { %v795_v25 = vsub.f32 %v781_v4, %v791_v24  ;;  %v184_v4 = vld [vmem:[%s3325_s2 + $0x40] sm:$0xff] }
 0x2f7   : > { %v2527_v26 = vpop.eup %2526  ;;  %v799_v27 = vmul.f32 1.442695, %v796_v23  ;;  %v2435_v7 = vpack.c.bf16 %v185_v5, %v184_v4 }
 0x2f8   : > { %v2529_v28 = vpop.eup %2528  ;;  %v797_v29 = vmul.f32 1.442695, %v795_v25  ;;  %v404_v32 = vsel %vm305_vm1, %v2527_v26, 0.0 }
 0x2f9   : > { %2534 = vpow2.f32 %v799_v27  ;;  %405 = vadd.xlane.f32.xlu1 %v404_v32  ;;  %v401_v33 = vsel %vm305_vm1, %v2529_v28, 0.0  ;;  %v191_v32 = vld [vmem:[%s3325_s2 + $0xb0] sm:$0xff] }
 0x2fa   : > { %2536 = vpow2.f32 %v797_v29  ;;  %402 = vadd.xlane.f32.xlu0 %v401_v33  ;;  %v190_v29 = vld [vmem:[%s3325_s2 + $0xa0] sm:$0xff] }
 0x2fb   : > { %v2447_v33 = vpack.c.bf16 %v191_v32, %v190_v29 }
 0x2fc   : > { %v2531_v34 = vpop.eup %2530 }
 0x2fd   : > { %v2533_v35 = vpop.eup %2532  ;;  %v601_v36 = vsel %vm305_vm1, %v2531_v34, 0.0  ;;  %2448 = vmatprep.subr.bf16.mxu0 %v2447_v33 }
 0x2fe   : > { %602 = vadd.xlane.f32.xlu0 %v601_v36  ;;  %v604_v37 = vsel %vm305_vm1, %v2533_v35, 0.0  ;;  %2450 = vmatpush3.bf16.msra.mxu0 %v2447_v33 }
 0x2ff   : > { %605 = vadd.xlane.f32.xlu1 %v604_v37 }
 0x303   : > { %v2535_v38 = vpop.eup %2534 }
 0x304   : > { %v2537_v39 = vpop.eup %2536  ;;  %v804_v40 = vsel %vm305_vm1, %v2535_v38, 0.0 }
 0x305   : > { %805 = vadd.xlane.f32.xlu1 %v804_v40  ;;  %v801_v41 = vsel %vm305_vm1, %v2537_v39, 0.0 }
 0x306   : > { %802 = vadd.xlane.f32.xlu0 %v801_v41 }
 0x316   : > { %2522 = vrot.lane.b32.xlu1 %v2765_v30, %s2640_s16 }
 0x31c   : > { %2517 = vrot.lane.b32.xlu0 %v2765_v30, %s2641_s17 }
 0x386   : > { %v406_v43 = vpop.xlane.xlu1 %405 }
 0x387   : > { %v403_v42 = vpop.xlane.xlu0 %402 }
 0x388   : > { %2538 = vrcp.f32 %v403_v42 }
 0x389   : > { %2540 = vrcp.f32 %v406_v43 }
 0x38b   : > { %v603_v45 = vpop.xlane.xlu0 %602 }
 0x38c   : > { %v606_v44 = vpop.xlane.xlu1 %605  ;;  %2542 = vrcp.f32 %v603_v45 }
 0x38d   : > { %2544 = vrcp.f32 %v606_v44 }
 0x392   : > { %v2539_v46 = vpop.eup %2538  ;;  %v806_v47 = vpop.xlane.xlu1 %805 }
 0x393   : > { %v803_v48 = vpop.xlane.xlu0 %802  ;;  %v409_v50 = vmul.f32 %v2539_v46, %v2529_v28  ;;  %v2541_v57 = vpop.eup %2540 }
 0x394   : > { %2546 = vrcp.f32 %v803_v48  ;;  %v410_v60 = vmul.f32 %v2541_v57, %v2527_v26 }
 0x395   : > { %2344 = vmatprep.mubr.msk.f32.mxu1 %vm305_vm1, %v409_v50  ;;  %2548 = vrcp.f32 %v806_v47 }
 0x396   : > { %v2523_v51 = vpop.permute.xlu1 %2522  ;;  %v2543_v58 = vpop.eup %2542 }
 0x397   : > { %v2518_v52 = vpop.permute.xlu0 %2517  ;;  %v2525_v53 = vunpack.i.h.bf16 %v2523_v51  ;;  %v2524_v54 = vunpack.i.l.bf16 %v2523_v51  ;;  %v2545_v61 = vpop.eup %2544  ;;  %v609_v62 = vmul.f32 %v2543_v58, %v2531_v34  ;;  %v2861_v34 = vld [vmem:[%s3325_s2 + $0xc0] sm:$0xff] }
 0x398   : > { %v2520_v30 = vunpack.i.h.bf16 %v2518_v52  ;;  %v2519_v55 = vunpack.i.l.bf16 %v2518_v52  ;;  %v610_v0 = vmul.f32 %v2545_v61, %v2533_v35  ;;  %v2642_v35 = vmov -1e+09   ;;  %v2895_v61 = vld [vmem:[%s3326_s3 + $0x3] ss:$0 sm:$0xff] }
 0x399   : > { %v2421_v59 = vpack.c.bf16 %v2525_v53, %v2524_v54  ;;  %v1082_v36 = vsel %vm1080_vm5, -100.0, %v2642_v35  ;;  %v1202_v35 = vstv %s1201_s13  ;;  %s2285_s13 = sadd.s32 4294967288, %s2796_s15 }
 0x39a   : > { %v2411_v56 = vpack.c.bf16 %v2520_v30, %v2519_v55  ;;  %v1083_v37 = vsel %vm1081_vm6, 0.0, %v1082_v36  ;;  %v195_v30 = vld [vmem:[%s3326_s3 + $0x2] ss:$0 sm:$0xff]  ;;  %v1206_v36 = vstv %s1205_s14  ;;  %vm1203_vm12 = vcmp.eq.s32.totalorder %v1202_v35, 1  ;;  %p1517_p6 = scmp.eq.s32.totalorder %s2285_s13, 1  ;;  %p1516_p7 = scmp.gt.s32.totalorder %s2285_s13, 0 }
 0x39b   : > { %vm1207_vm13 = vcmp.eq.s32.totalorder %v1206_v36, 1 }
 0x39c   : > { %2412 = vmatprep.subr.bf16.mxu1 %v2411_v56  ;;  %s1519_s14 = scalar_select %p1517_p6, 1, 0 }
 0x39d   : > { %2414 = vmatpush3.bf16.msra.mxu1 %v2411_v56 }
 0x39e   : > { %2422 = vmatprep.subr.bf16.mxu1 %v2421_v59  ;;  %v2547_v63 = vpop.eup %2546 }
 0x39f   : > { %v2549_v1 = vpop.eup %2548  ;;  %v809_v2 = vmul.f32 %v2547_v63, %v2537_v39  ;;  %v194_v39 = vld [vmem:[%s3326_s3 + $0x1] ss:$0 sm:$0xff] }
 0x3a0   : > { %2345 = vmatmul.mubr.msk.f32.vlgmr.msra.gmra.mrb[2].mxu1 %vm305_vm1, %v410_v60  ;;  %v810_v3 = vmul.f32 %v2549_v1, %v2535_v38  ;;  %v1084_v38 = vadd.f32 %v1083_v37, %v2861_v34  ;;  %v1099_v60 = vstv %s1098_s5  ;;  %s1360_s5 = scalar_select %p1358_p0, 1, 0 }
 0x3a1   : > { %2424 = vmatpush3.bf16.msra.mxu1 %v2421_v59  ;;  %2358 = vmatprep.mubr.msk.f32.mxu1 %vm305_vm1, %v609_v62  ;;  %v1103_v62 = vstv %s1102_s6  ;;  %vm1100_vm8 = vcmp.eq.s32.totalorder %v1099_v60, 1  ;;  %v1267_v60 = vsub.s32 3, %v2751_v16  ;;  %s1364_s6 = scalar_select %p1357_p1, 1, 0 }
 0x3a2   : > { %2432 = vmatprep.subr.bf16.mxu1 %v2767_v31  ;;  %vm1104_vm9 = vcmp.eq.s32.totalorder %v1103_v62, 1 }
 0x3a4   : > { %2359 = vmatmul.mubr.msk.f32.vlgmr.msra.gmra.mrb[4].mxu1 %vm305_vm1, %v610_v0 }
 0x3a5   : > { %2434 = vmatpush3.bf16.msra.mxu1 %v2767_v31  ;;  %2372 = vmatprep.mubr.msk.f32.mxu1 %vm305_vm1, %v809_v2  ;;  %v187_v31 = vld [vmem:[%s3325_s2 + $0x70] sm:$0xff] }
 0x3a6   : > { %v2439_v8 = vpack.c.bf16 %v187_v31, %v186_v6  ;;  %2436 = vmatprep.subr.bf16.mxu1 %v2435_v7 }
 0x3a8   : > { %2373 = vmatmul.mubr.msk.f32.vlgmr.msra.gmra.mrb[6].mxu1 %vm305_vm1, %v810_v3 }
 0x3a9   : > { %2438 = vmatpush3.bf16.msra.mxu1 %v2435_v7 }
 0x3aa   : > { %2440 = vmatprep.subr.bf16.mxu1 %v2439_v8 }
 0x3ad   : > { %2442 = vmatpush3.bf16.msra.mxu1 %v2439_v8 }
 0x3ae   : > { %2444 = vmatprep.subr.bf16.mxu1 %v2443_v11 }
 0x3b1   : > { %2446 = vmatpush3.bf16.msra.mxu1 %v2443_v11 }
 0x473   : > { %v2346_v12 = vpop.f32.mrb[2].mxu1 }
 0x474   : > { %v489_v13 = vpop.f32.mrb[3].mxu1 }
 0x477   : > { %v2360_v14 = vpop.f32.mrb[4].mxu1 }
 0x478   : > { %896 = vrot.lane.b32.xlu0 %v2360_v14, %s2640_s16  ;;  %v689_v15 = vpop.f32.mrb[5].mxu1 }
 0x479   : > { %894 = vrot.lane.b32.xlu1 %v689_v15, %s2640_s16  ;;  %s2280_s16 = sadd.s32 4294967293, %s2796_s15 }
 0x47a   : > { %p1252_p8 = scmp.eq.s32.totalorder %s2280_s16, 1  ;;  %p1251_p9 = scmp.gt.s32.totalorder %s2280_s16, 0 }
 0x47b   : > { %v2374_v18 = vpop.f32.mrb[6].mxu1  ;;  %s1523_s16 = scalar_select %p1516_p7, 1, 0 }
 0x47c   : > { %904 = vrot.lane.b32.xlu0 %v2374_v18, %s2641_s17  ;;  %v883_v19 = vpop.f32.mrb[7].mxu1  ;;  %s1258_s18 = scalar_select %p1251_p9, 1, 0 }
 0x47d   : > { %902 = vrot.lane.b32.xlu1 %v883_v19, %s2641_s17  ;;  %s1254_s17 = scalar_select %p1252_p8, 1, 0 }
 0x4a1   : > { %1085 = vmax.xlane.f32.xlu1 %v1084_v38 }
 0x4ea   : > { %v897_v21 = vpop.permute.xlu0 %896 }
 0x4eb   : > { %v895_v22 = vpop.permute.xlu1 %894  ;;  %v909_v26 = vsel %vm305_vm1, %v2346_v12, %v897_v21  ;;  %v1149_v12 = vstv %s1148_s10  ;;  %s2284_s10 = sadd.s32 4294967289, %s2796_s15 }
 0x4ec   : > { %v908_v24 = vsel %vm305_vm1, %v489_v13, %v895_v22  ;;  %v1153_v13 = vstv %s1152_s11  ;;  %vm1150_vm10 = vcmp.eq.s32.totalorder %v1149_v12, 1  ;;  %v1308_v12 = vstv %s1307_s24  ;;  %p1464_p4 = scmp.eq.s32.totalorder %s2284_s10, 1  ;;  %p1463_p5 = scmp.gt.s32.totalorder %s2284_s10, 0 }
 0x4ed   : > { %vm1154_vm11 = vcmp.eq.s32.totalorder %v1153_v13, 1  ;;  %v1312_v13 = vstv %s1311_s26  ;;  %s2287_s24 = sadd.s32 4294967286, %s2796_s15 }
 0x4ee   : > { %v905_v23 = vpop.permute.xlu0 %904  ;;  %s1466_s11 = scalar_select %p1464_p4, 1, 0 }
 0x4ef   : > { %v903_v25 = vpop.permute.xlu1 %902  ;;  %v911_v28 = vsel %vm215_vm0, %v909_v26, %v905_v23  ;;  %s1470_s12 = scalar_select %p1463_p5, 1, 0 }
 0x4f0   : > { %v910_v27 = vsel %vm215_vm0, %v908_v24, %v903_v25  ;;  %vm1309_vm0 = vcmp.eq.s32.totalorder %v1308_v12, 1  ;;  %p1623_p12 = scmp.eq.s32.totalorder %s2287_s24, 1  ;;  %p1622_p13 = scmp.gt.s32.totalorder %s2287_s24, 0 }
 0x4f1   : > { %2387 = vmatprep.mubr.msk.f32.mxu1 %vm912_vm4, %v910_v27 }
 0x4f2   : > { %2388 = vmatmul.mubr.msk.f32.vlgmr.msra.gmra.mrb[8].mxu1 %vm912_vm4, %v911_v28  ;;  %s1625_s26 = scalar_select %p1623_p12, 1, 0 }
 0x4f3   : > { %s1629_s27 = scalar_select %p1622_p13, 1, 0 }
 0x52e   : > { %v1086_v47 = vpop.xlane.xlu1 %1085 }
 0x52f   : > { %v1087_v48 = vsel %vm2877_vm7, %v1086_v47, -1e+09 }
 0x530   : > { %v1088_v50 = vrot.slane %v1087_v48, 4 }
 0x532   : > { %v1089_v51 = vmax.f32 %v1087_v48, %v1088_v50 }
 0x534   : > { %v1090_v52 = vrot.slane %v1089_v51, 2 }
 0x536   : > { %v1091_v53 = vmax.f32 %v1089_v51, %v1090_v52 }
 0x538   : > { %v1092_v54 = vrot.slane %v1091_v53, 1 }
 0x53a   : > { %v1093_v58 = vmax.f32 %v1091_v53, %v1092_v54 }
 0x5c5   : > { %v2389_v40 = vpop.f32.mrb[8].mxu1 }
 0x5c6   : > { %v991_v41 = vadd.f32 %v2389_v40, %v194_v39  ;;  %v985_v42 = vpop.f32.mrb[9].mxu1 }
 0x5c7   : > { %v986_v43 = vadd.f32 %v985_v42, %v194_v39  ;;  %v1214_v39 = vsub.s32 2, %v2751_v16 }
 0x5c9   : > { %2550 = vtanh.f32 %v986_v43 }
 0x5ca   : > { %2552 = vtanh.f32 %v991_v41 }
 0x5d3   : > { %v2551_v44 = vpop.eup %2550 }
 0x5d4   : > { %v2553_v45 = vpop.eup %2552  ;;  %2394 = vmatprep.mubr.msk.f32.mxu0 %vm305_vm1, %v2551_v44 }
 0x5d5   : > { %2395 = vmatmul.mubr.msk.f32.vlgmr.msra.gmra.mrb[8].mxu0 %vm305_vm1, %v2553_v45  ;;  %vm1313_vm1 = vcmp.eq.s32.totalorder %v1312_v13, 1 }
 0x6a8   : > { %v2396_v55 = vpop.f32.mrb[8].mxu0 }
 0x6a9   : > { %v2888_v56 = vadd.f32 %v2396_v55, %v195_v30  ;;  %v1068_v57 = vpop.f32.mrb[9].mxu0  ;;  %v1259_v55 = vstv %s1258_s18 }
 0x6aa   : > { %v2890_v59 = vadd.f32 %v1068_v57, %v195_v30  ;;  %v1255_v30 = vstv %s1254_s17  ;;  %vm1260_vm15 = vcmp.eq.s32.totalorder %v1259_v55, 1  ;;  %s2286_s17 = sadd.s32 4294967287, %s2796_s15 }
 0x6ab   : > { %vm1256_vm14 = vcmp.eq.s32.totalorder %v1255_v30, 1  ;;  %p1570_p8 = scmp.eq.s32.totalorder %s2286_s17, 1  ;;  %p1569_p9 = scmp.gt.s32.totalorder %s2286_s17, 0 }
 0x6ac   : > { %v1094_v63 = vadd.f32 %v1093_v58, %v2890_v59 }
 0x6ad   : > { %s1572_s18 = scalar_select %p1570_p8, 1, 0 }
 0x6ae   : > { %v1097_v0 = vadd.f32 %v1094_v63, %v2895_v61  ;;  %s1576_s19 = scalar_select %p1569_p9, 1, 0 }
 0x6b0   : > { %v1101_v1 = vsel %vm1100_vm8, %v1097_v0, %v1094_v63 }
 0x6b1   : > { %v1105_v2 = vsel %vm1104_vm9, %v1101_v1, %v1083_v37 }
 0x6b2   : > { %v1109_v3 = vrot.slane %v1105_v2, %v2754_v17  ;;  %v1156_v18 = vrot.slane %v1105_v2, 7 }
 0x6b4   : > { %v2901_v4 = vadd.f32 %v1109_v3, %v2861_v34 }
 0x6b6   : > { %1111 = vmax.xlane.f32.xlu0 %v2901_v4 }
 0x743   : > { %v2904_v5 = vpop.xlane.xlu0 %1111 }
 0x744   : > { %v1136_v6 = vsel %vm2877_vm7, %v2904_v5, -1e+09 }
 0x745   : > { %v1137_v7 = vrot.slane %v1136_v6, 4 }
 0x747   : > { %v1138_v31 = vmax.f32 %v1136_v6, %v1137_v7 }
 0x749   : > { %v1139_v8 = vrot.slane %v1138_v31, 2 }
 0x74b   : > { %v1140_v9 = vmax.f32 %v1138_v31, %v1139_v8 }
 0x74d   : > { %v1141_v10 = vrot.slane %v1140_v9, 1 }
 0x74f   : > { %v1142_v11 = vmax.f32 %v1140_v9, %v1141_v10 }
 0x751   : > { %v1143_v14 = vadd.f32 %v1142_v11, %v2890_v59 }
 0x753   : > { %v1147_v15 = vadd.f32 %v1143_v14, %v2895_v61 }
 0x755   : > { %v1151_v19 = vsel %vm1150_vm10, %v1147_v15, %v1143_v14 }
 0x756   : > { %v1158_v21 = vsel %vm1154_vm11, %v1151_v19, %v1156_v18  ;;  %v1320_v18 = vsub.s32 4, %v2751_v16 }
 0x757   : > { %v1162_v22 = vrot.slane %v1158_v21, %v2761_v20  ;;  %v1209_v40 = vrot.slane %v1158_v21, 7 }
 0x759   : > { %v2914_v23 = vadd.f32 %v1162_v22, %v2861_v34 }
 0x75b   : > { %1164 = vmax.xlane.f32.xlu0 %v2914_v23 }
 0x7e8   : > { %v2917_v24 = vpop.xlane.xlu0 %1164 }
 0x7e9   : > { %v1189_v25 = vsel %vm2877_vm7, %v2917_v24, -1e+09 }
 0x7ea   : > { %v1190_v26 = vrot.slane %v1189_v25, 4 }
 0x7ec   : > { %v1191_v27 = vmax.f32 %v1189_v25, %v1190_v26 }
 0x7ee   : > { %v1192_v28 = vrot.slane %v1191_v27, 2 }
 0x7f0   : > { %v1193_v29 = vmax.f32 %v1191_v27, %v1192_v28 }
 0x7f2   : > { %v1194_v32 = vrot.slane %v1193_v29, 1 }
 0x7f4   : > { %v1195_v33 = vmax.f32 %v1193_v29, %v1194_v32 }
 0x7f6   : > { %v1196_v37 = vadd.f32 %v1195_v33, %v2890_v59 }
 0x7f8   : > { %v1200_v38 = vadd.f32 %v1196_v37, %v2895_v61 }
 0x7fa   : > { %v1204_v41 = vsel %vm1203_vm12, %v1200_v38, %v1196_v37  ;;  %v1361_v38 = vstv %s1360_s5  ;;  %s2288_s5 = sadd.s32 4294967285, %s2796_s15 }
 0x7fb   : > { %v1211_v42 = vsel %vm1207_vm13, %v1204_v41, %v1209_v40  ;;  %v1365_v40 = vstv %s1364_s6  ;;  %vm1362_vm2 = vcmp.eq.s32.totalorder %v1361_v38, 1  ;;  %p1676_p0 = scmp.eq.s32.totalorder %s2288_s5, 1  ;;  %p1675_p1 = scmp.gt.s32.totalorder %s2288_s5, 0 }
 0x7fc   : > { %v1215_v43 = vrot.slane %v1211_v42, %v1214_v39  ;;  %v1262_v62 = vrot.slane %v1211_v42, 7  ;;  %vm1366_vm3 = vcmp.eq.s32.totalorder %v1365_v40, 1 }
 0x7fd   : > { %s1678_s6 = scalar_select %p1676_p0, 1, 0 }
 0x7fe   : > { %v2929_v44 = vadd.f32 %v1215_v43, %v2861_v34  ;;  %v1373_v43 = vsub.s32 5, %v2751_v16  ;;  %s1682_s7 = scalar_select %p1675_p1, 1, 0 }
 0x800   : > { %1217 = vmax.xlane.f32.xlu1 %v2929_v44 }
 0x88d   : > { %v2932_v45 = vpop.xlane.xlu1 %1217 }
 0x88e   : > { %v1242_v47 = vsel %vm2877_vm7, %v2932_v45, -1e+09 }
 0x88f   : > { %v1243_v48 = vrot.slane %v1242_v47, 4 }
 0x891   : > { %v1244_v50 = vmax.f32 %v1242_v47, %v1243_v48 }
 0x893   : > { %v1245_v51 = vrot.slane %v1244_v50, 2 }
 0x895   : > { %v1246_v52 = vmax.f32 %v1244_v50, %v1245_v51 }
 0x897   : > { %v1247_v53 = vrot.slane %v1246_v52, 1 }
 0x899   : > { %v1248_v54 = vmax.f32 %v1246_v52, %v1247_v53 }
 0x89b   : > { %v1249_v57 = vadd.f32 %v1248_v54, %v2890_v59 }
 0x89d   : > { %v1253_v58 = vadd.f32 %v1249_v57, %v2895_v61 }
 0x89f   : > { %v1257_v63 = vsel %vm1256_vm14, %v1253_v58, %v1249_v57 }
 0x8a0   : > { %v1264_v0 = vsel %vm1260_vm15, %v1257_v63, %v1262_v62 }
 0x8a1   : > { %v1268_v1 = vrot.slane %v1264_v0, %v1267_v60  ;;  %v1315_v19 = vrot.slane %v1264_v0, 7  ;;  %v1414_v0 = vstv %s1413_s8  ;;  %s2289_s8 = sadd.s32 4294967284, %s2796_s15 }
 0x8a2   : > { %vm1415_vm4 = vcmp.eq.s32.totalorder %v1414_v0, 1  ;;  %p1729_p2 = scmp.eq.s32.totalorder %s2289_s8, 1  ;;  %p1728_p3 = scmp.gt.s32.totalorder %s2289_s8, 0 }
 0x8a3   : > { %v2944_v2 = vadd.f32 %v1268_v1, %v2861_v34  ;;  %v1418_v1 = vstv %s1417_s9 }
 0x8a4   : > { %vm1419_vm8 = vcmp.eq.s32.totalorder %v1418_v1, 1  ;;  %s1731_s9 = scalar_select %p1729_p2, 1, 0 }
 0x8a5   : > { %1270 = vmax.xlane.f32.xlu0 %v2944_v2  ;;  %s1735_s10 = scalar_select %p1728_p3, 1, 0 }
 0x932   : > { %v2947_v3 = vpop.xlane.xlu0 %1270 }
 0x933   : > { %v1295_v6 = vsel %vm2877_vm7, %v2947_v3, -1e+09 }
 0x934   : > { %v1296_v7 = vrot.slane %v1295_v6, 4 }
 0x936   : > { %v1297_v31 = vmax.f32 %v1295_v6, %v1296_v7 }
 0x938   : > { %v1298_v8 = vrot.slane %v1297_v31, 2 }
 0x93a   : > { %v1299_v9 = vmax.f32 %v1297_v31, %v1298_v8  ;;  %v1426_v31 = vsub.s32 6, %v2751_v16 }
 0x93c   : > { %v1300_v10 = vrot.slane %v1299_v9, 1 }
 0x93e   : > { %v1301_v11 = vmax.f32 %v1299_v9, %v1300_v10 }
 0x940   : > { %v1302_v14 = vadd.f32 %v1301_v11, %v2890_v59 }
 0x942   : > { %v1306_v15 = vadd.f32 %v1302_v14, %v2895_v61 }
 0x944   : > { %v1310_v21 = vsel %vm1309_vm0, %v1306_v15, %v1302_v14 }
 0x945   : > { %v1317_v22 = vsel %vm1313_vm1, %v1310_v21, %v1315_v19 }
 0x946   : > { %v1321_v25 = vrot.slane %v1317_v22, %v1320_v18  ;;  %v1368_v47 = vrot.slane %v1317_v22, 7 }
 0x948   : > { %v2959_v26 = vadd.f32 %v1321_v25, %v2861_v34 }
 0x94a   : > { %1323 = vmax.xlane.f32.xlu1 %v2959_v26 }
 0x9d7   : > { %v2962_v27 = vpop.xlane.xlu1 %1323 }
 0x9d8   : > { %v1348_v28 = vsel %vm2877_vm7, %v2962_v27, -1e+09 }
 0x9d9   : > { %v1349_v29 = vrot.slane %v1348_v28, 4 }
 0x9db   : > { %v1350_v32 = vmax.f32 %v1348_v28, %v1349_v29  ;;  %v1467_v29 = vstv %s1466_s11  ;;  %s2290_s11 = sadd.s32 4294967283, %s2796_s15 }
 0x9dc   : > { %vm1468_vm9 = vcmp.eq.s32.totalorder %v1467_v29, 1  ;;  %p1782_p4 = scmp.eq.s32.totalorder %s2290_s11, 1  ;;  %p1781_p5 = scmp.gt.s32.totalorder %s2290_s11, 0 }
 0x9dd   : > { %v1351_v33 = vrot.slane %v1350_v32, 2 }
 0x9de   : > { %s1788_s13 = scalar_select %p1781_p5, 1, 0 }
 0x9df   : > { %v1352_v35 = vmax.f32 %v1350_v32, %v1351_v33  ;;  %v1471_v32 = vstv %s1470_s12  ;;  %s1784_s12 = scalar_select %p1782_p4, 1, 0 }
 0x9e0   : > { %vm1472_vm10 = vcmp.eq.s32.totalorder %v1471_v32, 1 }
 0x9e1   : > { %v1353_v36 = vrot.slane %v1352_v35, 1 }
 0x9e3   : > { %v1354_v37 = vmax.f32 %v1352_v35, %v1353_v36  ;;  %v1479_v36 = vsub.s32 7, %v2751_v16 }
 0x9e5   : > { %v1355_v41 = vadd.f32 %v1354_v37, %v2890_v59 }
 0x9e7   : > { %v1359_v42 = vadd.f32 %v1355_v41, %v2895_v61 }
 0x9e9   : > { %v1363_v48 = vsel %vm1362_vm2, %v1359_v42, %v1355_v41 }
 0x9ea   : > { %v1370_v50 = vsel %vm1366_vm3, %v1363_v48, %v1368_v47 }
 0x9eb   : > { %v1374_v51 = vrot.slane %v1370_v50, %v1373_v43  ;;  %v1421_v8 = vrot.slane %v1370_v50, 7 }
 0x9ed   : > { %v2974_v52 = vadd.f32 %v1374_v51, %v2861_v34 }
 0x9ef   : > { %1376 = vmax.xlane.f32.xlu0 %v2974_v52 }
 0xa7c   : > { %v2977_v53 = vpop.xlane.xlu0 %1376 }
 0xa7d   : > { %v1401_v54 = vsel %vm2877_vm7, %v2977_v53, -1e+09 }
 0xa7e   : > { %v1402_v30 = vrot.slane %v1401_v54, 4 }
 0xa80   : > { %v1403_v55 = vmax.f32 %v1401_v54, %v1402_v30 }
 0xa82   : > { %v1404_v57 = vrot.slane %v1403_v55, 2 }
 0xa84   : > { %v1405_v58 = vmax.f32 %v1403_v55, %v1404_v57  ;;  %v1520_v57 = vstv %s1519_s14  ;;  %s2291_s14 = sadd.s32 4294967282, %s2796_s15 }
 0xa85   : > { %vm1521_vm11 = vcmp.eq.s32.totalorder %v1520_v57, 1  ;;  %p1835_p6 = scmp.eq.s32.totalorder %s2291_s14, 1  ;;  %p1834_p7 = scmp.gt.s32.totalorder %s2291_s14, 0 }
 0xa86   : > { %v1406_v62 = vrot.slane %v1405_v58, 1 }
 0xa87   : > { %s1841_s17 = scalar_select %p1834_p7, 1, 0 }
 0xa88   : > { %v1407_v63 = vmax.f32 %v1405_v58, %v1406_v62  ;;  %v1524_v58 = vstv %s1523_s16  ;;  %s1837_s16 = scalar_select %p1835_p6, 1, 0 }
 0xa89   : > { %vm1525_vm12 = vcmp.eq.s32.totalorder %v1524_v58, 1 }
 0xa8a   : > { %v1408_v6 = vadd.f32 %v1407_v63, %v2890_v59 }
 0xa8c   : > { %v1412_v7 = vadd.f32 %v1408_v6, %v2895_v61 }
 0xa8e   : > { %v1416_v9 = vsel %vm1415_vm4, %v1412_v7, %v1408_v6 }
 0xa8f   : > { %v1423_v10 = vsel %vm1419_vm8, %v1416_v9, %v1421_v8 }
 0xa90   : > { %v1427_v11 = vrot.slane %v1423_v10, %v1426_v31  ;;  %v1474_v37 = vrot.slane %v1423_v10, 7 }
 0xa92   : > { %v2989_v12 = vadd.f32 %v1427_v11, %v2861_v34 }
 0xa94   : > { %1429 = vmax.xlane.f32.xlu1 %v2989_v12 }
 0xb21   : > { %v2992_v13 = vpop.xlane.xlu1 %1429 }
 0xb22   : > { %v1454_v14 = vsel %vm2877_vm7, %v2992_v13, -1e+09 }
 0xb23   : > { %v1455_v15 = vrot.slane %v1454_v14, 4 }
 0xb25   : > { %v1456_v19 = vmax.f32 %v1454_v14, %v1455_v15 }
 0xb27   : > { %v1457_v21 = vrot.slane %v1456_v19, 2 }
 0xb29   : > { %v1458_v22 = vmax.f32 %v1456_v19, %v1457_v21 }
 0xb2b   : > { %v1459_v25 = vrot.slane %v1458_v22, 1 }
 0xb2d   : > { %v1460_v28 = vmax.f32 %v1458_v22, %v1459_v25  ;;  %v1573_v22 = vstv %s1572_s18  ;;  %v1577_v25 = vstv %s1576_s19  ;;  %s2292_s18 = sadd.s32 4294967281, %s2796_s15  ;;  %s168_s15 = sand.u32 1, %s2622_s21  }
 0xb2e   : > { %vm1574_vm13 = vcmp.eq.s32.totalorder %v1573_v22, 1  ;;  %vm1578_vm14 = vcmp.eq.s32.totalorder %v1577_v25, 1  ;;  %p1888_p8 = scmp.eq.s32.totalorder %s2292_s18, 1  ;;  %p1887_p9 = scmp.gt.s32.totalorder %s2292_s18, 0 }
 0xb2f   : > { %v1461_v33 = vadd.f32 %v1460_v28, %v2890_v59 }
 0xb30   : > { %s1890_s19 = scalar_select %p1888_p8, 1, 0 }
 0xb31   : > { %v1465_v35 = vadd.f32 %v1461_v33, %v2895_v61  ;;  %s1894_s24 = scalar_select %p1887_p9, 1, 0 }
 0xb33   : > { %v1469_v38 = vsel %vm1468_vm9, %v1465_v35, %v1461_v33 }
 0xb34   : > { %v1476_v40 = vsel %vm1472_vm10, %v1469_v38, %v1474_v37 }
 0xb35   : > { %v1480_v41 = vrot.slane %v1476_v40, %v1479_v36  ;;  %v1527_v0 = vrot.slane %v1476_v40, 7 }
 0xb37   : > { %v3002_v42 = vadd.f32 %v1480_v41, %v2861_v34 }
 0xb39   : > { %1482 = vmax.xlane.f32.xlu0 %v3002_v42 }
 0xbc6   : > { %v3005_v47 = vpop.xlane.xlu0 %1482 }
 0xbc7   : > { %v1507_v59 = vsel %vm2877_vm7, %v3005_v47, -1e+09 }
 0xbc8   : > { %v1508_v48 = vrot.slane %v1507_v59, 4 }
 0xbca   : > { %v1509_v50 = vmax.f32 %v1507_v59, %v1508_v48 }
 0xbcc   : > { %v1510_v51 = vrot.slane %v1509_v50, 2 }
 0xbce   : > { %v1511_v54 = vmax.f32 %v1509_v50, %v1510_v51 }
 0xbd0   : > { %v1512_v30 = vrot.slane %v1511_v54, 1 }
 0xbd2   : > { %v1513_v55 = vmax.f32 %v1511_v54, %v1512_v30  ;;  %v1626_v54 = vstv %s1625_s26  ;;  %v1630_v30 = vstv %s1629_s27  ;;  %s2293_s26 = sshll.u32 %s2693_s23, 4  ;;  %s169_s27 = scalar_lea.vmem [#allocation4], %s168_s15 }
 0xbd3   : > { %vm1627_vm15 = vcmp.eq.s32.totalorder %v1626_v54, 1  ;;  %vm1631_vm0 = vcmp.eq.s32.totalorder %v1630_v30, 1  ;;  %v1736_v54 = vstv %s1735_s10  ;;  %s2193_s5 = sshll.u32 %s169_s27, 4  ;;  %s3281_s8 = scalar_lea.hbm %s3327_s4, %s2293_s26  ;;  %s3283_s5 = int_to_ptr.vmem [resolvable:$true] %s2193_s5 }
 0xbd4   : > { %v1514_v62 = vadd.f32 %v1513_v55, %v2888_v56  ;;  %vm1737_vm4 = vcmp.eq.s32.totalorder %v1736_v54, 1  ;;  %v1838_v54 = vstv %s1837_s16  ;;  %s2566_s10 = scalar_lea.vmem %s3283_s5, 16  ;;  %s2643_s23 = smov [#allocation4]  }
 0xbd5   : > { %vm1839_vm10 = vcmp.eq.s32.totalorder %v1838_v54, 1  ;;  %p2567_p12 = scmp.ne.s32.totalorder %s3283_s5, %s2566_s10  ;;  %s2570_s11 = sshll.u32 %s2643_s23, 4  ;;  %s2571_s11 = int_to_ptr.vmem [resolvable:$false] %s2570_s11 }
 0xbd6   : > { %v1518_v63 = vadd.f32 %v1514_v62, %v2895_v61  ;;  %p2573_p1 = scmp.lt.s32.totalorder %s3283_s5, %s2571_s11 }
 0xbd7   : > { %p2568_p13 = pnand %p2567_p12, %p2710_p10 }
 0xbd8   : > { %v1522_v1 = vsel %vm1521_vm11, %v1518_v63, %v1514_v62 }
 0xbd9   : > { %v1529_v6 = vsel %vm1525_vm12, %v1522_v1, %v1527_v0  ;;  %p2569_p0 = pneg %p2568_p13 }
 0xbda   : > { %v1533_v7 = vrot.slane %v1529_v6, %v2754_v17  ;;  %v1580_v32 = vrot.slane %v1529_v6, 7 }
 0xbdc   : > { %v3015_v8 = vadd.f32 %v1533_v7, %v2861_v34 }
 0xbde   : > { %1535 = vmax.xlane.f32.xlu1 %v3015_v8 }
 0xc6b   : > { %v3018_v9 = vpop.xlane.xlu1 %1535 }
 0xc6c   : > { %v1560_v10 = vsel %vm2877_vm7, %v3018_v9, -1e+09 }
 0xc6d   : > { %v1561_v11 = vrot.slane %v1560_v10, 4 }
 0xc6f   : > { %v1562_v14 = vmax.f32 %v1560_v10, %v1561_v11 }
 0xc71   : > { %v1563_v15 = vrot.slane %v1562_v14, 2 }
 0xc73   : > { %v1564_v19 = vmax.f32 %v1562_v14, %v1563_v15 }
 0xc75   : > { %v1565_v17 = vrot.slane %v1564_v19, 1 }
 0xc77   : > { %v1566_v21 = vmax.f32 %v1564_v19, %v1565_v17  ;;  %v1679_v17 = vstv %s1678_s6 }
 0xc78   : > { %vm1680_vm1 = vcmp.eq.s32.totalorder %v1679_v17, 1  ;;  %v1785_v17 = vstv %s1784_s12  ;;  %s2572_s12 = scalar_lea.vmem %s2571_s11, 32 }
 0xc79   : > { %v1567_v28 = vadd.f32 %v1566_v21, %v2888_v56  ;;  %v1683_v21 = vstv %s1682_s7  ;;  %vm1786_vm8 = vcmp.eq.s32.totalorder %v1785_v17, 1  ;;  %p2574_p2 = scmp.lt.s32.totalorder %s2572_s12, %s2566_s10 }
 0xc7a   : > { %vm1684_vm2 = vcmp.eq.s32.totalorder %v1683_v21, 1  ;;  %v1789_v21 = vstv %s1788_s13 }
 0xc7b   : > { %v1571_v29 = vadd.f32 %v1567_v28, %v2895_v61  ;;  %vm1790_vm9 = vcmp.eq.s32.totalorder %v1789_v21, 1  ;;  %p2575_p3 = por %p2574_p2, %p2573_p1 }
 0xc7d   : > { %v1575_v33 = vsel %vm1574_vm13, %v1571_v29, %v1567_v28  ;;  %p2576_p4 = pnand %p2575_p3, %p2569_p0 }
 0xc7e   : > { %v1582_v35 = vsel %vm1578_vm14, %v1575_v33, %v1580_v32 }
 0xc7f   : > { %v1586_v36 = vrot.slane %v1582_v35, %v2761_v20  ;;  %v1633_v58 = vrot.slane %v1582_v35, 7 }
 0xc81   : > { %v3028_v37 = vadd.f32 %v1586_v36, %v2861_v34 }
 0xc83   : > { %1588 = vmax.xlane.f32.xlu0 %v3028_v37 }
 0xd10   : > { %v3031_v38 = vpop.xlane.xlu0 %1588 }
 0xd11   : > { %v1613_v40 = vsel %vm2877_vm7, %v3031_v38, -1e+09 }
 0xd12   : > { %v1614_v41 = vrot.slane %v1613_v40, 4 }
 0xd14   : > { %v1615_v59 = vmax.f32 %v1613_v40, %v1614_v41 }
 0xd16   : > { %v1616_v48 = vrot.slane %v1615_v59, 2 }
 0xd18   : > { %v1617_v50 = vmax.f32 %v1615_v59, %v1616_v48 }
 0xd1a   : > { %v1618_v20 = vrot.slane %v1617_v50, 1 }
 0xd1c   : > { %v1619_v51 = vmax.f32 %v1617_v50, %v1618_v20 }
 0xd1e   : > { %v1620_v55 = vadd.f32 %v1619_v51, %v2888_v56  ;;  %v1732_v51 = vstv %s1731_s9  ;;  %s2181_s9 = scalar_lea.sflag [#allocation5], %s168_s15 }
 0xd1f   : > { %vm1733_vm3 = vcmp.eq.s32.totalorder %v1732_v51, 1 }
 0xd20   : > { %v1624_v57 = vadd.f32 %v1620_v55, %v2895_v61 }
 0xd22   : > { %v1628_v62 = vsel %vm1627_vm15, %v1624_v57, %v1620_v55  ;;  %vm1902_vm15 = vcmask 1047559  }
 0xd23   : > { %v1635_v63 = vsel %vm1631_vm0, %v1628_v62, %v1633_v58 }
 0xd24   : > { %v1639_v0 = vrot.slane %v1635_v63, %v1214_v39  ;;  %v1686_v28 = vrot.slane %v1635_v63, 7 }
 0xd26   : > { %v3042_v1 = vadd.f32 %v1639_v0, %v2861_v34 }
 0xd28   : > { %1641 = vmax.xlane.f32.xlu1 %v3042_v1 }
 0xdb5   : > { %v3045_v6 = vpop.xlane.xlu1 %1641 }
 0xdb6   : > { %v1666_v7 = vsel %vm2877_vm7, %v3045_v6, -1e+09 }
 0xdb7   : > { %v1667_v10 = vrot.slane %v1666_v7, 4 }
 0xdb9   : > { %v1668_v11 = vmax.f32 %v1666_v7, %v1667_v10 }
 0xdbb   : > { %v1669_v14 = vrot.slane %v1668_v11, 2 }
 0xdbd   : > { %v1670_v15 = vmax.f32 %v1668_v11, %v1669_v14 }
 0xdbf   : > { %v1671_v39 = vrot.slane %v1670_v15, 1 }
 0xdc1   : > { %v1672_v19 = vmax.f32 %v1670_v15, %v1671_v39 }
 0xdc3   : > { %v1673_v22 = vadd.f32 %v1672_v19, %v2888_v56 }
 0xdc5   : > { %v1677_v25 = vadd.f32 %v1673_v22, %v2895_v61 }
 0xdc7   : > { %v1681_v29 = vsel %vm1680_vm1, %v1677_v25, %v1673_v22 }
 0xdc8   : > { %v1688_v32 = vsel %vm1684_vm2, %v1681_v29, %v1686_v28 }
 0xdc9   : > { %v1692_v33 = vrot.slane %v1688_v32, %v1267_v60  ;;  %v1739_v57 = vrot.slane %v1688_v32, 7 }
 0xdcb   : > { %v3056_v35 = vadd.f32 %v1692_v33, %v2861_v34 }
 0xdcd   : > { %1694 = vmax.xlane.f32.xlu0 %v3056_v35 }
 0xe5a   : > { %v3059_v36 = vpop.xlane.xlu0 %1694 }
 0xe5b   : > { %v1719_v40 = vsel %vm2877_vm7, %v3059_v36, -1e+09 }
 0xe5c   : > { %v1720_v41 = vrot.slane %v1719_v40, 4 }
 0xe5e   : > { %v1721_v59 = vmax.f32 %v1719_v40, %v1720_v41 }
 0xe60   : > { %v1722_v48 = vrot.slane %v1721_v59, 2 }
 0xe62   : > { %v1723_v50 = vmax.f32 %v1721_v59, %v1722_v48 }
 0xe64   : > { %v1724_v60 = vrot.slane %v1723_v50, 1 }
 0xe66   : > { %v1725_v20 = vmax.f32 %v1723_v50, %v1724_v60 }
 0xe68   : > { %v1726_v30 = vadd.f32 %v1725_v20, %v2888_v56 }
 0xe6a   : > { %v1730_v55 = vadd.f32 %v1726_v30, %v2895_v61 }
 0xe6c   : > { %v1734_v58 = vsel %vm1733_vm3, %v1730_v55, %v1726_v30  ;;  %v1842_v30 = vstv %s1841_s17 }
 0xe6d   : > { %v1741_v62 = vsel %vm1737_vm4, %v1734_v58, %v1739_v57  ;;  %vm1843_vm11 = vcmp.eq.s32.totalorder %v1842_v30, 1 }
 0xe6e   : > { %v1745_v63 = vrot.slane %v1741_v62, %v1320_v18  ;;  %v1792_v28 = vrot.slane %v1741_v62, 7 }
 0xe70   : > { %v3070_v0 = vadd.f32 %v1745_v63, %v2861_v34 }
 0xe72   : > { %1747 = vmax.xlane.f32.xlu1 %v3070_v0 }
 0xeff   : > { %v3073_v7 = vpop.xlane.xlu1 %1747 }
 0xf00   : > { %v1772_v10 = vsel %vm2877_vm7, %v3073_v7, -1e+09 }
 0xf01   : > { %v1773_v11 = vrot.slane %v1772_v10, 4 }
 0xf03   : > { %v1774_v14 = vmax.f32 %v1772_v10, %v1773_v11 }
 0xf05   : > { %v1775_v15 = vrot.slane %v1774_v14, 2 }
 0xf07   : > { %v1776_v39 = vmax.f32 %v1774_v14, %v1775_v15 }
 0xf09   : > { %v1777_v18 = vrot.slane %v1776_v39, 1 }
 0xf0b   : > { %v1778_v19 = vmax.f32 %v1776_v39, %v1777_v18 }
 0xf0d   : > { %v1779_v22 = vadd.f32 %v1778_v19, %v2888_v56 }
 0xf0f   : > { %v1783_v25 = vadd.f32 %v1779_v22, %v2895_v61 }
 0xf11   : > { %v1787_v29 = vsel %vm1786_vm8, %v1783_v25, %v1779_v22  ;;  %v1891_v25 = vstv %s1890_s19  ;;  %vm1696_vm8 = vcmp.ge.f32.partialorder %v3056_v35, %v3059_v36 }
 0xf12   : > { %v1794_v32 = vsel %vm1790_vm9, %v1787_v29, %v1792_v28  ;;  %v1895_v28 = vstv %s1894_s24  ;;  %vm1892_vm13 = vcmp.eq.s32.totalorder %v1891_v25, 1 }
 0xf13   : > { %v1798_v33 = vrot.slane %v1794_v32, %v1373_v43  ;;  %v1845_v58 = vrot.slane %v1794_v32, 7  ;;  %vm1896_vm14 = vcmp.eq.s32.totalorder %v1895_v28, 1 }
 0xf15   : > { %v3084_v40 = vadd.f32 %v1798_v33, %v2861_v34 }
 0xf17   : > { %1800 = vmax.xlane.f32.xlu0 %v3084_v40 }
 0xfa4   : > { %v3087_v41 = vpop.xlane.xlu0 %1800 }
 0xfa5   : > { %v1825_v59 = vsel %vm2877_vm7, %v3087_v41, -1e+09  ;;  %vm1802_vm1 = vcmp.ge.f32.partialorder %v3084_v40, %v3087_v41 }
 0xfa6   : > { %v1826_v48 = vrot.slane %v1825_v59, 4  ;;  %v1803_v30 = vsel %vm1802_vm1, %v2798_v49, 128  ;;  %vm1590_vm1 = vcmp.ge.f32.partialorder %v3028_v37, %v3031_v38 }
 0xfa7   : > { %v1804_v41 = vand.u32 65535, %v1803_v30 }
 0xfa8   : > { %v1827_v50 = vmax.f32 %v1825_v59, %v1826_v48 }
 0xfaa   : > { %v1828_v60 = vrot.slane %v1827_v50, 2 }
 0xfac   : > { %v1829_v20 = vmax.f32 %v1827_v50, %v1828_v60 }
 0xfae   : > { %v1830_v43 = vrot.slane %v1829_v20, 1 }
 0xfb0   : > { %v1831_v51 = vmax.f32 %v1829_v20, %v1830_v43 }
 0xfb2   : > { %v1832_v55 = vadd.f32 %v1831_v51, %v2888_v56 }
 0xfb4   : > { %v1836_v57 = vadd.f32 %v1832_v55, %v2895_v61 }
 0xfb6   : > { %v1840_v62 = vsel %vm1839_vm10, %v1836_v57, %v1832_v55 }
 0xfb7   : > { %v1847_v63 = vsel %vm1843_vm11, %v1840_v62, %v1845_v58  ;;  %v1805_v62 = vshra.s32 %v1803_v30, 16  ;;  %vm1643_vm11 = vcmp.ge.f32.partialorder %v3042_v1, %v3045_v6 }
 0xfb8   : > { %v1851_v10 = vrot.slane %v1847_v63, %v1426_v31  ;;  %v1898_v33 = vrot.slane %v1847_v63, 7 }
 0xfb9   : > { %v1807_v63 = vcvt.s32.f32 %v1805_v62 }
 0xfba   : > { %v1852_v11 = vadd.f32 %v1851_v10, %v2861_v34 }
 0xfbc   : > { %1853 = vmax.xlane.f32.xlu1 %v1852_v11 }
0x1049   : > { %v1854_v14 = vpop.xlane.xlu1 %1853 }
0x104a   : > { %vm1855_vm12 = vcmp.ge.f32.partialorder %v1852_v11, %v1854_v14  ;;  %v1878_v15 = vsel %vm2877_vm7, %v1854_v14, -1e+09 }
0x104b   : > { %v1856_v39 = vsel %vm1855_vm12, %v2798_v49, 128  ;;  %v1879_v18 = vrot.slane %v1878_v15, 4 }
0x104c   : > { %v1858_v19 = vshra.s32 %v1856_v39, 16  ;;  %v1857_v20 = vand.u32 65535, %v1856_v39 }
0x104d   : > { %v1880_v17 = vmax.f32 %v1878_v15, %v1879_v18  ;;  %v1806_v18 = vcvt.s32.f32 %v1804_v41 }
0x104e   : > { %v1860_v21 = vcvt.s32.f32 %v1858_v19  ;;  %v1859_v51 = vcvt.s32.f32 %v1857_v20 }
0x104f   : > { %v1881_v22 = vrot.slane %v1880_v17, 2 }
0x1050   : > { %1861 = vmin.xlane.f32.xlu1 %v1860_v21 }
0x1051   : > { %v1882_v16 = vmax.f32 %v1880_v17, %v1881_v22 }
0x1053   : > { %v1883_v34 = vrot.slane %v1882_v16, 1 }
0x1055   : > { %v1884_v31 = vmax.f32 %v1882_v16, %v1883_v34 }
0x1057   : > { %v1885_v29 = vadd.f32 %v1884_v31, %v2888_v56 }
0x1059   : > { %v1889_v32 = vadd.f32 %v1885_v29, %v2895_v61 }
0x105b   : > { %v1893_v59 = vsel %vm1892_vm13, %v1889_v32, %v1885_v29  ;;  %vm1923_vm13 = vcmp.eq.s32.totalorder %v2798_v49, 15 }
0x105c   : > { %v1900_v48 = vsel %vm1896_vm14, %v1893_v59, %v1898_v33  ;;  %vm1940_vm14 = vcmp.eq.s32.totalorder %v2798_v49, 14 }
0x105d   : > { %v1901_v50 = vsel %vm1080_vm5, %v1900_v48, -1e+09  ;;  %vm1749_vm5 = vcmp.ge.f32.partialorder %v3070_v0, %v3073_v7 }
0x105e   : > { %v1903_v60 = vsel %vm1902_vm15, %v1901_v50, -inf  ;;  %v1750_v14 = vsel %vm1749_vm5, %v2798_v49, 128  ;;  %vm1957_vm5 = vcmp.eq.s32.totalorder %v2798_v49, 13 }
0x105f   : > { %1904 = vmax.xlane.f32.xlu0 %v1903_v60  ;;  %v1752_v19 = vshra.s32 %v1750_v14, 16 }
0x10dd   : > { %v1862_v43 = vpop.xlane.xlu1 %1861 }
0x10de   : > { %vm1863_vm0 = vcmp.eq.f32.partialorder %v1860_v21, %v1862_v43  ;;  %v1754_v21 = vcvt.s32.f32 %v1752_v19  ;;  %v1868_v16 = vcvt.f32.s32 %v1862_v43 }
0x10df   : > { %v1864_v54 = vsel %vm1863_vm0, %v1859_v51, inf  ;;  %v1751_v51 = vand.u32 65535, %v1750_v14 }
0x10e0   : > { %1865 = vmin.xlane.f32.xlu1 %v1864_v54  ;;  %v1869_v0 = vshll.u32 %v1868_v16, 16 }
0x10ec   : > { %v1905_v56 = vpop.xlane.xlu0 %1904 }
0x10ed   : > { %vm1906_vm2 = vcmp.ge.f32.partialorder %v1901_v50, %v1905_v56  ;;  %v1697_v56 = vsel %vm1696_vm8, %v2798_v49, 128 }
0x10ee   : > { %v1907_v61 = vsel %vm1906_vm2, %v2798_v49, 128  ;;  %v1699_v62 = vshra.s32 %v1697_v56, 16  ;;  %v1698_v16 = vand.u32 65535, %v1697_v56 }
0x10ef   : > { %v1908_v55 = vsel %vm1902_vm15, %v1907_v61, 2147483647 }
0x10f0   : > { %v1910_v57 = vshra.s32 %v1908_v55, 16  ;;  %v1909_v10 = vand.u32 65535, %v1908_v55  ;;  %v1701_v35 = vcvt.s32.f32 %v1699_v62 }
0x10f2   : > { %v1912_v58 = vcvt.s32.f32 %v1910_v57  ;;  %v1911_v40 = vcvt.s32.f32 %v1909_v10  ;;  %v1753_v57 = vcvt.s32.f32 %v1751_v51 }
0x10f4   : > { %1913 = vmin.xlane.f32.xlu0 %v1912_v58 }
0x10f8   : > { %1808 = vmin.xlane.f32.xlu0 %v1807_v63 }
0x116d   : > { %v1866_v22 = vpop.xlane.xlu1 %1865 }
0x116e   : > { %v1867_v34 = vcvt.f32.s32 %v1866_v22 }
0x1170   : > { %v1870_v7 = vadd.s32 %v1869_v0, %v1867_v34 }
0x1172   : > { %v1871_v31 = vsel %vm2877_vm7, %v1870_v7, 0  ;;  %v1644_v7 = vsel %vm1643_vm11, %v2798_v49, 128  ;;  %vm1484_vm11 = vcmp.ge.f32.partialorder %v3002_v42, %v3005_v47 }
0x1173   : > { %v1872_v25 = vrot.slane %v1871_v31, 4 }
0x1175   : > { %v1873_v28 = vadd.s32 %v1872_v25, %v1871_v31  ;;  %v1700_v25 = vcvt.s32.f32 %v1698_v16 }
0x1177   : > { %v1874_v29 = vrot.slane %v1873_v28, 2 }
0x1179   : > { %v1875_v32 = vadd.s32 %v1874_v29, %v1873_v28  ;;  %v1646_v29 = vshra.s32 %v1644_v7, 16 }
0x117b   : > { %v1876_v48 = vrot.slane %v1875_v32, 1 }
0x117d   : > { %v1877_v54 = vadd.s32 %v1876_v48, %v1875_v32 }
0x1181   : > { %v1914_v11 = vpop.xlane.xlu0 %1913 }
0x1182   : > { %vm1915_vm3 = vcmp.eq.f32.partialorder %v1912_v58, %v1914_v11  ;;  %v1920_v33 = vcvt.f32.s32 %v1914_v11 }
0x1183   : > { %v1916_v15 = vsel %vm1915_vm3, %v1911_v40, inf }
0x1184   : > { %1917 = vmin.xlane.f32.xlu1 %v1916_v15  ;;  %v1921_v50 = vshll.u32 %v1920_v33, 16 }
0x1185   : > { %v1809_v39 = vpop.xlane.xlu0 %1808 }
0x1186   : > { %vm1810_vm4 = vcmp.eq.f32.partialorder %v1807_v63, %v1809_v39  ;;  %v1815_v40 = vcvt.f32.s32 %v1809_v39 }
0x1187   : > { %v1811_v17 = vsel %vm1810_vm4, %v1806_v18, inf  ;;  %vm1537_vm4 = vcmp.ge.f32.partialorder %v3015_v8, %v3018_v9 }
0x1188   : > { %1812 = vmin.xlane.f32.xlu0 %v1811_v17  ;;  %v1816_v14 = vshll.u32 %v1815_v40, 16  ;;  %v1591_v40 = vsel %vm1590_vm1, %v2798_v49, 128 }
0x118c   : > { %1755 = vmin.xlane.f32.xlu0 %v1754_v21 }
0x1211   : > { %v1918_v59 = vpop.xlane.xlu1 %1917 }
0x1212   : > { %v1919_v60 = vcvt.f32.s32 %v1918_v59 }
0x1214   : > { %v1922_v20 = vadd.s32 %v1921_v50, %v1919_v60  ;;  %v1648_v50 = vcvt.s32.f32 %v1646_v29 }
0x1215   : > { %v1813_v43 = vpop.xlane.xlu0 %1812 }
0x1216   : > { %vm1925_vm9 = vcmp.eq.s32.totalorder %v2798_v49, %v1922_v20  ;;  %v1814_v41 = vcvt.f32.s32 %v1813_v43  ;;  %v1924_v48 = vsel %vm1923_vm13, %v1922_v20, 0  ;;  %vm1991_vm13 = vcmp.eq.s32.totalorder %v2798_v49, 11 }
0x1217   : > { %v1926_v61 = vsel %vm1925_vm9, %v1877_v54, 0  ;;  %vm1974_vm9 = vcmp.eq.s32.totalorder %v2798_v49, 12 }
0x1218   : > { %v1927_v30 = vsel %vm1902_vm15, %v1926_v61, 0  ;;  %v1817_v15 = vadd.s32 %v1816_v14, %v1814_v41 }
0x1219   : > { %v1756_v55 = vpop.xlane.xlu0 %1755  ;;  %v1929_v58 = vshrl.u32 %v1927_v30, 16  ;;  %v1928_v11 = vand.u32 65535, %v1927_v30 }
0x121a   : > { %vm1757_vm10 = vcmp.eq.f32.partialorder %v1754_v21, %v1756_v55  ;;  %v1818_v18 = vsel %vm2877_vm7, %v1817_v15, 0 }
0x121b   : > { %v1758_v63 = vsel %vm1757_vm10, %v1753_v57, inf  ;;  %v1931_v10 = vcvt.s32.f32 %v1929_v58  ;;  %v1930_v36 = vcvt.s32.f32 %v1928_v11  ;;  %v1819_v19 = vrot.slane %v1818_v18, 4 }
0x121c   : > { %1759 = vmin.xlane.f32.xlu0 %v1758_v63  ;;  %v1762_v58 = vcvt.f32.s32 %v1756_v55  ;;  %v1593_v55 = vshra.s32 %v1591_v40, 16 }
0x121d   : > { %1934 = vadd.xlane.f32.xlu1 %v1931_v10  ;;  %v1820_v17 = vadd.s32 %v1819_v19, %v1818_v18 }
0x121e   : > { %v1763_v63 = vshll.u32 %v1762_v58, 16 }
0x121f   : > { %v1821_v21 = vrot.slane %v1820_v17, 2 }
0x1220   : > { %1702 = vmin.xlane.f32.xlu0 %v1701_v35 }
0x1221   : > { %1932 = vadd.xlane.f32.xlu1 %v1930_v36  ;;  %v1822_v34 = vadd.s32 %v1821_v21, %v1820_v17  ;;  %v1645_v36 = vand.u32 65535, %v1644_v7  ;;  %v1595_v17 = vcvt.s32.f32 %v1593_v55 }
0x1223   : > { %v1823_v32 = vrot.slane %v1822_v34, 1  ;;  %v1647_v15 = vcvt.s32.f32 %v1645_v36 }
0x1225   : > { %v1824_v60 = vadd.s32 %v1823_v32, %v1822_v34 }
0x12a9   : > { %v1760_v22 = vpop.xlane.xlu0 %1759 }
0x12aa   : > { %v1935_v0 = vpop.xlane.xlu1 %1934  ;;  %v1761_v62 = vcvt.f32.s32 %v1760_v22 }
0x12ab   : > { %v1937_v31 = vcvt.f32.s32 %v1935_v0 }
0x12ac   : > { %v1764_v10 = vadd.s32 %v1763_v63, %v1761_v62 }
0x12ad   : > { %v3127_v39 = vpop.xlane.xlu0 %1702  ;;  %v1938_v33 = vshll.u32 %v1937_v31, 16 }
0x12ae   : > { %v1933_v28 = vpop.xlane.xlu1 %1932  ;;  %vm1704_vm12 = vcmp.eq.f32.partialorder %v1701_v35, %v3127_v39  ;;  %v1765_v20 = vsel %vm2877_vm7, %v1764_v10, 0 }
0x12af   : > { %v1936_v59 = vcvt.f32.s32 %v1933_v28  ;;  %v1705_v1 = vsel %vm1704_vm12, %v1700_v25, inf  ;;  %v1766_v11 = vrot.slane %v1765_v20, 4 }
0x12b0   : > { %1706 = vmin.xlane.f32.xlu0 %v1705_v1 }
0x12b1   : > { %v1939_v6 = vadd.s32 %v1938_v33, %v1936_v59  ;;  %v1767_v41 = vadd.s32 %v1766_v11, %v1765_v20 }
0x12b3   : > { %v1941_v43 = vsel %vm1940_vm14, %v1939_v6, %v1924_v48  ;;  %vm1942_vm0 = vcmp.eq.s32.totalorder %v2798_v49, %v1939_v6  ;;  %v1768_v18 = vrot.slane %v1767_v41, 2  ;;  %v1709_v6 = vcvt.f32.s32 %v3127_v39 }
0x12b4   : > { %1649 = vmin.xlane.f32.xlu0 %v1648_v50  ;;  %v1943_v51 = vsel %vm1942_vm0, %v1824_v60, 0  ;;  %vm1431_vm0 = vcmp.ge.f32.partialorder %v2989_v12, %v2992_v13 }
0x12b5   : > { %v1944_v54 = vsel %vm1902_vm15, %v1943_v51, 0  ;;  %v1769_v21 = vadd.s32 %v1768_v18, %v1767_v41  ;;  %v1592_v51 = vand.u32 65535, %v1591_v40 }
0x12b6   : > { %v1946_v56 = vshrl.u32 %v1944_v54, 16  ;;  %v1945_v30 = vand.u32 65535, %v1944_v54  ;;  %v1538_v54 = vsel %vm1537_vm4, %v2798_v49, 128 }
0x12b7   : > { %v1770_v38 = vrot.slane %v1769_v21, 1 }
0x12b8   : > { %v1948_v61 = vcvt.s32.f32 %v1946_v56  ;;  %v1947_v57 = vcvt.s32.f32 %v1945_v30  ;;  %v1594_v30 = vcvt.s32.f32 %v1592_v51 }
0x12b9   : > { %v1771_v31 = vadd.s32 %v1770_v38, %v1769_v21  ;;  %v1539_v38 = vand.u32 65535, %v1538_v54 }
0x12ba   : > { %1951 = vadd.xlane.f32.xlu1 %v1948_v61 }
0x12be   : > { %1949 = vadd.xlane.f32.xlu1 %v1947_v57  ;;  %v1540_v57 = vshra.s32 %v1538_v54, 16 }
0x12c0   : > { %v1542_v62 = vcvt.s32.f32 %v1540_v57 }
0x133d   : > { %v1707_v35 = vpop.xlane.xlu0 %1706 }
0x133e   : > { %v1708_v48 = vcvt.f32.s32 %v1707_v35 }
0x1341   : > { %v3139_v14 = vpop.xlane.xlu0 %1649 }
0x1342   : > { %vm1651_vm2 = vcmp.eq.f32.partialorder %v1648_v50, %v3139_v14  ;;  %v1710_v50 = vshll.u32 %v1709_v6, 16 }
0x1343   : > { %v1652_v19 = vsel %vm1651_vm2, %v1647_v15, inf  ;;  %vm2008_vm2 = vcmp.eq.s32.totalorder %v2798_v49, 10 }
0x1344   : > { %1653 = vmin.xlane.f32.xlu0 %v1652_v19  ;;  %v1711_v60 = vadd.s32 %v1710_v50, %v1708_v48 }
0x1346   : > { %v1712_v56 = vsel %vm2877_vm7, %v1711_v60, 0 }
0x1347   : > { %v1952_v22 = vpop.xlane.xlu1 %1951  ;;  %v1713_v58 = vrot.slane %v1712_v56, 4 }
0x1348   : > { %v1954_v16 = vcvt.f32.s32 %v1952_v22  ;;  %1596 = vmin.xlane.f32.xlu0 %v1595_v17 }
0x1349   : > { %v1714_v63 = vadd.s32 %v1713_v58, %v1712_v56 }
0x134a   : > { %v1955_v34 = vshll.u32 %v1954_v16, 16 }
0x134b   : > { %v1950_v37 = vpop.xlane.xlu1 %1949  ;;  %v1715_v8 = vrot.slane %v1714_v63, 2 }
0x134c   : > { %v1953_v0 = vcvt.f32.s32 %v1950_v37 }
0x134d   : > { %v1716_v9 = vadd.s32 %v1715_v8, %v1714_v63 }
0x134e   : > { %v1956_v7 = vadd.s32 %v1955_v34, %v1953_v0  ;;  %v1485_v34 = vsel %vm1484_vm11, %v2798_v49, 128  ;;  %v1656_v0 = vcvt.f32.s32 %v3139_v14 }
0x134f   : > { %v1717_v35 = vrot.slane %v1716_v9, 1 }
0x1350   : > { %v1958_v25 = vsel %vm1957_vm5, %v1956_v7, %v1941_v43  ;;  %vm1959_vm3 = vcmp.eq.s32.totalorder %v2798_v49, %v1956_v7 }
0x1351   : > { %v1960_v28 = vsel %vm1959_vm3, %v1771_v31, 0  ;;  %v1718_v15 = vadd.s32 %v1717_v35, %v1716_v9  ;;  %v1541_v31 = vcvt.s32.f32 %v1539_v38  ;;  %vm1378_vm3 = vcmp.ge.f32.partialorder %v2974_v52, %v2977_v53 }
0x1352   : > { %v1961_v29 = vsel %vm1902_vm15, %v1960_v28, 0  ;;  %v1487_v28 = vshra.s32 %v1485_v34, 16 }
0x1353   : > { %v1963_v32 = vshrl.u32 %v1961_v29, 16  ;;  %v1962_v59 = vand.u32 65535, %v1961_v29 }
0x1355   : > { %v1965_v33 = vcvt.s32.f32 %v1963_v32  ;;  %v1964_v1 = vcvt.s32.f32 %v1962_v59  ;;  %v1657_v32 = vshll.u32 %v1656_v0, 16  ;;  %v1489_v59 = vcvt.s32.f32 %v1487_v28 }
0x1357   : > { %1968 = vadd.xlane.f32.xlu1 %v1965_v33 }
0x135b   : > { %1966 = vadd.xlane.f32.xlu1 %v1964_v1 }
0x13d1   : > { %v1654_v43 = vpop.xlane.xlu0 %1653 }
0x13d5   : > { %v3151_v61 = vpop.xlane.xlu0 %1596 }
0x13d6   : > { %vm1598_vm8 = vcmp.eq.f32.partialorder %v1595_v17, %v3151_v61 }
0x13d7   : > { %v1599_v39 = vsel %vm1598_vm8, %v1594_v30, inf  ;;  %vm2025_vm8 = vcmp.eq.s32.totalorder %v2798_v49, 9 }
0x13d8   : > { %1600 = vmin.xlane.f32.xlu0 %v1599_v39 }
0x13dc   : > { %1543 = vmin.xlane.f32.xlu0 %v1542_v62 }
0x13e4   : > { %v1969_v10 = vpop.xlane.xlu1 %1968 }
0x13e5   : > { %v1971_v20 = vcvt.f32.s32 %v1969_v10 }
0x13e7   : > { %v1972_v36 = vshll.u32 %v1971_v20, 16  ;;  %v1486_v20 = vand.u32 65535, %v1485_v34 }
0x13e8   : > { %v1967_v11 = vpop.xlane.xlu1 %1966 }
0x13e9   : > { %v1970_v40 = vcvt.f32.s32 %v1967_v11  ;;  %v1432_v11 = vsel %vm1431_vm0, %v2798_v49, 128 }
0x13eb   : > { %v1973_v41 = vadd.s32 %v1972_v36, %v1970_v40  ;;  %v1488_v36 = vcvt.s32.f32 %v1486_v20  ;;  %v1434_v40 = vshra.s32 %v1432_v11, 16 }
0x13ed   : > { %v1975_v55 = vsel %vm1974_vm9, %v1973_v41, %v1958_v25  ;;  %vm1976_vm10 = vcmp.eq.s32.totalorder %v2798_v49, %v1973_v41  ;;  %v1655_v25 = vcvt.f32.s32 %v1654_v43 }
0x13ee   : > { %v1977_v18 = vsel %vm1976_vm10, %v1718_v15, 0  ;;  %v1436_v15 = vcvt.s32.f32 %v1434_v40  ;;  %vm1325_vm10 = vcmp.ge.f32.partialorder %v2959_v26, %v2962_v27 }
0x13ef   : > { %v1978_v19 = vsel %vm1902_vm15, %v1977_v18, 0  ;;  %v1658_v33 = vadd.s32 %v1657_v32, %v1655_v25 }
0x13f0   : > { %v1980_v17 = vshrl.u32 %v1978_v19, 16  ;;  %v1979_v22 = vand.u32 65535, %v1978_v19 }
0x13f1   : > { %v1659_v42 = vsel %vm2877_vm7, %v1658_v33, 0 }
0x13f2   : > { %v1982_v21 = vcvt.s32.f32 %v1980_v17  ;;  %v1981_v16 = vcvt.s32.f32 %v1979_v22  ;;  %v1660_v47 = vrot.slane %v1659_v42, 4 }
0x13f4   : > { %1985 = vadd.xlane.f32.xlu1 %v1982_v21  ;;  %v1661_v1 = vadd.s32 %v1660_v47, %v1659_v42 }
0x13f6   : > { %v1662_v6 = vrot.slane %v1661_v1, 2 }
0x13f8   : > { %1983 = vadd.xlane.f32.xlu1 %v1981_v16  ;;  %v1663_v14 = vadd.s32 %v1662_v6, %v1661_v1 }
0x13fa   : > { %v1664_v43 = vrot.slane %v1663_v14, 1 }
0x13fc   : > { %v1665_v30 = vadd.s32 %v1664_v43, %v1663_v14  ;;  %v1433_v14 = vand.u32 65535, %v1432_v11 }
0x1465   : > { %v1601_v37 = vpop.xlane.xlu0 %1600 }
0x1466   : > { %v1602_v18 = vcvt.f32.s32 %v1601_v37 }
0x1469   : > { %v3161_v7 = vpop.xlane.xlu0 %1543 }
0x146a   : > { %vm1545_vm12 = vcmp.eq.f32.partialorder %v1542_v62, %v3161_v7 }
0x146b   : > { %v1546_v29 = vsel %vm1545_vm12, %v1541_v31, inf  ;;  %vm2042_vm12 = vcmp.eq.s32.totalorder %v2798_v49, 8 }
0x146c   : > { %1547 = vmin.xlane.f32.xlu0 %v1546_v29 }
0x1470   : > { %1490 = vmin.xlane.f32.xlu0 %v1489_v59 }
0x1481   : > { %v1986_v48 = vpop.xlane.xlu1 %1985 }
0x1482   : > { %v1988_v50 = vcvt.f32.s32 %v1986_v48  ;;  %v1379_v48 = vsel %vm1378_vm3, %v2798_v49, 128 }
0x1483   : > { %v1381_v43 = vshra.s32 %v1379_v48, 16 }
0x1484   : > { %v1989_v51 = vshll.u32 %v1988_v50, 16 }
0x1485   : > { %v1984_v60 = vpop.xlane.xlu1 %1983 }
0x1486   : > { %v1987_v54 = vcvt.f32.s32 %v1984_v60  ;;  %v1435_v60 = vcvt.s32.f32 %v1433_v14 }
0x1488   : > { %v1990_v56 = vadd.s32 %v1989_v51, %v1987_v54  ;;  %v1383_v54 = vcvt.s32.f32 %v1381_v43 }
0x148a   : > { %v1992_v57 = vsel %vm1991_vm13, %v1990_v56, %v1975_v55  ;;  %vm1993_vm14 = vcmp.eq.s32.totalorder %v2798_v49, %v1990_v56  ;;  %v1603_v55 = vcvt.f32.s32 %v3151_v61  ;;  %v1550_v56 = vcvt.f32.s32 %v3161_v7 }
0x148b   : > { %v1994_v39 = vsel %vm1993_vm14, %v1665_v30, 0  ;;  %vm1272_vm14 = vcmp.ge.f32.partialorder %v2944_v2, %v2947_v3 }
0x148c   : > { %v1995_v58 = vsel %vm1902_vm15, %v1994_v39, 0  ;;  %v1604_v19 = vshll.u32 %v1603_v55, 16 }
0x148d   : > { %v1997_v62 = vshrl.u32 %v1995_v58, 16  ;;  %v1996_v8 = vand.u32 65535, %v1995_v58 }
0x148e   : > { %v1605_v17 = vadd.s32 %v1604_v19, %v1602_v18 }
0x148f   : > { %v1999_v63 = vcvt.s32.f32 %v1997_v62  ;;  %v1998_v9 = vcvt.s32.f32 %v1996_v8 }
0x1490   : > { %v1606_v12 = vsel %vm2877_vm7, %v1605_v17, 0 }
0x1491   : > { %2002 = vadd.xlane.f32.xlu1 %v1999_v63  ;;  %v1607_v13 = vrot.slane %v1606_v12, 4 }
0x1493   : > { %v1608_v21 = vadd.s32 %v1607_v13, %v1606_v12 }
0x1495   : > { %2000 = vadd.xlane.f32.xlu1 %v1998_v9  ;;  %v1609_v22 = vrot.slane %v1608_v21, 2 }
0x1497   : > { %v1610_v16 = vadd.s32 %v1609_v22, %v1608_v21  ;;  %v1380_v21 = vand.u32 65535, %v1379_v48  ;;  %v1326_v22 = vsel %vm1325_vm10, %v2798_v49, 128 }
0x1499   : > { %v1611_v31 = vrot.slane %v1610_v16, 1 }
0x149b   : > { %v1612_v61 = vadd.s32 %v1611_v31, %v1610_v16 }
0x14f9   : > { %v1548_v10 = vpop.xlane.xlu0 %1547 }
0x14fa   : > { %v1549_v30 = vcvt.f32.s32 %v1548_v10 }
0x14fd   : > { %v3172_v35 = vpop.xlane.xlu0 %1490 }
0x14fe   : > { %vm1492_vm1 = vcmp.eq.f32.partialorder %v1489_v59, %v3172_v35 }
0x14ff   : > { %v1493_v41 = vsel %vm1492_vm1, %v1488_v36, inf  ;;  %vm2059_vm1 = vcmp.eq.s32.totalorder %v2798_v49, 7 }
0x1500   : > { %1494 = vmin.xlane.f32.xlu0 %v1493_v41 }
0x1504   : > { %1437 = vmin.xlane.f32.xlu0 %v1436_v15 }
0x151e   : > { %v2003_v38 = vpop.xlane.xlu1 %2002 }
0x151f   : > { %v2005_v34 = vcvt.f32.s32 %v2003_v38  ;;  %v1382_v38 = vcvt.s32.f32 %v1380_v21 }
0x1521   : > { %v2006_v25 = vshll.u32 %v2005_v34, 16  ;;  %v1328_v34 = vshra.s32 %v1326_v22, 16 }
0x1522   : > { %v2001_v0 = vpop.xlane.xlu1 %2000 }
0x1523   : > { %v2004_v28 = vcvt.f32.s32 %v2001_v0  ;;  %v1330_v31 = vcvt.s32.f32 %v1328_v34 }
0x1525   : > { %v2007_v29 = vadd.s32 %v2006_v25, %v2004_v28  ;;  %v1497_v25 = vcvt.f32.s32 %v3172_v35 }
0x1527   : > { %v2009_v37 = vsel %vm2008_vm2, %v2007_v29, %v1992_v57  ;;  %vm2010_vm5 = vcmp.eq.s32.totalorder %v2798_v49, %v2007_v29  ;;  %v1551_v57 = vshll.u32 %v1550_v56, 16  ;;  %v1498_v29 = vshll.u32 %v1497_v25, 16 }
0x1528   : > { %v2011_v32 = vsel %vm2010_vm5, %v1612_v61, 0  ;;  %vm1219_vm5 = vcmp.ge.f32.partialorder %v2929_v44, %v2932_v45 }
0x1529   : > { %v2012_v33 = vsel %vm1902_vm15, %v2011_v32, 0  ;;  %v1552_v39 = vadd.s32 %v1551_v57, %v1549_v30 }
0x152a   : > { %v2014_v59 = vshrl.u32 %v2012_v33, 16  ;;  %v2013_v47 = vand.u32 65535, %v2012_v33 }
0x152b   : > { %v1553_v52 = vsel %vm2877_vm7, %v1552_v39, 0 }
0x152c   : > { %v2016_v42 = vcvt.s32.f32 %v2014_v59  ;;  %v2015_v1 = vcvt.s32.f32 %v2013_v47  ;;  %v1554_v53 = vrot.slane %v1553_v52, 4 }
0x152e   : > { %2019 = vadd.xlane.f32.xlu1 %v2016_v42  ;;  %v1555_v58 = vadd.s32 %v1554_v53, %v1553_v52  ;;  %v1327_v52 = vand.u32 65535, %v1326_v22  ;;  %v1273_v53 = vsel %vm1272_vm14, %v2798_v49, 128 }
0x1530   : > { %v1556_v62 = vrot.slane %v1555_v58, 2 }
0x1532   : > { %2017 = vadd.xlane.f32.xlu1 %v2015_v1  ;;  %v1557_v63 = vadd.s32 %v1556_v62, %v1555_v58  ;;  %v1329_v62 = vcvt.s32.f32 %v1327_v52 }
0x1534   : > { %v1558_v11 = vrot.slane %v1557_v63, 1 }
0x1536   : > { %v1559_v7 = vadd.s32 %v1558_v11, %v1557_v63  ;;  %v1275_v63 = vshra.s32 %v1273_v53, 16 }
0x158d   : > { %v1495_v6 = vpop.xlane.xlu0 %1494 }
0x158e   : > { %v1496_v28 = vcvt.f32.s32 %v1495_v6 }
0x1590   : > { %v1499_v61 = vadd.s32 %v1498_v29, %v1496_v28  ;;  %v1274_v29 = vand.u32 65535, %v1273_v53 }
0x1591   : > { %v3184_v50 = vpop.xlane.xlu0 %1437 }
0x1592   : > { %vm1439_vm4 = vcmp.eq.f32.partialorder %v1436_v15, %v3184_v50  ;;  %v1500_v26 = vsel %vm2877_vm7, %v1499_v61, 0  ;;  %v1220_v61 = vsel %vm1219_vm5, %v2798_v49, 128  ;;  %vm2143_vm5 = vcmp.eq.s32.totalorder %v2798_v49, 2 }
0x1593   : > { %v1440_v51 = vsel %vm1439_vm4, %v1435_v60, inf  ;;  %v1501_v27 = vrot.slane %v1500_v26, 4  ;;  %vm2076_vm4 = vcmp.eq.s32.totalorder %v2798_v49, 6 }
0x1594   : > { %1441 = vmin.xlane.f32.xlu0 %v1440_v51 }
0x1598   : > { %1384 = vmin.xlane.f32.xlu0 %v1383_v54 }
0x15bb   : > { %v2020_v8 = vpop.xlane.xlu1 %2019 }
0x15bc   : > { %v2022_v9 = vcvt.f32.s32 %v2020_v8 }
0x15be   : > { %v2023_v36 = vshll.u32 %v2022_v9, 16  ;;  %v1277_v9 = vcvt.s32.f32 %v1275_v63 }
0x15bf   : > { %v2018_v20 = vpop.xlane.xlu1 %2017 }
0x15c0   : > { %v2021_v40 = vcvt.f32.s32 %v2018_v20  ;;  %v1444_v20 = vcvt.f32.s32 %v3184_v50 }
0x15c2   : > { %v2024_v41 = vadd.s32 %v2023_v36, %v2021_v40  ;;  %v1445_v36 = vshll.u32 %v1444_v20, 16  ;;  %v1221_v20 = vand.u32 65535, %v1220_v61 }
0x15c4   : > { %v2026_v10 = vsel %vm2025_vm8, %v2024_v41, %v2009_v37  ;;  %vm2027_vm9 = vcmp.eq.s32.totalorder %v2798_v49, %v2024_v41  ;;  %v1502_v37 = vadd.s32 %v1501_v27, %v1500_v26  ;;  %v1276_v27 = vcvt.s32.f32 %v1274_v29 }
0x15c5   : > { %v2028_v15 = vsel %vm2027_vm9, %v1559_v7, 0  ;;  %vm1166_vm9 = vcmp.ge.f32.partialorder %v2914_v23, %v2917_v24 }
0x15c6   : > { %v2029_v55 = vsel %vm1902_vm15, %v2028_v15, 0  ;;  %v1503_v32 = vrot.slane %v1502_v37, 2 }
0x15c7   : > { %v2031_v18 = vshrl.u32 %v2029_v55, 16  ;;  %v2030_v17 = vand.u32 65535, %v2029_v55 }
0x15c8   : > { %v1504_v33 = vadd.s32 %v1503_v32, %v1502_v37  ;;  %v1222_v37 = vshra.s32 %v1220_v61, 16 }
0x15c9   : > { %v2033_v19 = vcvt.s32.f32 %v2031_v18  ;;  %v2032_v12 = vcvt.s32.f32 %v2030_v17 }
0x15ca   : > { %v1505_v1 = vrot.slane %v1504_v33, 1 }
0x15cb   : > { %2036 = vadd.xlane.f32.xlu1 %v2033_v19 }
0x15cc   : > { %v1506_v35 = vadd.s32 %v1505_v1, %v1504_v33  ;;  %v1224_v33 = vcvt.s32.f32 %v1222_v37 }
0x15cf   : > { %2034 = vadd.xlane.f32.xlu1 %v2032_v12 }
0x1621   : > { %v1442_v13 = vpop.xlane.xlu0 %1441 }
0x1622   : > { %v1443_v11 = vcvt.f32.s32 %v1442_v13 }
0x1624   : > { %v1446_v40 = vadd.s32 %v1445_v36, %v1443_v11  ;;  %v1167_v11 = vsel %vm1166_vm9, %v2798_v49, 128 }
0x1625   : > { %v3196_v16 = vpop.xlane.xlu0 %1384 }
0x1626   : > { %vm1386_vm11 = vcmp.eq.f32.partialorder %v1383_v54, %v3196_v16  ;;  %v1447_v2 = vsel %vm2877_vm7, %v1446_v40, 0  ;;  %v1223_v40 = vcvt.s32.f32 %v1221_v20 }
0x1627   : > { %v1387_v0 = vsel %vm1386_vm11, %v1382_v38, inf  ;;  %v1448_v3 = vrot.slane %v1447_v2, 4 }
0x1628   : > { %1388 = vmin.xlane.f32.xlu0 %v1387_v0 }
0x1629   : > { %v1449_v41 = vadd.s32 %v1448_v3, %v1447_v2  ;;  %v1169_v2 = vshra.s32 %v1167_v11, 16 }
0x162b   : > { %v1450_v7 = vrot.slane %v1449_v41, 2 }
0x162c   : > { %1331 = vmin.xlane.f32.xlu0 %v1330_v31 }
0x1658   : > { %v2037_v59 = vpop.xlane.xlu1 %2036 }
0x1659   : > { %v2039_v42 = vcvt.f32.s32 %v2037_v59  ;;  %v1391_v59 = vcvt.f32.s32 %v3196_v16 }
0x165b   : > { %v2040_v14 = vshll.u32 %v2039_v42, 16 }
0x165c   : > { %v2035_v47 = vpop.xlane.xlu1 %2034 }
0x165d   : > { %v2038_v48 = vcvt.f32.s32 %v2035_v47  ;;  %v1392_v47 = vshll.u32 %v1391_v59, 16 }
0x165f   : > { %v2041_v60 = vadd.s32 %v2040_v14, %v2038_v48 }
0x1661   : > { %v2043_v6 = vsel %vm2042_vm12, %v2041_v60, %v2026_v10  ;;  %vm2044_vm13 = vcmp.eq.s32.totalorder %v2798_v49, %v2041_v60  ;;  %v1451_v10 = vadd.s32 %v1450_v7, %v1449_v41  ;;  %v1171_v41 = vcvt.s32.f32 %v1169_v2 }
0x1662   : > { %v2045_v43 = vsel %vm2044_vm13, %v1506_v35, 0  ;;  %vm1113_vm12 = vcmp.ge.f32.partialorder %v2901_v4, %v2904_v5  ;;  %vm2109_vm13 = vcmp.eq.s32.totalorder %v2798_v49, 4 }
0x1663   : > { %v2046_v51 = vsel %vm1902_vm15, %v2045_v43, 0  ;;  %v1452_v19 = vrot.slane %v1451_v10, 1 }
0x1664   : > { %v2048_v54 = vshrl.u32 %v2046_v51, 16  ;;  %v2047_v30 = vand.u32 65535, %v2046_v51 }
0x1665   : > { %v1453_v50 = vadd.s32 %v1452_v19, %v1451_v10 }
0x1666   : > { %v2050_v56 = vcvt.s32.f32 %v2048_v54  ;;  %v2049_v57 = vcvt.s32.f32 %v2047_v30 }
0x1668   : > { %2053 = vadd.xlane.f32.xlu1 %v2050_v56 }
0x166c   : > { %2051 = vadd.xlane.f32.xlu1 %v2049_v57 }
0x16b5   : > { %v1389_v39 = vpop.xlane.xlu0 %1388 }
0x16b6   : > { %v1390_v42 = vcvt.f32.s32 %v1389_v39 }
0x16b8   : > { %v1393_v1 = vadd.s32 %v1392_v47, %v1390_v42 }
0x16b9   : > { %v3208_v58 = vpop.xlane.xlu0 %1331 }
0x16ba   : > { %vm1333_vm0 = vcmp.eq.f32.partialorder %v1330_v31, %v3208_v58  ;;  %v1394_v44 = vsel %vm2877_vm7, %v1393_v1, 0  ;;  %v1338_v7 = vcvt.f32.s32 %v3208_v58 }
0x16bb   : > { %v1334_v8 = vsel %vm1333_vm0, %v1329_v62, inf  ;;  %v1395_v45 = vrot.slane %v1394_v44, 4 }
0x16bc   : > { %1335 = vmin.xlane.f32.xlu0 %v1334_v8 }
0x16bd   : > { %v1396_v14 = vadd.s32 %v1395_v45, %v1394_v44 }
0x16bf   : > { %v1397_v48 = vrot.slane %v1396_v14, 2 }
0x16c0   : > { %1278 = vmin.xlane.f32.xlu0 %v1277_v9 }
0x16c1   : > { %v1398_v60 = vadd.s32 %v1397_v48, %v1396_v14 }
0x16c3   : > { %v1399_v51 = vrot.slane %v1398_v60, 1 }
0x16c5   : > { %v1400_v16 = vadd.s32 %v1399_v51, %v1398_v60 }
0x16f5   : > { %v2054_v15 = vpop.xlane.xlu1 %2053 }
0x16f6   : > { %v2056_v55 = vcvt.f32.s32 %v2054_v15  ;;  %v1339_v15 = vshll.u32 %v1338_v7, 16 }
0x16f8   : > { %v2057_v17 = vshll.u32 %v2056_v55, 16 }
0x16f9   : > { %v2052_v18 = vpop.xlane.xlu1 %2051 }
0x16fa   : > { %v2055_v12 = vcvt.f32.s32 %v2052_v18 }
0x16fc   : > { %v2058_v21 = vadd.s32 %v2057_v17, %v2055_v12 }
0x16fe   : > { %v2060_v13 = vsel %vm2059_vm1, %v2058_v21, %v2043_v6  ;;  %vm2061_vm2 = vcmp.eq.s32.totalorder %v2798_v49, %v2058_v21  ;;  %vm2126_vm1 = vcmp.eq.s32.totalorder %v2798_v49, 3 }
0x16ff   : > { %v2062_v22 = vsel %vm2061_vm2, %v1453_v50, 0 }
0x1700   : > { %v2063_v38 = vsel %vm1902_vm15, %v2062_v22, 0 }
0x1701   : > { %v2065_v34 = vshrl.u32 %v2063_v38, 16  ;;  %v2064_v31 = vand.u32 65535, %v2063_v38 }
0x1703   : > { %v2067_v0 = vcvt.s32.f32 %v2065_v34  ;;  %v2066_v25 = vcvt.s32.f32 %v2064_v31 }
0x1705   : > { %2070 = vadd.xlane.f32.xlu1 %v2067_v0 }
0x1709   : > { %2068 = vadd.xlane.f32.xlu1 %v2066_v25 }
0x1749   : > { %v1336_v28 = vpop.xlane.xlu0 %1335 }
0x174a   : > { %v1337_v10 = vcvt.f32.s32 %v1336_v28 }
0x174c   : > { %v1340_v55 = vadd.s32 %v1339_v15, %v1337_v10 }
0x174d   : > { %v3220_v26 = vpop.xlane.xlu0 %1278 }
0x174e   : > { %vm1280_vm3 = vcmp.eq.f32.partialorder %v1277_v9, %v3220_v26  ;;  %v1341_v23 = vsel %vm2877_vm7, %v1340_v55, 0  ;;  %v1285_v45 = vcvt.f32.s32 %v3220_v26 }
0x174f   : > { %v1281_v32 = vsel %vm1280_vm3, %v1276_v27, inf  ;;  %v1342_v24 = vrot.slane %v1341_v23, 4 }
0x1750   : > { %1282 = vmin.xlane.f32.xlu0 %v1281_v32  ;;  %v1168_v32 = vand.u32 65535, %v1167_v11  ;;  %v1286_v48 = vshll.u32 %v1285_v45, 16 }
0x1751   : > { %v1343_v18 = vadd.s32 %v1342_v24, %v1341_v23 }
0x1752   : > { %v1170_v42 = vcvt.s32.f32 %v1168_v32 }
0x1753   : > { %v1344_v19 = vrot.slane %v1343_v18, 2 }
0x1754   : > { %1225 = vmin.xlane.f32.xlu0 %v1224_v33 }
0x1755   : > { %v1345_v17 = vadd.s32 %v1344_v19, %v1343_v18 }
0x1792   : > { %v2071_v35 = vpop.xlane.xlu1 %2070 }
0x1793   : > { %v2073_v6 = vcvt.f32.s32 %v2071_v35 }
0x1795   : > { %v2074_v54 = vshll.u32 %v2073_v6, 16 }
0x1796   : > { %v2069_v43 = vpop.xlane.xlu1 %2068 }
0x1797   : > { %v2072_v56 = vcvt.f32.s32 %v2069_v43 }
0x1799   : > { %v2075_v30 = vadd.s32 %v2074_v54, %v2072_v56 }
0x179b   : > { %v2077_v57 = vsel %vm2076_vm4, %v2075_v30, %v2060_v13  ;;  %vm2078_vm8 = vcmp.eq.s32.totalorder %v2798_v49, %v2075_v30  ;;  %v1346_v13 = vrot.slane %v1345_v17, 1  ;;  %vm2160_vm4 = vcmp.eq.s32.totalorder %v2798_v49, 1 }
0x179c   : > { %v2079_v39 = vsel %vm2078_vm8, %v1400_v16, 0 }
0x179d   : > { %v2080_v52 = vsel %vm1902_vm15, %v2079_v39, 0  ;;  %v1347_v0 = vadd.s32 %v1346_v13, %v1345_v17 }
0x179e   : > { %v2082_v53 = vshrl.u32 %v2080_v52, 16  ;;  %v2081_v63 = vand.u32 65535, %v2080_v52 }
0x17a0   : > { %v2084_v62 = vcvt.s32.f32 %v2082_v53  ;;  %v2083_v8 = vcvt.s32.f32 %v2081_v63 }
0x17a2   : > { %2087 = vadd.xlane.f32.xlu1 %v2084_v62 }
0x17a6   : > { %2085 = vadd.xlane.f32.xlu1 %v2083_v8 }
0x17dd   : > { %v1283_v9 = vpop.xlane.xlu0 %1282 }
0x17de   : > { %v1284_v14 = vcvt.f32.s32 %v1283_v9 }
0x17e0   : > { %v1287_v60 = vadd.s32 %v1286_v48, %v1284_v14 }
0x17e1   : > { %v3232_v36 = vpop.xlane.xlu0 %1225 }
0x17e2   : > { %vm1227_vm10 = vcmp.eq.f32.partialorder %v1224_v33, %v3232_v36  ;;  %v1114_v33 = vsel %vm1113_vm12, %v2798_v49, 128  ;;  %v1288_v4 = vsel %vm2877_vm7, %v1287_v60, 0  ;;  %v1232_v7 = vcvt.f32.s32 %v3232_v36 }
0x17e3   : > { %v1228_v3 = vsel %vm1227_vm10, %v1223_v40, inf  ;;  %v1116_v47 = vshra.s32 %v1114_v33, 16  ;;  %v1289_v5 = vrot.slane %v1288_v4, 4  ;;  %v1115_v11 = vand.u32 65535, %v1114_v33 }
0x17e4   : > { %1229 = vmin.xlane.f32.xlu0 %v1228_v3  ;;  %v1233_v15 = vshll.u32 %v1232_v7, 16 }
0x17e5   : > { %v1118_v44 = vcvt.s32.f32 %v1116_v47  ;;  %v1290_v35 = vadd.s32 %v1289_v5, %v1288_v4  ;;  %v1117_v3 = vcvt.s32.f32 %v1115_v11 }
0x17e7   : > { %v1291_v6 = vrot.slane %v1290_v35, 2 }
0x17e8   : > { %1172 = vmin.xlane.f32.xlu0 %v1171_v41 }
0x17e9   : > { %v1292_v43 = vadd.s32 %v1291_v6, %v1290_v35 }
0x17eb   : > { %v1293_v30 = vrot.slane %v1292_v43, 1 }
0x17ed   : > { %v1294_v26 = vadd.s32 %v1293_v30, %v1292_v43 }
0x182f   : > { %v2088_v12 = vpop.xlane.xlu1 %2087 }
0x1830   : > { %v2090_v21 = vcvt.f32.s32 %v2088_v12 }
0x1832   : > { %v2091_v22 = vshll.u32 %v2090_v21, 16 }
0x1833   : > { %v2086_v50 = vpop.xlane.xlu1 %2085 }
0x1834   : > { %v2089_v38 = vcvt.f32.s32 %v2086_v50 }
0x1836   : > { %v2092_v34 = vadd.s32 %v2091_v22, %v2089_v38 }
0x1838   : > { %v2093_v58 = vsel %vm1081_vm6, %v2092_v34, %v2077_v57  ;;  %vm2094_vm11 = vcmp.eq.s32.totalorder %v2798_v49, %v2092_v34 }
0x1839   : > { %v2095_v31 = vsel %vm2094_vm11, %v1347_v0, 0 }
0x183a   : > { %v2096_v25 = vsel %vm1902_vm15, %v2095_v31, 0 }
0x183b   : > { %v2098_v28 = vshrl.u32 %v2096_v25, 16  ;;  %v2097_v61 = vand.u32 65535, %v2096_v25 }
0x183d   : > { %v2100_v29 = vcvt.s32.f32 %v2098_v28  ;;  %v2099_v27 = vcvt.s32.f32 %v2097_v61 }
0x183f   : > { %2103 = vadd.xlane.f32.xlu1 %v2100_v29 }
0x1843   : > { %2101 = vadd.xlane.f32.xlu1 %v2099_v27 }
0x1871   : > { %v1230_v37 = vpop.xlane.xlu0 %1229 }
0x1872   : > { %v1231_v10 = vcvt.f32.s32 %v1230_v37 }
0x1874   : > { %v1234_v55 = vadd.s32 %v1233_v15, %v1231_v10 }
0x1875   : > { %v3245_v59 = vpop.xlane.xlu0 %1172 }
0x1876   : > { %vm1174_vm6 = vcmp.eq.f32.partialorder %v1171_v41, %v3245_v59  ;;  %v1235_v23 = vsel %vm2877_vm7, %v1234_v55, 0  ;;  %v1179_v27 = vcvt.f32.s32 %v3245_v59 }
0x1877   : > { %v1175_v1 = vsel %vm1174_vm6, %v1170_v42, inf  ;;  %v1236_v24 = vrot.slane %v1235_v23, 4 }
0x1878   : > { %1176 = vmin.xlane.f32.xlu0 %v1175_v1  ;;  %v1180_v32 = vshll.u32 %v1179_v27, 16 }
0x1879   : > { %v1237_v18 = vadd.s32 %v1236_v24, %v1235_v23 }
0x187b   : > { %v1238_v19 = vrot.slane %v1237_v18, 2 }
0x187c   : > { %1119 = vmin.xlane.f32.xlu0 %v1118_v44 }
0x187d   : > { %v1239_v17 = vadd.s32 %v1238_v19, %v1237_v18 }
0x187f   : > { %v1240_v13 = vrot.slane %v1239_v17, 1 }
0x1881   : > { %v1241_v36 = vadd.s32 %v1240_v13, %v1239_v17 }
0x18cc   : > { %v2104_v51 = vpop.xlane.xlu1 %2103 }
0x18cd   : > { %v2106_v54 = vcvt.f32.s32 %v2104_v51 }
0x18cf   : > { %v2107_v16 = vshll.u32 %v2106_v54, 16 }
0x18d0   : > { %v2102_v56 = vpop.xlane.xlu1 %2101 }
0x18d1   : > { %v2105_v57 = vcvt.f32.s32 %v2102_v56 }
0x18d3   : > { %v2108_v39 = vadd.s32 %v2107_v16, %v2105_v57 }
0x18d5   : > { %v2110_v52 = vsel %vm2109_vm13, %v2108_v39, %v2093_v58  ;;  %vm2111_vm14 = vcmp.eq.s32.totalorder %v2798_v49, %v2108_v39 }
0x18d6   : > { %v2112_v53 = vsel %vm2111_vm14, %v1294_v26, 0 }
0x18d7   : > { %v2113_v62 = vsel %vm1902_vm15, %v2112_v53, 0 }
0x18d8   : > { %v2115_v63 = vshrl.u32 %v2113_v62, 16  ;;  %v2114_v9 = vand.u32 65535, %v2113_v62 }
0x18da   : > { %v2117_v8 = vcvt.s32.f32 %v2115_v63  ;;  %v2116_v20 = vcvt.s32.f32 %v2114_v9 }
0x18dc   : > { %2120 = vadd.xlane.f32.xlu1 %v2117_v8 }
0x18e0   : > { %2118 = vadd.xlane.f32.xlu1 %v2116_v20 }
0x1905   : > { %v1177_v40 = vpop.xlane.xlu0 %1176 }
0x1906   : > { %v1178_v37 = vcvt.f32.s32 %v1177_v40 }
0x1908   : > { %v1181_v33 = vadd.s32 %v1180_v32, %v1178_v37 }
0x1909   : > { %v3254_v2 = vpop.xlane.xlu0 %1119 }
0x190a   : > { %vm1121_vm0 = vcmp.eq.f32.partialorder %v1118_v44, %v3254_v2  ;;  %v1182_v42 = vsel %vm2877_vm7, %v1181_v33, 0  ;;  %v1126_v26 = vcvt.f32.s32 %v3254_v2 }
0x190b   : > { %v1122_v41 = vsel %vm1121_vm0, %v1117_v3, inf  ;;  %v1183_v47 = vrot.slane %v1182_v42, 4 }
0x190c   : > { %1123 = vmin.xlane.f32.xlu0 %v1122_v41  ;;  %v1127_v53 = vshll.u32 %v1126_v26, 16 }
0x190d   : > { %v1184_v1 = vadd.s32 %v1183_v47, %v1182_v42 }
0x190f   : > { %v1185_v44 = vrot.slane %v1184_v1, 2 }
0x1911   : > { %v1186_v45 = vadd.s32 %v1185_v44, %v1184_v1 }
0x1913   : > { %v1187_v4 = vrot.slane %v1186_v45, 1 }
0x1915   : > { %v1188_v59 = vadd.s32 %v1187_v4, %v1186_v45 }
0x1969   : > { %v2121_v12 = vpop.xlane.xlu1 %2120 }
0x196a   : > { %v2123_v21 = vcvt.f32.s32 %v2121_v12 }
0x196c   : > { %v2124_v22 = vshll.u32 %v2123_v21, 16 }
0x196d   : > { %v2119_v50 = vpop.xlane.xlu1 %2118 }
0x196e   : > { %v2122_v38 = vcvt.f32.s32 %v2119_v50 }
0x1970   : > { %v2125_v34 = vadd.s32 %v2124_v22, %v2122_v38 }
0x1972   : > { %v2127_v0 = vsel %vm2126_vm1, %v2125_v34, %v2110_v52  ;;  %vm2128_vm2 = vcmp.eq.s32.totalorder %v2798_v49, %v2125_v34 }
0x1973   : > { %v2129_v58 = vsel %vm2128_vm2, %v1241_v36, 0 }
0x1974   : > { %v2130_v31 = vsel %vm1902_vm15, %v2129_v58, 0 }
0x1975   : > { %v2132_v25 = vshrl.u32 %v2130_v31, 16  ;;  %v2131_v29 = vand.u32 65535, %v2130_v31 }
0x1977   : > { %v2134_v28 = vcvt.s32.f32 %v2132_v25  ;;  %v2133_v61 = vcvt.s32.f32 %v2131_v29 }
0x1979   : > { %2137 = vadd.xlane.f32.xlu1 %v2134_v28 }
0x197d   : > { %2135 = vadd.xlane.f32.xlu1 %v2133_v61 }
0x1999   : > { %v1124_v39 = vpop.xlane.xlu0 %1123 }
0x199a   : > { %v1125_v52 = vcvt.f32.s32 %v1124_v39 }
0x199c   : > { %v1128_v62 = vadd.s32 %v1127_v53, %v1125_v52 }
0x199e   : > { %v1129_v63 = vsel %vm2877_vm7, %v1128_v62, 0  ;;  %vm2177_vm7 = vcmp.eq.s32.totalorder %v2798_v49, 0 }
0x199f   : > { %v1130_v8 = vrot.slane %v1129_v63, 4 }
0x19a1   : > { %v1131_v9 = vadd.s32 %v1130_v8, %v1129_v63 }
0x19a3   : > { %v1132_v20 = vrot.slane %v1131_v9, 2 }
0x19a5   : > { %v1133_v11 = vadd.s32 %v1132_v20, %v1131_v9 }
0x19a7   : > { %v1134_v7 = vrot.slane %v1133_v11, 1 }
0x19a9   : > { %v1135_v55 = vadd.s32 %v1134_v7, %v1133_v11 }
0x1a06   : > { %v2138_v14 = vpop.xlane.xlu1 %2137 }
0x1a07   : > { %v2140_v48 = vcvt.f32.s32 %v2138_v14 }
0x1a09   : > { %v2141_v5 = vshll.u32 %v2140_v48, 16 }
0x1a0a   : > { %v2136_v60 = vpop.xlane.xlu1 %2135 }
0x1a0b   : > { %v2139_v35 = vcvt.f32.s32 %v2136_v60 }
0x1a0d   : > { %v2142_v6 = vadd.s32 %v2141_v5, %v2139_v35 }
0x1a0f   : > { %v2144_v43 = vsel %vm2143_vm5, %v2142_v6, %v2127_v0  ;;  %vm2145_vm3 = vcmp.eq.s32.totalorder %v2798_v49, %v2142_v6 }
0x1a10   : > { %v2146_v51 = vsel %vm2145_vm3, %v1188_v59, 0 }
0x1a11   : > { %v2147_v54 = vsel %vm1902_vm15, %v2146_v51, 0 }
0x1a12   : > { %v2149_v56 = vshrl.u32 %v2147_v54, 16  ;;  %v2148_v30 = vand.u32 65535, %v2147_v54 }
0x1a14   : > { %v2151_v16 = vcvt.s32.f32 %v2149_v56  ;;  %v2150_v57 = vcvt.s32.f32 %v2148_v30 }
0x1a16   : > { %2154 = vadd.xlane.f32.xlu1 %v2151_v16  ;;  %2152 = vadd.xlane.f32.xlu0 %v2150_v57 }
0x1aa3   : > { %v2155_v40 = vpop.xlane.xlu1 %2154  ;;  %v2153_v3 = vpop.xlane.xlu0 %2152 }
0x1aa4   : > { %v2157_v41 = vcvt.f32.s32 %v2155_v40  ;;  %v2156_v15 = vcvt.f32.s32 %v2153_v3 }
0x1aa6   : > { %v2158_v10 = vshll.u32 %v2157_v41, 16 }
0x1aa8   : > { %v2159_v2 = vadd.s32 %v2158_v10, %v2156_v15 }
0x1aaa   : > { %vm2162_vm8 = vcmp.eq.s32.totalorder %v2798_v49, %v2159_v2  ;;  %v2161_v46 = vsel %vm2160_vm4, %v2159_v2, %v2144_v43 }
0x1aab   : > { %v2163_v23 = vsel %vm2162_vm8, %v1135_v55, 0 }
0x1aac   : > { %v2164_v24 = vsel %vm1902_vm15, %v2163_v23, 0 }
0x1aad   : > { %v2166_v18 = vshrl.u32 %v2164_v24, 16  ;;  %v2165_v19 = vand.u32 65535, %v2164_v24 }
0x1aaf   : > { %v2168_v17 = vcvt.s32.f32 %v2166_v18  ;;  %v2167_v12 = vcvt.s32.f32 %v2165_v19 }
0x1ab1   : > { %2171 = vadd.xlane.f32.xlu1 %v2168_v17  ;;  %2169 = vadd.xlane.f32.xlu0 %v2167_v12 }
0x1b3e   : > { %v2172_v21 = vpop.xlane.xlu1 %2171  ;;  %v2170_v50 = vpop.xlane.xlu0 %2169 }
0x1b3f   : > { %v2174_v13 = vcvt.f32.s32 %v2172_v21  ;;  %v2173_v38 = vcvt.f32.s32 %v2170_v50 }
0x1b41   : > { %v2175_v22 = vshll.u32 %v2174_v13, 16 }
0x1b43   : > { %v2176_v34 = vadd.s32 %v2175_v22, %v2173_v38 }
0x1b45   : > { %v2178_v36 = vsel %vm2177_vm7, %v2176_v34, %v2161_v46 }
0x1b46   : > { %2179 = vst [vmem:[%s169_s27 - $0x7] sm:$0x80] %v2178_v36 }
0x1b47   : > { %2579 = shalt.err (!%p2576_p4)
}
0x1b48   : > { %s2580_s13 = scalar_lea.hbm %s3281_s8, 16  ;;  %s2584_s17 = scalar_lea.hbm %s3327_s4, 32 }
0x1b49   : > { %p2581_p5 = scmp.ne.s32.totalorder %s3281_s8, %s2580_s13  ;;  %p2585_p8 = scmp.lt.u32.totalorder %s3281_s8, %s3327_s4 }
0x1b4a   : > { %p2586_p9 = scmp.lt.u32.totalorder %s2584_s17, %s2580_s13  ;;  %p2588_p13 = scmp.lt.u32.totalorder %s2580_s13, %s3281_s8 }
0x1b4b   : > { %p2582_p6 = pnand %p2581_p5, %p2710_p10 }
0x1b4c   : > { %p2587_p12 = por %p2586_p9, %p2585_p8 }
0x1b4d   : > { %p2583_p7 = pneg %p2582_p6 }
0x1b4e   : > { %p2589_p0 = por %p2588_p13, %p2587_p12 }
0x1b50   : > { %p2590_p1 = pnand %p2589_p0, %p2583_p7 }
0x1b52   : > { %2593 = shalt.err (!%p2590_p1)
}
0x1b53   : > { %2451 = dma.vmem_to_hbm [thread:$0]  (%p2710_p10), %s3283_s5, 16, %s3281_s8, %s2181_s9  }
0x1b54 PF: > { %p2457_p2 = scmp.ge.s32.totalorder %s2630_s22, 2  ;;  %s2205_s24 = sand.u32 1, %s2618_s20  }
0x1b55   : > { %s2206_s15 = scalar_lea.sflag [#allocation5], %s2205_s24 }
0x1b56   : > { %p2454_p3 = pnand %p2457_p2, %p2714_p11 }
0x1b58   : > { %2613 = dma.done.wait (!%p2454_p3), %s2206_s15, 16  }
0x1b59   : > { %2615 = vsyncadd (!%p2454_p3), %s2206_s15, 4294967280  ;;  %p20_p4 = scmp.ge.s32.totalorder %s2697_s25, 4   ;;  %s3334_s20 = smov %s2622_s21 }
0x1b5a   : > { %s3335_s21 = smov %s2626_s0  ;;  %s3336_s0 = smov %s2708_s28 }
0x1b5b   : > { %s3337_s22 = smov %s2697_s25  ;;  %22 = sbr.rel (!%p20_p4) target bundleno = 18 (0x12), region = 67 }
0x1b62   :  { %2210 = vsyncpa [#allocation5], 1 }
0x1b63   :  { %2212 = vsyncpa [#allocation5 + $0x1], 1 }

</bundles_post_ra>
